<compile_context>
chip_gen: v7x
topology: tpu7x:2x2x1
jax: 0.10.0
libtpu: 0.0.40
codegen_flags: <defaults>
</compile_context>

<pallas_src>
import functools

import jax
import jax.numpy as jnp
from jax import lax
from jax.experimental import pallas as pl
from jax.experimental.pallas import tpu as pltpu


# -----------------------------------------------------------------------------
# In-kernel helpers
# -----------------------------------------------------------------------------
def _shift_same(x, off, t_idx):
    """Return y with y[:, t] = x[:, t + off], zero-padded outside [0, T).

    `off` is a static Python int; the shift lowers to an XLU lane rotate plus a
    VPU select, keeping all operands lane-aligned (no 130-lane slabs).
    """
    if off == 0:
        return x
    T = x.shape[-1]
    shifted = pltpu.roll(x, shift=(-off) % T, axis=1)
    if off < 0:
        return jnp.where(t_idx >= -off, shifted, 0.0)
    return jnp.where(t_idx < T - off, shifted, 0.0)


# -----------------------------------------------------------------------------
# Pallas kernels
# -----------------------------------------------------------------------------
def _bottleneck_kernel(alpha_ref, x_ref, w_in_ref, b_in_ref, w_dw_ref, b_dw_ref,
                       w_rs_ref, b_rs_ref, *out_refs, X, ch, skip):
    """Fused BottleneckTCN stack (X dilated sub-blocks) for one batch element.

    alpha_ref: SMEM (2*X,)  per-sub-block PReLU slopes [a_in, a_dw]*X
    x_ref:     (1, ch, T)
    w_in_ref:  (X, mid, ch)        b_in_ref: (X, mid, 1)
    w_dw_ref:  (X, 3, mid, 1)      b_dw_ref: (X, mid, 1)
    w_rs_ref:  (X, rs_ch, mid)     b_rs_ref: (X, rs_ch, 1)   rs_ch = 2*ch (skip) or ch
    out_refs:  (1, ch, T) residual output [+ (1, ch, T) skip-sum output]
    """
    y_ref = out_refs[0]
    T = x_ref.shape[2]
    mid = w_in_ref.shape[1]

    x = x_ref[0].astype(jnp.float32)                       # (ch, T)
    skip_acc = jnp.zeros_like(x) if skip else None
    t_mid = lax.broadcasted_iota(jnp.int32, (mid, T), 1)   # hoisted out of loop

    for j in range(X):                                     # static unroll over sub-blocks
        d = 2 ** j
        a_in = alpha_ref[2 * j]
        a_dw = alpha_ref[2 * j + 1]

        # 1x1 bottleneck conv + PReLU (single MXU matmul).
        h = jnp.dot(w_in_ref[j], x, preferred_element_type=jnp.float32) + b_in_ref[j]
        h = jnp.where(h >= 0, h, a_in * h)

        # Dilated depthwise conv (k=3, 'same' zero padding) + bias + PReLU.
        dw = (w_dw_ref[j, 0] * _shift_same(h, -d, t_mid)
              + w_dw_ref[j, 1] * h
              + w_dw_ref[j, 2] * _shift_same(h, d, t_mid)
              + b_dw_ref[j])
        dw = jnp.where(dw >= 0, dw, a_dw * dw)

        # Fused residual(+skip) 1x1 conv: one matmul with C_out = rs_ch.
        rs = jnp.dot(w_rs_ref[j], dw, preferred_element_type=jnp.float32) + b_rs_ref[j]
        x = x + rs[:ch]
        if skip:
            skip_acc = skip_acc + rs[ch:]

    y_ref[0] = x.astype(y_ref.dtype)
    if skip:
        out_refs[1][0] = skip_acc.astype(out_refs[1].dtype)


def _fusion_kernel(alpha_ref, xi_ref, xa_ref, wi_ref, bi_ref, wa_ref, ba_ref,
                   yi_ref, ya_ref, *, K):
    """Fused LayerFusion for one batch element.

    alpha_ref: SMEM (2,)  PReLU slopes [a_inter, a_intra]
    xi_ref: (1, ci, T)    xa_ref: (1, ca, T)
    wi_ref: (ci, K*(ci+ca))  bi_ref: (ci, 1)   (im2col-flattened weights)
    wa_ref: (ca, K*(ci+ca))  ba_ref: (ca, 1)
    """
    T = xi_ref.shape[2]
    cat = jnp.concatenate([xi_ref[0], xa_ref[0]], axis=0).astype(jnp.float32)
    p = (K - 1) // 2
    t_idx = lax.broadcasted_iota(jnp.int32, cat.shape, 1)

    # im2col: stack K shifted copies along channels -> single big contraction.
    cols = [_shift_same(cat, k - p, t_idx) for k in range(K)]
    big = jnp.concatenate(cols, axis=0)                    # (K*(ci+ca), T)

    yi = jnp.dot(wi_ref[...], big, preferred_element_type=jnp.float32) + bi_ref[...]
    yi = jnp.where(yi >= 0, yi, alpha_ref[0] * yi)
    yi_ref[0] = yi.astype(yi_ref.dtype)

    ya = jnp.dot(wa_ref[...], big, preferred_element_type=jnp.float32) + ba_ref[...]
    ya = jnp.where(ya >= 0, ya, alpha_ref[1] * ya)
    ya_ref[0] = ya.astype(ya_ref.dtype)


# -----------------------------------------------------------------------------
# Pallas wrappers
# -----------------------------------------------------------------------------
def bottleneck_tcn(x, p, skip):
    """x: (B, ch, T); p: stacked per-stack params. Returns y or (y, skip_sum)."""
    B, ch, T = x.shape
    X, mid, _ = p["w_in"].shape
    rs_ch = p["w_rs"].shape[1]

    kernel = functools.partial(_bottleneck_kernel, X=X, ch=ch, skip=skip)
    out_shape = jax.ShapeDtypeStruct((B, ch, T), x.dtype)
    out_spec = pl.BlockSpec((1, ch, T), lambda b: (b, 0, 0))
    if skip:
        out_shapes = (out_shape, out_shape)
        out_specs = (out_spec, out_spec)
    else:
        out_shapes = out_shape
        out_specs = out_spec

    return pl.pallas_call(
        kernel,
        out_shape=out_shapes,
        grid=(B,),
        in_specs=[
            pl.BlockSpec(memory_space=pltpu.MemorySpace.SMEM),     # alphas
            pl.BlockSpec((1, ch, T), lambda b: (b, 0, 0)),         # x
            pl.BlockSpec((X, mid, ch), lambda b: (0, 0, 0)),       # w_in
            pl.BlockSpec((X, mid, 1), lambda b: (0, 0, 0)),        # b_in
            pl.BlockSpec((X, 3, mid, 1), lambda b: (0, 0, 0, 0)),  # w_dw
            pl.BlockSpec((X, mid, 1), lambda b: (0, 0, 0)),        # b_dw
            pl.BlockSpec((X, rs_ch, mid), lambda b: (0, 0, 0)),    # w_rs (res|skip)
            pl.BlockSpec((X, rs_ch, 1), lambda b: (0, 0, 0)),      # b_rs
        ],
        out_specs=out_specs,
        compiler_params=pltpu.CompilerParams(dimension_semantics=("parallel",)),
    )(p["alphas"], x, p["w_in"], p["b_in"], p["w_dw"], p["b_dw"],
      p["w_rs"], p["b_rs"])


def layer_fusion(x_inter, x_intra, fp):
    """Fused LayerFusion: concat channels, K-tap 'same' conv per path, PReLU."""
    B, ci, T = x_inter.shape
    _, ca, _ = x_intra.shape
    K = fp["w_i"].shape[1] // (ci + ca)

    kernel = functools.partial(_fusion_kernel, K=K)
    return pl.pallas_call(
        kernel,
        out_shape=(jax.ShapeDtypeStruct((B, ci, T), x_inter.dtype),
                   jax.ShapeDtypeStruct((B, ca, T), x_intra.dtype)),
        grid=(B,),
        in_specs=[
            pl.BlockSpec(memory_space=pltpu.MemorySpace.SMEM),         # alphas
            pl.BlockSpec((1, ci, T), lambda b: (b, 0, 0)),
            pl.BlockSpec((1, ca, T), lambda b: (b, 0, 0)),
            pl.BlockSpec((ci, K * (ci + ca)), lambda b: (0, 0)),
            pl.BlockSpec((ci, 1), lambda b: (0, 0)),
            pl.BlockSpec((ca, K * (ci + ca)), lambda b: (0, 0)),
            pl.BlockSpec((ca, 1), lambda b: (0, 0)),
        ],
        out_specs=(pl.BlockSpec((1, ci, T), lambda b: (b, 0, 0)),
                   pl.BlockSpec((1, ca, T), lambda b: (b, 0, 0))),
        compiler_params=pltpu.CompilerParams(dimension_semantics=("parallel",)),
    )(fp["alphas"], x_inter, x_intra, fp["w_i"], fp["b_i"], fp["w_a"], fp["b_a"])


# -----------------------------------------------------------------------------
# Module forward logic (mirrors the PyTorch control flow)
# -----------------------------------------------------------------------------
def tcn_separation_part(x_inter, x_intra, params, cfg):
    skip = cfg["SKIP"]
    n = cfg["N"]
    if not skip:
        for i in range(n):
            blk = params["blocks"][i]
            x_inter = bottleneck_tcn(x_inter, blk["inter"], False)
            x_intra = bottleneck_tcn(x_intra, blk["intra"], False)
            x_inter, x_intra = layer_fusion(x_inter, x_intra, blk["fuse"])
        return [x_inter, x_intra]
    # skip path: [[x_inter, 0], [x_intra, 0]] threaded through the blocks.
    inter_skip = jnp.zeros_like(x_inter)
    intra_skip = jnp.zeros_like(x_intra)
    for i in range(n):
        final = i == n - 1
        blk = params["blocks"][i]
        x_inter, s = bottleneck_tcn(x_inter, blk["inter"], True)
        inter_skip = inter_skip + s
        x_intra, s = bottleneck_tcn(x_intra, blk["intra"], True)
        intra_skip = intra_skip + s
        if not final:
            x_inter, x_intra = layer_fusion(x_inter, x_intra, blk["fuse"])
        # final block: fuse == nn.Identity
    return [inter_skip, intra_skip]


# -----------------------------------------------------------------------------
# Deterministic parameter initialization (weights pre-packed for the kernels)
# -----------------------------------------------------------------------------
def init_tcn_stack(key, ch, mid, x_blocks, skip, scale=0.1):
    key, *ks = jax.random.split(key, 7)
    w_in = scale * jax.random.normal(ks[0], (x_blocks, mid, ch), jnp.float32)
    b_in = scale * jax.random.normal(ks[1], (x_blocks, mid, 1), jnp.float32)
    w_dw = scale * jax.random.normal(ks[2], (x_blocks, 3, mid, 1), jnp.float32)
    b_dw = scale * jax.random.normal(ks[3], (x_blocks, mid, 1), jnp.float32)
    w_res = scale * jax.random.normal(ks[4], (x_blocks, ch, mid), jnp.float32)
    b_res = jnp.zeros((x_blocks, ch, 1), jnp.float32)
    if skip:
        w_skp = scale * jax.random.normal(ks[5], (x_blocks, ch, mid), jnp.float32)
        b_skp = jnp.zeros((x_blocks, ch, 1), jnp.float32)
        w_rs = jnp.concatenate([w_res, w_skp], axis=1)   # fused res|skip matmul
        b_rs = jnp.concatenate([b_res, b_skp], axis=1)
    else:
        w_rs, b_rs = w_res, b_res
    # TODO(synk): scalar PReLU slopes (nn.PReLU default); per-channel would need
    # (X, mid) slope arrays instead.
    alphas = jnp.full((2 * x_blocks,), 0.25, jnp.float32)
    return {"w_in": w_in, "b_in": b_in, "w_dw": w_dw, "b_dw": b_dw,
            "w_rs": w_rs, "b_rs": b_rs, "alphas": alphas}


def init_fusion(key, ci, ca, k_trans, scale=0.1):
    k1, k2, k3, k4 = jax.random.split(key, 4)
    w_i = scale * jax.random.normal(k1, (k_trans, ci, ci + ca), jnp.float32)
    b_i = scale * jax.random.normal(k2, (ci, 1), jnp.float32)
    w_a = scale * jax.random.normal(k3, (k_trans, ca, ci + ca), jnp.float32)
    b_a = scale * jax.random.normal(k4, (ca, 1), jnp.float32)
    # im2col weight layout: (C_out, K*C_in), tap-major along the contraction.
    w_i = jnp.transpose(w_i, (1, 0, 2)).reshape(ci, k_trans * (ci + ca))
    w_a = jnp.transpose(w_a, (1, 0, 2)).reshape(ca, k_trans * (ci + ca))
    return {"w_i": w_i, "b_i": b_i, "w_a": w_a, "b_a": b_a,
            "alphas": jnp.full((2,), 0.25, jnp.float32)}


def init_params(key, cfg):
    # TODO(synk): fused LayerFusion assumes 'same' padding; other PADDING values
    # change T between blocks and are not supported by this kernel.
    assert cfg["PADDING"] == (cfg["K_TRANS"] - 1) // 2
    ci, ca = cfg["C_INTER"], cfg["C_INTRA"]
    cim, cam = cfg["C_INTER_MID"], cfg["C_INTRA_MID"]
    blocks = []
    for i in range(cfg["N"]):
        key, k_inter, k_intra, k_fuse = jax.random.split(key, 4)
        blk = {
            "inter": init_tcn_stack(k_inter, ci, cim, cfg["X"][i], cfg["SKIP"]),
            "intra": init_tcn_stack(k_intra, ca, cam, cfg["X"][i], cfg["SKIP"]),
        }
        final = i == cfg["N"] - 1
        if (not cfg["SKIP"]) or (not final):
            blk["fuse"] = init_fusion(k_fuse, ci, ca, cfg["K_TRANS"])
        blocks.append(blk)
    return {"blocks": blocks}


# -----------------------------------------------------------------------------
if __name__ == "__main__":
    cfg = dict(C_INTER=8, C_INTRA=16, C_INTER_MID=16, C_INTRA_MID=16,
               N=2, X=[2, 2], K_TRANS=3, PADDING=1, SKIP=True)
    B, T = 2, 128

    key = jax.random.PRNGKey(0)
    kx, ky, kp = jax.random.split(key, 3)
    x_inter = jax.random.normal(kx, (B, cfg["C_INTER"], T), jnp.float32)
    x_intra = jax.random.normal(ky, (B, cfg["C_INTRA"], T), jnp.float32)
    params = init_params(kp, cfg)

    fwd = jax.jit(functools.partial(tcn_separation_part, cfg=cfg))
    out_inter, out_intra = fwd(x_inter, x_intra, params)
    out_inter = jax.block_until_ready(out_inter)
    out_intra = jax.block_until_ready(out_intra)

    assert out_inter.shape == x_inter.shape, out_inter.shape
    assert out_intra.shape == x_intra.shape, out_intra.shape
    assert bool(jnp.all(jnp.isfinite(out_inter)))
    assert bool(jnp.all(jnp.isfinite(out_intra)))
    print("KERNEL_OK")
</pallas_src>

<mosaic_0001>
module attributes {stable_mosaic.version = 11 : i64} {
  func.func @_bottleneck_kernel(%arg0: i32, %arg1: memref<4xf32, #tpu.memory_space<smem>>, %arg2: memref<1x8x128xf32, #tpu.memory_space<vmem>>, %arg3: memref<2x16x8xf32, #tpu.memory_space<vmem>>, %arg4: memref<2x16x1xf32, #tpu.memory_space<vmem>>, %arg5: memref<2x3x16x1xf32, #tpu.memory_space<vmem>>, %arg6: memref<2x16x1xf32, #tpu.memory_space<vmem>>, %arg7: memref<2x16x16xf32, #tpu.memory_space<vmem>>, %arg8: memref<2x16x1xf32, #tpu.memory_space<vmem>>, %arg9: memref<1x8x128xf32, #tpu.memory_space<vmem>>, %arg10: memref<1x8x128xf32, #tpu.memory_space<vmem>>) attributes {dimension_semantics = [#tpu.dimension_semantics<parallel>], iteration_bounds = array<i64: 2>, scalar_prefetch = 0 : i64, scratch_operands = 0 : i64, tpu.core_type = #tpu.core_type<tc>, window_params = [{transform_indices = @transform_0, window_bounds = array<i64: 4>}, {transform_indices = @transform_1, window_bounds = array<i64: 1, 8, 128>}, {pipeline_mode = #tpu.pipeline_mode<synchronous>, transform_indices = @transform_2, window_bounds = array<i64: 2, 16, 8>}, {pipeline_mode = #tpu.pipeline_mode<synchronous>, transform_indices = @transform_3, window_bounds = array<i64: 2, 16, 1>}, {pipeline_mode = #tpu.pipeline_mode<synchronous>, transform_indices = @transform_4, window_bounds = array<i64: 2, 3, 16, 1>}, {pipeline_mode = #tpu.pipeline_mode<synchronous>, transform_indices = @transform_5, window_bounds = array<i64: 2, 16, 1>}, {pipeline_mode = #tpu.pipeline_mode<synchronous>, transform_indices = @transform_6, window_bounds = array<i64: 2, 16, 16>}, {pipeline_mode = #tpu.pipeline_mode<synchronous>, transform_indices = @transform_7, window_bounds = array<i64: 2, 16, 1>}, {transform_indices = @transform_8, window_bounds = array<i64: 1, 8, 128>}, {transform_indices = @transform_9, window_bounds = array<i64: 1, 8, 128>}]} {
    %c0 = arith.constant 0 : index
    %c0_0 = arith.constant 0 : index
    %c0_1 = arith.constant 0 : index
    %0 = vector.load %arg2[%c0, %c0_0, %c0_1] : memref<1x8x128xf32, #tpu.memory_space<vmem>>, vector<1x8x128xf32>
    %1 = vector.shape_cast %0 : vector<1x8x128xf32> to vector<8x128xf32>
    %cst = arith.constant 0.000000e+00 : f32
    %2 = vector.broadcast %cst : f32 to vector<8x128xf32>
    %3 = tpu.iota {dimensions = array<i32: 1>} : vector<16x128xi32>
    %c0_2 = arith.constant 0 : index
    %4 = memref.load %arg1[%c0_2] : memref<4xf32, #tpu.memory_space<smem>>
    %c1 = arith.constant 1 : index
    %5 = memref.load %arg1[%c1] : memref<4xf32, #tpu.memory_space<smem>>
    %c0_3 = arith.constant 0 : index
    %c0_4 = arith.constant 0 : index
    %c0_5 = arith.constant 0 : index
    %6 = vector.load %arg3[%c0_3, %c0_4, %c0_5] : memref<2x16x8xf32, #tpu.memory_space<vmem>>, vector<1x16x8xf32>
    %7 = vector.shape_cast %6 : vector<1x16x8xf32> to vector<16x8xf32>
    %cst_6 = arith.constant dense<0.000000e+00> : vector<16x128xf32>
    %8 = tpu.matmul %7, %1, %cst_6 {dimension_numbers = #tpu.dot_dimension_numbers<[1], [0], [0], [1], [0, 0, 1, 1], [], []>} : vector<16x8xf32>, vector<8x128xf32>, vector<16x128xf32> -> vector<16x128xf32>
    %c0_7 = arith.constant 0 : index
    %c0_8 = arith.constant 0 : index
    %c0_9 = arith.constant 0 : index
    %9 = vector.load %arg4[%c0_7, %c0_8, %c0_9] : memref<2x16x1xf32, #tpu.memory_space<vmem>>, vector<1x16x1xf32>
    %10 = vector.shape_cast %9 : vector<1x16x1xf32> to vector<16x1xf32>
    %11 = vector.broadcast %10 : vector<16x1xf32> to vector<16x128xf32>
    %12 = arith.addf %8, %11 : vector<16x128xf32>
    %cst_10 = arith.constant 0.000000e+00 : f32
    %13 = vector.broadcast %cst_10 : f32 to vector<16x128xf32>
    %14 = arith.cmpf oge, %12, %13 : vector<16x128xf32>
    %15 = vector.broadcast %4 : f32 to vector<16x128xf32>
    %16 = arith.mulf %15, %12 : vector<16x128xf32>
    %17 = arith.select %14, %12, %16 : vector<16x128xi1>, vector<16x128xf32>
    %c0_11 = arith.constant 0 : index
    %c0_12 = arith.constant 0 : index
    %c0_13 = arith.constant 0 : index
    %c0_14 = arith.constant 0 : index
    %18 = vector.load %arg5[%c0_11, %c0_12, %c0_13, %c0_14] : memref<2x3x16x1xf32, #tpu.memory_space<vmem>>, vector<1x1x16x1xf32>
    %19 = vector.shape_cast %18 : vector<1x1x16x1xf32> to vector<16x1xf32>
    %c1_i32 = arith.constant 1 : i32
    %20 = tpu.dynamic_rotate %17 by %c1_i32 dim 1 : vector<16x128xf32>, i32 -> vector<16x128xf32>
    %c1_i32_15 = arith.constant 1 : i32
    %21 = vector.broadcast %c1_i32_15 : i32 to vector<16x128xi32>
    %22 = arith.cmpi sge, %3, %21 : vector<16x128xi32>
    %cst_16 = arith.constant 0.000000e+00 : f32
    %23 = vector.broadcast %cst_16 : f32 to vector<16x128xf32>
    %24 = arith.select %22, %20, %23 : vector<16x128xi1>, vector<16x128xf32>
    %25 = vector.broadcast %19 : vector<16x1xf32> to vector<16x128xf32>
    %26 = arith.mulf %25, %24 : vector<16x128xf32>
    %c0_17 = arith.constant 0 : index
    %c1_18 = arith.constant 1 : index
    %c0_19 = arith.constant 0 : index
    %c0_20 = arith.constant 0 : index
    %27 = vector.load %arg5[%c0_17, %c1_18, %c0_19, %c0_20] : memref<2x3x16x1xf32, #tpu.memory_space<vmem>>, vector<1x1x16x1xf32>
    %28 = vector.shape_cast %27 : vector<1x1x16x1xf32> to vector<16x1xf32>
    %29 = vector.broadcast %28 : vector<16x1xf32> to vector<16x128xf32>
    %30 = arith.mulf %29, %17 : vector<16x128xf32>
    %31 = arith.addf %26, %30 : vector<16x128xf32>
    %c0_21 = arith.constant 0 : index
    %c2 = arith.constant 2 : index
    %c0_22 = arith.constant 0 : index
    %c0_23 = arith.constant 0 : index
    %32 = vector.load %arg5[%c0_21, %c2, %c0_22, %c0_23] : memref<2x3x16x1xf32, #tpu.memory_space<vmem>>, vector<1x1x16x1xf32>
    %33 = vector.shape_cast %32 : vector<1x1x16x1xf32> to vector<16x1xf32>
    %c127_i32 = arith.constant 127 : i32
    %34 = tpu.dynamic_rotate %17 by %c127_i32 dim 1 : vector<16x128xf32>, i32 -> vector<16x128xf32>
    %c127_i32_24 = arith.constant 127 : i32
    %35 = vector.broadcast %c127_i32_24 : i32 to vector<16x128xi32>
    %36 = arith.cmpi slt, %3, %35 : vector<16x128xi32>
    %cst_25 = arith.constant 0.000000e+00 : f32
    %37 = vector.broadcast %cst_25 : f32 to vector<16x128xf32>
    %38 = arith.select %36, %34, %37 : vector<16x128xi1>, vector<16x128xf32>
    %39 = vector.broadcast %33 : vector<16x1xf32> to vector<16x128xf32>
    %40 = arith.mulf %39, %38 : vector<16x128xf32>
    %41 = arith.addf %31, %40 : vector<16x128xf32>
    %c0_26 = arith.constant 0 : index
    %c0_27 = arith.constant 0 : index
    %c0_28 = arith.constant 0 : index
    %42 = vector.load %arg6[%c0_26, %c0_27, %c0_28] : memref<2x16x1xf32, #tpu.memory_space<vmem>>, vector<1x16x1xf32>
    %43 = vector.shape_cast %42 : vector<1x16x1xf32> to vector<16x1xf32>
    %44 = vector.broadcast %43 : vector<16x1xf32> to vector<16x128xf32>
    %45 = arith.addf %41, %44 : vector<16x128xf32>
    %cst_29 = arith.constant 0.000000e+00 : f32
    %46 = vector.broadcast %cst_29 : f32 to vector<16x128xf32>
    %47 = arith.cmpf oge, %45, %46 : vector<16x128xf32>
    %48 = vector.broadcast %5 : f32 to vector<16x128xf32>
    %49 = arith.mulf %48, %45 : vector<16x128xf32>
    %50 = arith.select %47, %45, %49 : vector<16x128xi1>, vector<16x128xf32>
    %c0_30 = arith.constant 0 : index
    %c0_31 = arith.constant 0 : index
    %c0_32 = arith.constant 0 : index
    %51 = vector.load %arg7[%c0_30, %c0_31, %c0_32] : memref<2x16x16xf32, #tpu.memory_space<vmem>>, vector<1x16x16xf32>
    %52 = vector.shape_cast %51 : vector<1x16x16xf32> to vector<16x16xf32>
    %cst_33 = arith.constant dense<0.000000e+00> : vector<16x128xf32>
    %53 = tpu.matmul %52, %50, %cst_33 {dimension_numbers = #tpu.dot_dimension_numbers<[1], [0], [0], [1], [0, 0, 1, 1], [], []>} : vector<16x16xf32>, vector<16x128xf32>, vector<16x128xf32> -> vector<16x128xf32>
    %c0_34 = arith.constant 0 : index
    %c0_35 = arith.constant 0 : index
    %c0_36 = arith.constant 0 : index
    %54 = vector.load %arg8[%c0_34, %c0_35, %c0_36] : memref<2x16x1xf32, #tpu.memory_space<vmem>>, vector<1x16x1xf32>
    %55 = vector.shape_cast %54 : vector<1x16x1xf32> to vector<16x1xf32>
    %56 = vector.broadcast %55 : vector<16x1xf32> to vector<16x128xf32>
    %57 = arith.addf %53, %56 : vector<16x128xf32>
    %58 = vector.extract_strided_slice %57 {offsets = [0, 0], sizes = [8, 128], strides = [1, 1]} : vector<16x128xf32> to vector<8x128xf32>
    %59 = arith.addf %1, %58 : vector<8x128xf32>
    %60 = vector.extract_strided_slice %57 {offsets = [8, 0], sizes = [8, 128], strides = [1, 1]} : vector<16x128xf32> to vector<8x128xf32>
    %61 = arith.addf %2, %60 : vector<8x128xf32>
    %c2_37 = arith.constant 2 : index
    %62 = memref.load %arg1[%c2_37] : memref<4xf32, #tpu.memory_space<smem>>
    %c3 = arith.constant 3 : index
    %63 = memref.load %arg1[%c3] : memref<4xf32, #tpu.memory_space<smem>>
    %c1_38 = arith.constant 1 : index
    %c0_39 = arith.constant 0 : index
    %c0_40 = arith.constant 0 : index
    %64 = vector.load %arg3[%c1_38, %c0_39, %c0_40] : memref<2x16x8xf32, #tpu.memory_space<vmem>>, vector<1x16x8xf32>
    %65 = vector.shape_cast %64 : vector<1x16x8xf32> to vector<16x8xf32>
    %cst_41 = arith.constant dense<0.000000e+00> : vector<16x128xf32>
    %66 = tpu.matmul %65, %59, %cst_41 {dimension_numbers = #tpu.dot_dimension_numbers<[1], [0], [0], [1], [0, 0, 1, 1], [], []>} : vector<16x8xf32>, vector<8x128xf32>, vector<16x128xf32> -> vector<16x128xf32>
    %c1_42 = arith.constant 1 : index
    %c0_43 = arith.constant 0 : index
    %c0_44 = arith.constant 0 : index
    %67 = vector.load %arg4[%c1_42, %c0_43, %c0_44] : memref<2x16x1xf32, #tpu.memory_space<vmem>>, vector<1x16x1xf32>
    %68 = vector.shape_cast %67 : vector<1x16x1xf32> to vector<16x1xf32>
    %69 = vector.broadcast %68 : vector<16x1xf32> to vector<16x128xf32>
    %70 = arith.addf %66, %69 : vector<16x128xf32>
    %cst_45 = arith.constant 0.000000e+00 : f32
    %71 = vector.broadcast %cst_45 : f32 to vector<16x128xf32>
    %72 = arith.cmpf oge, %70, %71 : vector<16x128xf32>
    %73 = vector.broadcast %62 : f32 to vector<16x128xf32>
    %74 = arith.mulf %73, %70 : vector<16x128xf32>
    %75 = arith.select %72, %70, %74 : vector<16x128xi1>, vector<16x128xf32>
    %c1_46 = arith.constant 1 : index
    %c0_47 = arith.constant 0 : index
    %c0_48 = arith.constant 0 : index
    %c0_49 = arith.constant 0 : index
    %76 = vector.load %arg5[%c1_46, %c0_47, %c0_48, %c0_49] : memref<2x3x16x1xf32, #tpu.memory_space<vmem>>, vector<1x1x16x1xf32>
    %77 = vector.shape_cast %76 : vector<1x1x16x1xf32> to vector<16x1xf32>
    %c2_i32 = arith.constant 2 : i32
    %78 = tpu.dynamic_rotate %75 by %c2_i32 dim 1 : vector<16x128xf32>, i32 -> vector<16x128xf32>
    %c2_i32_50 = arith.constant 2 : i32
    %79 = vector.broadcast %c2_i32_50 : i32 to vector<16x128xi32>
    %80 = arith.cmpi sge, %3, %79 : vector<16x128xi32>
    %cst_51 = arith.constant 0.000000e+00 : f32
    %81 = vector.broadcast %cst_51 : f32 to vector<16x128xf32>
    %82 = arith.select %80, %78, %81 : vector<16x128xi1>, vector<16x128xf32>
    %83 = vector.broadcast %77 : vector<16x1xf32> to vector<16x128xf32>
    %84 = arith.mulf %83, %82 : vector<16x128xf32>
    %c1_52 = arith.constant 1 : index
    %c1_53 = arith.constant 1 : index
    %c0_54 = arith.constant 0 : index
    %c0_55 = arith.constant 0 : index
    %85 = vector.load %arg5[%c1_52, %c1_53, %c0_54, %c0_55] : memref<2x3x16x1xf32, #tpu.memory_space<vmem>>, vector<1x1x16x1xf32>
    %86 = vector.shape_cast %85 : vector<1x1x16x1xf32> to vector<16x1xf32>
    %87 = vector.broadcast %86 : vector<16x1xf32> to vector<16x128xf32>
    %88 = arith.mulf %87, %75 : vector<16x128xf32>
    %89 = arith.addf %84, %88 : vector<16x128xf32>
    %c1_56 = arith.constant 1 : index
    %c2_57 = arith.constant 2 : index
    %c0_58 = arith.constant 0 : index
    %c0_59 = arith.constant 0 : index
    %90 = vector.load %arg5[%c1_56, %c2_57, %c0_58, %c0_59] : memref<2x3x16x1xf32, #tpu.memory_space<vmem>>, vector<1x1x16x1xf32>
    %91 = vector.shape_cast %90 : vector<1x1x16x1xf32> to vector<16x1xf32>
    %c126_i32 = arith.constant 126 : i32
    %92 = tpu.dynamic_rotate %75 by %c126_i32 dim 1 : vector<16x128xf32>, i32 -> vector<16x128xf32>
    %c126_i32_60 = arith.constant 126 : i32
    %93 = vector.broadcast %c126_i32_60 : i32 to vector<16x128xi32>
    %94 = arith.cmpi slt, %3, %93 : vector<16x128xi32>
    %cst_61 = arith.constant 0.000000e+00 : f32
    %95 = vector.broadcast %cst_61 : f32 to vector<16x128xf32>
    %96 = arith.select %94, %92, %95 : vector<16x128xi1>, vector<16x128xf32>
    %97 = vector.broadcast %91 : vector<16x1xf32> to vector<16x128xf32>
    %98 = arith.mulf %97, %96 : vector<16x128xf32>
    %99 = arith.addf %89, %98 : vector<16x128xf32>
    %c1_62 = arith.constant 1 : index
    %c0_63 = arith.constant 0 : index
    %c0_64 = arith.constant 0 : index
    %100 = vector.load %arg6[%c1_62, %c0_63, %c0_64] : memref<2x16x1xf32, #tpu.memory_space<vmem>>, vector<1x16x1xf32>
    %101 = vector.shape_cast %100 : vector<1x16x1xf32> to vector<16x1xf32>
    %102 = vector.broadcast %101 : vector<16x1xf32> to vector<16x128xf32>
    %103 = arith.addf %99, %102 : vector<16x128xf32>
    %cst_65 = arith.constant 0.000000e+00 : f32
    %104 = vector.broadcast %cst_65 : f32 to vector<16x128xf32>
    %105 = arith.cmpf oge, %103, %104 : vector<16x128xf32>
    %106 = vector.broadcast %63 : f32 to vector<16x128xf32>
    %107 = arith.mulf %106, %103 : vector<16x128xf32>
    %108 = arith.select %105, %103, %107 : vector<16x128xi1>, vector<16x128xf32>
    %c1_66 = arith.constant 1 : index
    %c0_67 = arith.constant 0 : index
    %c0_68 = arith.constant 0 : index
    %109 = vector.load %arg7[%c1_66, %c0_67, %c0_68] : memref<2x16x16xf32, #tpu.memory_space<vmem>>, vector<1x16x16xf32>
    %110 = vector.shape_cast %109 : vector<1x16x16xf32> to vector<16x16xf32>
    %cst_69 = arith.constant dense<0.000000e+00> : vector<16x128xf32>
    %111 = tpu.matmul %110, %108, %cst_69 {dimension_numbers = #tpu.dot_dimension_numbers<[1], [0], [0], [1], [0, 0, 1, 1], [], []>} : vector<16x16xf32>, vector<16x128xf32>, vector<16x128xf32> -> vector<16x128xf32>
    %c1_70 = arith.constant 1 : index
    %c0_71 = arith.constant 0 : index
    %c0_72 = arith.constant 0 : index
    %112 = vector.load %arg8[%c1_70, %c0_71, %c0_72] : memref<2x16x1xf32, #tpu.memory_space<vmem>>, vector<1x16x1xf32>
    %113 = vector.shape_cast %112 : vector<1x16x1xf32> to vector<16x1xf32>
    %114 = vector.broadcast %113 : vector<16x1xf32> to vector<16x128xf32>
    %115 = arith.addf %111, %114 : vector<16x128xf32>
    %116 = vector.extract_strided_slice %115 {offsets = [0, 0], sizes = [8, 128], strides = [1, 1]} : vector<16x128xf32> to vector<8x128xf32>
    %117 = arith.addf %59, %116 : vector<8x128xf32>
    %118 = vector.extract_strided_slice %115 {offsets = [8, 0], sizes = [8, 128], strides = [1, 1]} : vector<16x128xf32> to vector<8x128xf32>
    %119 = arith.addf %61, %118 : vector<8x128xf32>
    %c0_73 = arith.constant 0 : index
    %c0_74 = arith.constant 0 : index
    %c0_75 = arith.constant 0 : index
    %120 = vector.load %arg9[%c0_73, %c0_74, %c0_75] : memref<1x8x128xf32, #tpu.memory_space<vmem>>, vector<1x8x128xf32>
    %121 = vector.shape_cast %120 : vector<1x8x128xf32> to vector<8x128xf32>
    %122 = vector.shape_cast %117 : vector<8x128xf32> to vector<1x8x128xf32>
    tpu.vector_store %arg9[%c0_73, %c0_74, %c0_75], %122 {strides = array<i32>} : memref<1x8x128xf32, #tpu.memory_space<vmem>>, vector<1x8x128xf32>,
    %c0_76 = arith.constant 0 : index
    %c0_77 = arith.constant 0 : index
    %c0_78 = arith.constant 0 : index
    %123 = vector.load %arg10[%c0_76, %c0_77, %c0_78] : memref<1x8x128xf32, #tpu.memory_space<vmem>>, vector<1x8x128xf32>
    %124 = vector.shape_cast %123 : vector<1x8x128xf32> to vector<8x128xf32>
    %125 = vector.shape_cast %119 : vector<8x128xf32> to vector<1x8x128xf32>
    tpu.vector_store %arg10[%c0_76, %c0_77, %c0_78], %125 {strides = array<i32>} : memref<1x8x128xf32, #tpu.memory_space<vmem>>, vector<1x8x128xf32>,
    return
  }
  func.func @transform_0(%arg0: i32) -> i32 {
    %c0_i32 = arith.constant 0 : i32
    %c0_i32_0 = arith.constant 0 : i32
    return %c0_i32 : i32
  }
  func.func @transform_1(%arg0: i32) -> (i32, i32, i32) {
    %c0_i32 = arith.constant 0 : i32
    %c0_i32_0 = arith.constant 0 : i32
    %c0_i32_1 = arith.constant 0 : i32
    return %arg0, %c0_i32, %c0_i32_0 : i32, i32, i32
  }
  func.func @transform_2(%arg0: i32) -> (i32, i32, i32) {
    %c0_i32 = arith.constant 0 : i32
    %c0_i32_0 = arith.constant 0 : i32
    %c0_i32_1 = arith.constant 0 : i32
    %c0_i32_2 = arith.constant 0 : i32
    return %c0_i32, %c0_i32_0, %c0_i32_1 : i32, i32, i32
  }
  func.func @transform_3(%arg0: i32) -> (i32, i32, i32) {
    %c0_i32 = arith.constant 0 : i32
    %c0_i32_0 = arith.constant 0 : i32
    %c0_i32_1 = arith.constant 0 : i32
    %c0_i32_2 = arith.constant 0 : i32
    return %c0_i32, %c0_i32_0, %c0_i32_1 : i32, i32, i32
  }
  func.func @transform_4(%arg0: i32) -> (i32, i32, i32, i32) {
    %c0_i32 = arith.constant 0 : i32
    %c0_i32_0 = arith.constant 0 : i32
    %c0_i32_1 = arith.constant 0 : i32
    %c0_i32_2 = arith.constant 0 : i32
    %c0_i32_3 = arith.constant 0 : i32
    return %c0_i32, %c0_i32_0, %c0_i32_1, %c0_i32_2 : i32, i32, i32, i32
  }
  func.func @transform_5(%arg0: i32) -> (i32, i32, i32) {
    %c0_i32 = arith.constant 0 : i32
    %c0_i32_0 = arith.constant 0 : i32
    %c0_i32_1 = arith.constant 0 : i32
    %c0_i32_2 = arith.constant 0 : i32
    return %c0_i32, %c0_i32_0, %c0_i32_1 : i32, i32, i32
  }
  func.func @transform_6(%arg0: i32) -> (i32, i32, i32) {
    %c0_i32 = arith.constant 0 : i32
    %c0_i32_0 = arith.constant 0 : i32
    %c0_i32_1 = arith.constant 0 : i32
    %c0_i32_2 = arith.constant 0 : i32
    return %c0_i32, %c0_i32_0, %c0_i32_1 : i32, i32, i32
  }
  func.func @transform_7(%arg0: i32) -> (i32, i32, i32) {
    %c0_i32 = arith.constant 0 : i32
    %c0_i32_0 = arith.constant 0 : i32
    %c0_i32_1 = arith.constant 0 : i32
    %c0_i32_2 = arith.constant 0 : i32
    return %c0_i32, %c0_i32_0, %c0_i32_1 : i32, i32, i32
  }
  func.func @transform_8(%arg0: i32) -> (i32, i32, i32) {
    %c0_i32 = arith.constant 0 : i32
    %c0_i32_0 = arith.constant 0 : i32
    %c0_i32_1 = arith.constant 0 : i32
    return %arg0, %c0_i32, %c0_i32_0 : i32, i32, i32
  }
  func.func @transform_9(%arg0: i32) -> (i32, i32, i32) {
    %c0_i32 = arith.constant 0 : i32
    %c0_i32_0 = arith.constant 0 : i32
    %c0_i32_1 = arith.constant 0 : i32
    return %arg0, %c0_i32, %c0_i32_0 : i32, i32, i32
  }
}

module attributes {stable_mosaic.version = 11 : i64} {
  func.func @_bottleneck_kernel(%arg0: i32, %arg1: memref<4xf32, #tpu.memory_space<smem>>, %arg2: memref<1x16x128xf32, #tpu.memory_space<vmem>>, %arg3: memref<2x16x16xf32, #tpu.memory_space<vmem>>, %arg4: memref<2x16x1xf32, #tpu.memory_space<vmem>>, %arg5: memref<2x3x16x1xf32, #tpu.memory_space<vmem>>, %arg6: memref<2x16x1xf32, #tpu.memory_space<vmem>>, %arg7: memref<2x32x16xf32, #tpu.memory_space<vmem>>, %arg8: memref<2x32x1xf32, #tpu.memory_space<vmem>>, %arg9: memref<1x16x128xf32, #tpu.memory_space<vmem>>, %arg10: memref<1x16x128xf32, #tpu.memory_space<vmem>>) attributes {dimension_semantics = [#tpu.dimension_semantics<parallel>], iteration_bounds = array<i64: 2>, scalar_prefetch = 0 : i64, scratch_operands = 0 : i64, tpu.core_type = #tpu.core_type<tc>, window_params = [{transform_indices = @transform_0, window_bounds = array<i64: 4>}, {transform_indices = @transform_1, window_bounds = array<i64: 1, 16, 128>}, {pipeline_mode = #tpu.pipeline_mode<synchronous>, transform_indices = @transform_2, window_bounds = array<i64: 2, 16, 16>}, {pipeline_mode = #tpu.pipeline_mode<synchronous>, transform_indices = @transform_3, window_bounds = array<i64: 2, 16, 1>}, {pipeline_mode = #tpu.pipeline_mode<synchronous>, transform_indices = @transform_4, window_bounds = array<i64: 2, 3, 16, 1>}, {pipeline_mode = #tpu.pipeline_mode<synchronous>, transform_indices = @transform_5, window_bounds = array<i64: 2, 16, 1>}, {pipeline_mode = #tpu.pipeline_mode<synchronous>, transform_indices = @transform_6, window_bounds = array<i64: 2, 32, 16>}, {pipeline_mode = #tpu.pipeline_mode<synchronous>, transform_indices = @transform_7, window_bounds = array<i64: 2, 32, 1>}, {transform_indices = @transform_8, window_bounds = array<i64: 1, 16, 128>}, {transform_indices = @transform_9, window_bounds = array<i64: 1, 16, 128>}]} {
    %c0 = arith.constant 0 : index
    %c0_0 = arith.constant 0 : index
    %c0_1 = arith.constant 0 : index
    %0 = vector.load %arg2[%c0, %c0_0, %c0_1] : memref<1x16x128xf32, #tpu.memory_space<vmem>>, vector<1x16x128xf32>
    %1 = vector.shape_cast %0 : vector<1x16x128xf32> to vector<16x128xf32>
    %cst = arith.constant 0.000000e+00 : f32
    %2 = vector.broadcast %cst : f32 to vector<16x128xf32>
    %3 = tpu.iota {dimensions = array<i32: 1>} : vector<16x128xi32>
    %c0_2 = arith.constant 0 : index
    %4 = memref.load %arg1[%c0_2] : memref<4xf32, #tpu.memory_space<smem>>
    %c1 = arith.constant 1 : index
    %5 = memref.load %arg1[%c1] : memref<4xf32, #tpu.memory_space<smem>>
    %c0_3 = arith.constant 0 : index
    %c0_4 = arith.constant 0 : index
    %c0_5 = arith.constant 0 : index
    %6 = vector.load %arg3[%c0_3, %c0_4, %c0_5] : memref<2x16x16xf32, #tpu.memory_space<vmem>>, vector<1x16x16xf32>
    %7 = vector.shape_cast %6 : vector<1x16x16xf32> to vector<16x16xf32>
    %cst_6 = arith.constant dense<0.000000e+00> : vector<16x128xf32>
    %8 = tpu.matmul %7, %1, %cst_6 {dimension_numbers = #tpu.dot_dimension_numbers<[1], [0], [0], [1], [0, 0, 1, 1], [], []>} : vector<16x16xf32>, vector<16x128xf32>, vector<16x128xf32> -> vector<16x128xf32>
    %c0_7 = arith.constant 0 : index
    %c0_8 = arith.constant 0 : index
    %c0_9 = arith.constant 0 : index
    %9 = vector.load %arg4[%c0_7, %c0_8, %c0_9] : memref<2x16x1xf32, #tpu.memory_space<vmem>>, vector<1x16x1xf32>
    %10 = vector.shape_cast %9 : vector<1x16x1xf32> to vector<16x1xf32>
    %11 = vector.broadcast %10 : vector<16x1xf32> to vector<16x128xf32>
    %12 = arith.addf %8, %11 : vector<16x128xf32>
    %cst_10 = arith.constant 0.000000e+00 : f32
    %13 = vector.broadcast %cst_10 : f32 to vector<16x128xf32>
    %14 = arith.cmpf oge, %12, %13 : vector<16x128xf32>
    %15 = vector.broadcast %4 : f32 to vector<16x128xf32>
    %16 = arith.mulf %15, %12 : vector<16x128xf32>
    %17 = arith.select %14, %12, %16 : vector<16x128xi1>, vector<16x128xf32>
    %c0_11 = arith.constant 0 : index
    %c0_12 = arith.constant 0 : index
    %c0_13 = arith.constant 0 : index
    %c0_14 = arith.constant 0 : index
    %18 = vector.load %arg5[%c0_11, %c0_12, %c0_13, %c0_14] : memref<2x3x16x1xf32, #tpu.memory_space<vmem>>, vector<1x1x16x1xf32>
    %19 = vector.shape_cast %18 : vector<1x1x16x1xf32> to vector<16x1xf32>
    %c1_i32 = arith.constant 1 : i32
    %20 = tpu.dynamic_rotate %17 by %c1_i32 dim 1 : vector<16x128xf32>, i32 -> vector<16x128xf32>
    %c1_i32_15 = arith.constant 1 : i32
    %21 = vector.broadcast %c1_i32_15 : i32 to vector<16x128xi32>
    %22 = arith.cmpi sge, %3, %21 : vector<16x128xi32>
    %cst_16 = arith.constant 0.000000e+00 : f32
    %23 = vector.broadcast %cst_16 : f32 to vector<16x128xf32>
    %24 = arith.select %22, %20, %23 : vector<16x128xi1>, vector<16x128xf32>
    %25 = vector.broadcast %19 : vector<16x1xf32> to vector<16x128xf32>
    %26 = arith.mulf %25, %24 : vector<16x128xf32>
    %c0_17 = arith.constant 0 : index
    %c1_18 = arith.constant 1 : index
    %c0_19 = arith.constant 0 : index
    %c0_20 = arith.constant 0 : index
    %27 = vector.load %arg5[%c0_17, %c1_18, %c0_19, %c0_20] : memref<2x3x16x1xf32, #tpu.memory_space<vmem>>, vector<1x1x16x1xf32>
    %28 = vector.shape_cast %27 : vector<1x1x16x1xf32> to vector<16x1xf32>
    %29 = vector.broadcast %28 : vector<16x1xf32> to vector<16x128xf32>
    %30 = arith.mulf %29, %17 : vector<16x128xf32>
    %31 = arith.addf %26, %30 : vector<16x128xf32>
    %c0_21 = arith.constant 0 : index
    %c2 = arith.constant 2 : index
    %c0_22 = arith.constant 0 : index
    %c0_23 = arith.constant 0 : index
    %32 = vector.load %arg5[%c0_21, %c2, %c0_22, %c0_23] : memref<2x3x16x1xf32, #tpu.memory_space<vmem>>, vector<1x1x16x1xf32>
    %33 = vector.shape_cast %32 : vector<1x1x16x1xf32> to vector<16x1xf32>
    %c127_i32 = arith.constant 127 : i32
    %34 = tpu.dynamic_rotate %17 by %c127_i32 dim 1 : vector<16x128xf32>, i32 -> vector<16x128xf32>
    %c127_i32_24 = arith.constant 127 : i32
    %35 = vector.broadcast %c127_i32_24 : i32 to vector<16x128xi32>
    %36 = arith.cmpi slt, %3, %35 : vector<16x128xi32>
    %cst_25 = arith.constant 0.000000e+00 : f32
    %37 = vector.broadcast %cst_25 : f32 to vector<16x128xf32>
    %38 = arith.select %36, %34, %37 : vector<16x128xi1>, vector<16x128xf32>
    %39 = vector.broadcast %33 : vector<16x1xf32> to vector<16x128xf32>
    %40 = arith.mulf %39, %38 : vector<16x128xf32>
    %41 = arith.addf %31, %40 : vector<16x128xf32>
    %c0_26 = arith.constant 0 : index
    %c0_27 = arith.constant 0 : index
    %c0_28 = arith.constant 0 : index
    %42 = vector.load %arg6[%c0_26, %c0_27, %c0_28] : memref<2x16x1xf32, #tpu.memory_space<vmem>>, vector<1x16x1xf32>
    %43 = vector.shape_cast %42 : vector<1x16x1xf32> to vector<16x1xf32>
    %44 = vector.broadcast %43 : vector<16x1xf32> to vector<16x128xf32>
    %45 = arith.addf %41, %44 : vector<16x128xf32>
    %cst_29 = arith.constant 0.000000e+00 : f32
    %46 = vector.broadcast %cst_29 : f32 to vector<16x128xf32>
    %47 = arith.cmpf oge, %45, %46 : vector<16x128xf32>
    %48 = vector.broadcast %5 : f32 to vector<16x128xf32>
    %49 = arith.mulf %48, %45 : vector<16x128xf32>
    %50 = arith.select %47, %45, %49 : vector<16x128xi1>, vector<16x128xf32>
    %c0_30 = arith.constant 0 : index
    %c0_31 = arith.constant 0 : index
    %c0_32 = arith.constant 0 : index
    %51 = vector.load %arg7[%c0_30, %c0_31, %c0_32] : memref<2x32x16xf32, #tpu.memory_space<vmem>>, vector<1x32x16xf32>
    %52 = vector.shape_cast %51 : vector<1x32x16xf32> to vector<32x16xf32>
    %cst_33 = arith.constant dense<0.000000e+00> : vector<32x128xf32>
    %53 = tpu.matmul %52, %50, %cst_33 {dimension_numbers = #tpu.dot_dimension_numbers<[1], [0], [0], [1], [0, 0, 1, 1], [], []>} : vector<32x16xf32>, vector<16x128xf32>, vector<32x128xf32> -> vector<32x128xf32>
    %c0_34 = arith.constant 0 : index
    %c0_35 = arith.constant 0 : index
    %c0_36 = arith.constant 0 : index
    %54 = vector.load %arg8[%c0_34, %c0_35, %c0_36] : memref<2x32x1xf32, #tpu.memory_space<vmem>>, vector<1x32x1xf32>
    %55 = vector.shape_cast %54 : vector<1x32x1xf32> to vector<32x1xf32>
    %56 = vector.broadcast %55 : vector<32x1xf32> to vector<32x128xf32>
    %57 = arith.addf %53, %56 : vector<32x128xf32>
    %58 = vector.extract_strided_slice %57 {offsets = [0, 0], sizes = [16, 128], strides = [1, 1]} : vector<32x128xf32> to vector<16x128xf32>
    %59 = arith.addf %1, %58 : vector<16x128xf32>
    %60 = vector.extract_strided_slice %57 {offsets = [16, 0], sizes = [16, 128], strides = [1, 1]} : vector<32x128xf32> to vector<16x128xf32>
    %61 = arith.addf %2, %60 : vector<16x128xf32>
    %c2_37 = arith.constant 2 : index
    %62 = memref.load %arg1[%c2_37] : memref<4xf32, #tpu.memory_space<smem>>
    %c3 = arith.constant 3 : index
    %63 = memref.load %arg1[%c3] : memref<4xf32, #tpu.memory_space<smem>>
    %c1_38 = arith.constant 1 : index
    %c0_39 = arith.constant 0 : index
    %c0_40 = arith.constant 0 : index
    %64 = vector.load %arg3[%c1_38, %c0_39, %c0_40] : memref<2x16x16xf32, #tpu.memory_space<vmem>>, vector<1x16x16xf32>
    %65 = vector.shape_cast %64 : vector<1x16x16xf32> to vector<16x16xf32>
    %cst_41 = arith.constant dense<0.000000e+00> : vector<16x128xf32>
    %66 = tpu.matmul %65, %59, %cst_41 {dimension_numbers = #tpu.dot_dimension_numbers<[1], [0], [0], [1], [0, 0, 1, 1], [], []>} : vector<16x16xf32>, vector<16x128xf32>, vector<16x128xf32> -> vector<16x128xf32>
    %c1_42 = arith.constant 1 : index
    %c0_43 = arith.constant 0 : index
    %c0_44 = arith.constant 0 : index
    %67 = vector.load %arg4[%c1_42, %c0_43, %c0_44] : memref<2x16x1xf32, #tpu.memory_space<vmem>>, vector<1x16x1xf32>
    %68 = vector.shape_cast %67 : vector<1x16x1xf32> to vector<16x1xf32>
    %69 = vector.broadcast %68 : vector<16x1xf32> to vector<16x128xf32>
    %70 = arith.addf %66, %69 : vector<16x128xf32>
    %cst_45 = arith.constant 0.000000e+00 : f32
    %71 = vector.broadcast %cst_45 : f32 to vector<16x128xf32>
    %72 = arith.cmpf oge, %70, %71 : vector<16x128xf32>
    %73 = vector.broadcast %62 : f32 to vector<16x128xf32>
    %74 = arith.mulf %73, %70 : vector<16x128xf32>
    %75 = arith.select %72, %70, %74 : vector<16x128xi1>, vector<16x128xf32>
    %c1_46 = arith.constant 1 : index
    %c0_47 = arith.constant 0 : index
    %c0_48 = arith.constant 0 : index
    %c0_49 = arith.constant 0 : index
    %76 = vector.load %arg5[%c1_46, %c0_47, %c0_48, %c0_49] : memref<2x3x16x1xf32, #tpu.memory_space<vmem>>, vector<1x1x16x1xf32>
    %77 = vector.shape_cast %76 : vector<1x1x16x1xf32> to vector<16x1xf32>
    %c2_i32 = arith.constant 2 : i32
    %78 = tpu.dynamic_rotate %75 by %c2_i32 dim 1 : vector<16x128xf32>, i32 -> vector<16x128xf32>
    %c2_i32_50 = arith.constant 2 : i32
    %79 = vector.broadcast %c2_i32_50 : i32 to vector<16x128xi32>
    %80 = arith.cmpi sge, %3, %79 : vector<16x128xi32>
    %cst_51 = arith.constant 0.000000e+00 : f32
    %81 = vector.broadcast %cst_51 : f32 to vector<16x128xf32>
    %82 = arith.select %80, %78, %81 : vector<16x128xi1>, vector<16x128xf32>
    %83 = vector.broadcast %77 : vector<16x1xf32> to vector<16x128xf32>
    %84 = arith.mulf %83, %82 : vector<16x128xf32>
    %c1_52 = arith.constant 1 : index
    %c1_53 = arith.constant 1 : index
    %c0_54 = arith.constant 0 : index
    %c0_55 = arith.constant 0 : index
    %85 = vector.load %arg5[%c1_52, %c1_53, %c0_54, %c0_55] : memref<2x3x16x1xf32, #tpu.memory_space<vmem>>, vector<1x1x16x1xf32>
    %86 = vector.shape_cast %85 : vector<1x1x16x1xf32> to vector<16x1xf32>
    %87 = vector.broadcast %86 : vector<16x1xf32> to vector<16x128xf32>
    %88 = arith.mulf %87, %75 : vector<16x128xf32>
    %89 = arith.addf %84, %88 : vector<16x128xf32>
    %c1_56 = arith.constant 1 : index
    %c2_57 = arith.constant 2 : index
    %c0_58 = arith.constant 0 : index
    %c0_59 = arith.constant 0 : index
    %90 = vector.load %arg5[%c1_56, %c2_57, %c0_58, %c0_59] : memref<2x3x16x1xf32, #tpu.memory_space<vmem>>, vector<1x1x16x1xf32>
    %91 = vector.shape_cast %90 : vector<1x1x16x1xf32> to vector<16x1xf32>
    %c126_i32 = arith.constant 126 : i32
    %92 = tpu.dynamic_rotate %75 by %c126_i32 dim 1 : vector<16x128xf32>, i32 -> vector<16x128xf32>
    %c126_i32_60 = arith.constant 126 : i32
    %93 = vector.broadcast %c126_i32_60 : i32 to vector<16x128xi32>
    %94 = arith.cmpi slt, %3, %93 : vector<16x128xi32>
    %cst_61 = arith.constant 0.000000e+00 : f32
    %95 = vector.broadcast %cst_61 : f32 to vector<16x128xf32>
    %96 = arith.select %94, %92, %95 : vector<16x128xi1>, vector<16x128xf32>
    %97 = vector.broadcast %91 : vector<16x1xf32> to vector<16x128xf32>
    %98 = arith.mulf %97, %96 : vector<16x128xf32>
    %99 = arith.addf %89, %98 : vector<16x128xf32>
    %c1_62 = arith.constant 1 : index
    %c0_63 = arith.constant 0 : index
    %c0_64 = arith.constant 0 : index
    %100 = vector.load %arg6[%c1_62, %c0_63, %c0_64] : memref<2x16x1xf32, #tpu.memory_space<vmem>>, vector<1x16x1xf32>
    %101 = vector.shape_cast %100 : vector<1x16x1xf32> to vector<16x1xf32>
    %102 = vector.broadcast %101 : vector<16x1xf32> to vector<16x128xf32>
    %103 = arith.addf %99, %102 : vector<16x128xf32>
    %cst_65 = arith.constant 0.000000e+00 : f32
    %104 = vector.broadcast %cst_65 : f32 to vector<16x128xf32>
    %105 = arith.cmpf oge, %103, %104 : vector<16x128xf32>
    %106 = vector.broadcast %63 : f32 to vector<16x128xf32>
    %107 = arith.mulf %106, %103 : vector<16x128xf32>
    %108 = arith.select %105, %103, %107 : vector<16x128xi1>, vector<16x128xf32>
    %c1_66 = arith.constant 1 : index
    %c0_67 = arith.constant 0 : index
    %c0_68 = arith.constant 0 : index
    %109 = vector.load %arg7[%c1_66, %c0_67, %c0_68] : memref<2x32x16xf32, #tpu.memory_space<vmem>>, vector<1x32x16xf32>
    %110 = vector.shape_cast %109 : vector<1x32x16xf32> to vector<32x16xf32>
    %cst_69 = arith.constant dense<0.000000e+00> : vector<32x128xf32>
    %111 = tpu.matmul %110, %108, %cst_69 {dimension_numbers = #tpu.dot_dimension_numbers<[1], [0], [0], [1], [0, 0, 1, 1], [], []>} : vector<32x16xf32>, vector<16x128xf32>, vector<32x128xf32> -> vector<32x128xf32>
    %c1_70 = arith.constant 1 : index
    %c0_71 = arith.constant 0 : index
    %c0_72 = arith.constant 0 : index
    %112 = vector.load %arg8[%c1_70, %c0_71, %c0_72] : memref<2x32x1xf32, #tpu.memory_space<vmem>>, vector<1x32x1xf32>
    %113 = vector.shape_cast %112 : vector<1x32x1xf32> to vector<32x1xf32>
    %114 = vector.broadcast %113 : vector<32x1xf32> to vector<32x128xf32>
    %115 = arith.addf %111, %114 : vector<32x128xf32>
    %116 = vector.extract_strided_slice %115 {offsets = [0, 0], sizes = [16, 128], strides = [1, 1]} : vector<32x128xf32> to vector<16x128xf32>
    %117 = arith.addf %59, %116 : vector<16x128xf32>
    %118 = vector.extract_strided_slice %115 {offsets = [16, 0], sizes = [16, 128], strides = [1, 1]} : vector<32x128xf32> to vector<16x128xf32>
    %119 = arith.addf %61, %118 : vector<16x128xf32>
    %c0_73 = arith.constant 0 : index
    %c0_74 = arith.constant 0 : index
    %c0_75 = arith.constant 0 : index
    %120 = vector.load %arg9[%c0_73, %c0_74, %c0_75] : memref<1x16x128xf32, #tpu.memory_space<vmem>>, vector<1x16x128xf32>
    %121 = vector.shape_cast %120 : vector<1x16x128xf32> to vector<16x128xf32>
    %122 = vector.shape_cast %117 : vector<16x128xf32> to vector<1x16x128xf32>
    tpu.vector_store %arg9[%c0_73, %c0_74, %c0_75], %122 {strides = array<i32>} : memref<1x16x128xf32, #tpu.memory_space<vmem>>, vector<1x16x128xf32>,
    %c0_76 = arith.constant 0 : index
    %c0_77 = arith.constant 0 : index
    %c0_78 = arith.constant 0 : index
    %123 = vector.load %arg10[%c0_76, %c0_77, %c0_78] : memref<1x16x128xf32, #tpu.memory_space<vmem>>, vector<1x16x128xf32>
    %124 = vector.shape_cast %123 : vector<1x16x128xf32> to vector<16x128xf32>
    %125 = vector.shape_cast %119 : vector<16x128xf32> to vector<1x16x128xf32>
    tpu.vector_store %arg10[%c0_76, %c0_77, %c0_78], %125 {strides = array<i32>} : memref<1x16x128xf32, #tpu.memory_space<vmem>>, vector<1x16x128xf32>,
    return
  }
  func.func @transform_0(%arg0: i32) -> i32 {
    %c0_i32 = arith.constant 0 : i32
    %c0_i32_0 = arith.constant 0 : i32
    return %c0_i32 : i32
  }
  func.func @transform_1(%arg0: i32) -> (i32, i32, i32) {
    %c0_i32 = arith.constant 0 : i32
    %c0_i32_0 = arith.constant 0 : i32
    %c0_i32_1 = arith.constant 0 : i32
    return %arg0, %c0_i32, %c0_i32_0 : i32, i32, i32
  }
  func.func @transform_2(%arg0: i32) -> (i32, i32, i32) {
    %c0_i32 = arith.constant 0 : i32
    %c0_i32_0 = arith.constant 0 : i32
    %c0_i32_1 = arith.constant 0 : i32
    %c0_i32_2 = arith.constant 0 : i32
    return %c0_i32, %c0_i32_0, %c0_i32_1 : i32, i32, i32
  }
  func.func @transform_3(%arg0: i32) -> (i32, i32, i32) {
    %c0_i32 = arith.constant 0 : i32
    %c0_i32_0 = arith.constant 0 : i32
    %c0_i32_1 = arith.constant 0 : i32
    %c0_i32_2 = arith.constant 0 : i32
    return %c0_i32, %c0_i32_0, %c0_i32_1 : i32, i32, i32
  }
  func.func @transform_4(%arg0: i32) -> (i32, i32, i32, i32) {
    %c0_i32 = arith.constant 0 : i32
    %c0_i32_0 = arith.constant 0 : i32
    %c0_i32_1 = arith.constant 0 : i32
    %c0_i32_2 = arith.constant 0 : i32
    %c0_i32_3 = arith.constant 0 : i32
    return %c0_i32, %c0_i32_0, %c0_i32_1, %c0_i32_2 : i32, i32, i32, i32
  }
  func.func @transform_5(%arg0: i32) -> (i32, i32, i32) {
    %c0_i32 = arith.constant 0 : i32
    %c0_i32_0 = arith.constant 0 : i32
    %c0_i32_1 = arith.constant 0 : i32
    %c0_i32_2 = arith.constant 0 : i32
    return %c0_i32, %c0_i32_0, %c0_i32_1 : i32, i32, i32
  }
  func.func @transform_6(%arg0: i32) -> (i32, i32, i32) {
    %c0_i32 = arith.constant 0 : i32
    %c0_i32_0 = arith.constant 0 : i32
    %c0_i32_1 = arith.constant 0 : i32
    %c0_i32_2 = arith.constant 0 : i32
    return %c0_i32, %c0_i32_0, %c0_i32_1 : i32, i32, i32
  }
  func.func @transform_7(%arg0: i32) -> (i32, i32, i32) {
    %c0_i32 = arith.constant 0 : i32
    %c0_i32_0 = arith.constant 0 : i32
    %c0_i32_1 = arith.constant 0 : i32
    %c0_i32_2 = arith.constant 0 : i32
    return %c0_i32, %c0_i32_0, %c0_i32_1 : i32, i32, i32
  }
  func.func @transform_8(%arg0: i32) -> (i32, i32, i32) {
    %c0_i32 = arith.constant 0 : i32
    %c0_i32_0 = arith.constant 0 : i32
    %c0_i32_1 = arith.constant 0 : i32
    return %arg0, %c0_i32, %c0_i32_0 : i32, i32, i32
  }
  func.func @transform_9(%arg0: i32) -> (i32, i32, i32) {
    %c0_i32 = arith.constant 0 : i32
    %c0_i32_0 = arith.constant 0 : i32
    %c0_i32_1 = arith.constant 0 : i32
    return %arg0, %c0_i32, %c0_i32_0 : i32, i32, i32
  }
}

module attributes {stable_mosaic.version = 11 : i64} {
  func.func @_fusion_kernel(%arg0: i32, %arg1: memref<2xf32, #tpu.memory_space<smem>>, %arg2: memref<1x8x128xf32, #tpu.memory_space<vmem>>, %arg3: memref<1x16x128xf32, #tpu.memory_space<vmem>>, %arg4: memref<8x72xf32, #tpu.memory_space<vmem>>, %arg5: memref<8x1xf32, #tpu.memory_space<vmem>>, %arg6: memref<16x72xf32, #tpu.memory_space<vmem>>, %arg7: memref<16x1xf32, #tpu.memory_space<vmem>>, %arg8: memref<1x8x128xf32, #tpu.memory_space<vmem>>, %arg9: memref<1x16x128xf32, #tpu.memory_space<vmem>>) attributes {dimension_semantics = [#tpu.dimension_semantics<parallel>], iteration_bounds = array<i64: 2>, scalar_prefetch = 0 : i64, scratch_operands = 0 : i64, tpu.core_type = #tpu.core_type<tc>, window_params = [{transform_indices = @transform_0, window_bounds = array<i64: 2>}, {transform_indices = @transform_1, window_bounds = array<i64: 1, 8, 128>}, {transform_indices = @transform_2, window_bounds = array<i64: 1, 16, 128>}, {pipeline_mode = #tpu.pipeline_mode<synchronous>, transform_indices = @transform_3, window_bounds = array<i64: 8, 72>}, {pipeline_mode = #tpu.pipeline_mode<synchronous>, transform_indices = @transform_4, window_bounds = array<i64: 8, 1>}, {pipeline_mode = #tpu.pipeline_mode<synchronous>, transform_indices = @transform_5, window_bounds = array<i64: 16, 72>}, {pipeline_mode = #tpu.pipeline_mode<synchronous>, transform_indices = @transform_6, window_bounds = array<i64: 16, 1>}, {transform_indices = @transform_7, window_bounds = array<i64: 1, 8, 128>}, {transform_indices = @transform_8, window_bounds = array<i64: 1, 16, 128>}]} {
    %c0 = arith.constant 0 : index
    %c0_0 = arith.constant 0 : index
    %c0_1 = arith.constant 0 : index
    %0 = vector.load %arg2[%c0, %c0_0, %c0_1] : memref<1x8x128xf32, #tpu.memory_space<vmem>>, vector<1x8x128xf32>
    %1 = vector.shape_cast %0 : vector<1x8x128xf32> to vector<8x128xf32>
    %c0_2 = arith.constant 0 : index
    %c0_3 = arith.constant 0 : index
    %c0_4 = arith.constant 0 : index
    %2 = vector.load %arg3[%c0_2, %c0_3, %c0_4] : memref<1x16x128xf32, #tpu.memory_space<vmem>>, vector<1x16x128xf32>
    %3 = vector.shape_cast %2 : vector<1x16x128xf32> to vector<16x128xf32>
    %4 = tpu.concatenate %1, %3 in 0 : vector<8x128xf32>, vector<16x128xf32> -> vector<24x128xf32>
    %5 = tpu.iota {dimensions = array<i32: 1>} : vector<24x128xi32>
    %c1_i32 = arith.constant 1 : i32
    %6 = tpu.dynamic_rotate %4 by %c1_i32 dim 1 : vector<24x128xf32>, i32 -> vector<24x128xf32>
    %c1_i32_5 = arith.constant 1 : i32
    %7 = vector.broadcast %c1_i32_5 : i32 to vector<24x128xi32>
    %8 = arith.cmpi sge, %5, %7 : vector<24x128xi32>
    %cst = arith.constant 0.000000e+00 : f32
    %9 = vector.broadcast %cst : f32 to vector<24x128xf32>
    %10 = arith.select %8, %6, %9 : vector<24x128xi1>, vector<24x128xf32>
    %c127_i32 = arith.constant 127 : i32
    %11 = tpu.dynamic_rotate %4 by %c127_i32 dim 1 : vector<24x128xf32>, i32 -> vector<24x128xf32>
    %c127_i32_6 = arith.constant 127 : i32
    %12 = vector.broadcast %c127_i32_6 : i32 to vector<24x128xi32>
    %13 = arith.cmpi slt, %5, %12 : vector<24x128xi32>
    %cst_7 = arith.constant 0.000000e+00 : f32
    %14 = vector.broadcast %cst_7 : f32 to vector<24x128xf32>
    %15 = arith.select %13, %11, %14 : vector<24x128xi1>, vector<24x128xf32>
    %16 = tpu.concatenate %10, %4, %15 in 0 : vector<24x128xf32>, vector<24x128xf32>, vector<24x128xf32> -> vector<72x128xf32>
    %c0_8 = arith.constant 0 : index
    %c0_9 = arith.constant 0 : index
    %17 = vector.load %arg4[%c0_8, %c0_9] : memref<8x72xf32, #tpu.memory_space<vmem>>, vector<8x72xf32>
    %cst_10 = arith.constant dense<0.000000e+00> : vector<8x128xf32>
    %18 = tpu.matmul %17, %16, %cst_10 {dimension_numbers = #tpu.dot_dimension_numbers<[1], [0], [0], [1], [0, 0, 1, 1], [], []>} : vector<8x72xf32>, vector<72x128xf32>, vector<8x128xf32> -> vector<8x128xf32>
    %c0_11 = arith.constant 0 : index
    %c0_12 = arith.constant 0 : index
    %19 = vector.load %arg5[%c0_11, %c0_12] : memref<8x1xf32, #tpu.memory_space<vmem>>, vector<8x1xf32>
    %20 = vector.broadcast %19 : vector<8x1xf32> to vector<8x128xf32>
    %21 = arith.addf %18, %20 : vector<8x128xf32>
    %cst_13 = arith.constant 0.000000e+00 : f32
    %22 = vector.broadcast %cst_13 : f32 to vector<8x128xf32>
    %23 = arith.cmpf oge, %21, %22 : vector<8x128xf32>
    %c0_14 = arith.constant 0 : index
    %24 = memref.load %arg1[%c0_14] : memref<2xf32, #tpu.memory_space<smem>>
    %25 = vector.broadcast %24 : f32 to vector<8x128xf32>
    %26 = arith.mulf %25, %21 : vector<8x128xf32>
    %27 = arith.select %23, %21, %26 : vector<8x128xi1>, vector<8x128xf32>
    %c0_15 = arith.constant 0 : index
    %c0_16 = arith.constant 0 : index
    %c0_17 = arith.constant 0 : index
    %28 = vector.load %arg8[%c0_15, %c0_16, %c0_17] : memref<1x8x128xf32, #tpu.memory_space<vmem>>, vector<1x8x128xf32>
    %29 = vector.shape_cast %28 : vector<1x8x128xf32> to vector<8x128xf32>
    %30 = vector.shape_cast %27 : vector<8x128xf32> to vector<1x8x128xf32>
    tpu.vector_store %arg8[%c0_15, %c0_16, %c0_17], %30 {strides = array<i32>} : memref<1x8x128xf32, #tpu.memory_space<vmem>>, vector<1x8x128xf32>,
    %c0_18 = arith.constant 0 : index
    %c0_19 = arith.constant 0 : index
    %31 = vector.load %arg6[%c0_18, %c0_19] : memref<16x72xf32, #tpu.memory_space<vmem>>, vector<16x72xf32>
    %cst_20 = arith.constant dense<0.000000e+00> : vector<16x128xf32>
    %32 = tpu.matmul %31, %16, %cst_20 {dimension_numbers = #tpu.dot_dimension_numbers<[1], [0], [0], [1], [0, 0, 1, 1], [], []>} : vector<16x72xf32>, vector<72x128xf32>, vector<16x128xf32> -> vector<16x128xf32>
    %c0_21 = arith.constant 0 : index
    %c0_22 = arith.constant 0 : index
    %33 = vector.load %arg7[%c0_21, %c0_22] : memref<16x1xf32, #tpu.memory_space<vmem>>, vector<16x1xf32>
    %34 = vector.broadcast %33 : vector<16x1xf32> to vector<16x128xf32>
    %35 = arith.addf %32, %34 : vector<16x128xf32>
    %cst_23 = arith.constant 0.000000e+00 : f32
    %36 = vector.broadcast %cst_23 : f32 to vector<16x128xf32>
    %37 = arith.cmpf oge, %35, %36 : vector<16x128xf32>
    %c1 = arith.constant 1 : index
    %38 = memref.load %arg1[%c1] : memref<2xf32, #tpu.memory_space<smem>>
    %39 = vector.broadcast %38 : f32 to vector<16x128xf32>
    %40 = arith.mulf %39, %35 : vector<16x128xf32>
    %41 = arith.select %37, %35, %40 : vector<16x128xi1>, vector<16x128xf32>
    %c0_24 = arith.constant 0 : index
    %c0_25 = arith.constant 0 : index
    %c0_26 = arith.constant 0 : index
    %42 = vector.load %arg9[%c0_24, %c0_25, %c0_26] : memref<1x16x128xf32, #tpu.memory_space<vmem>>, vector<1x16x128xf32>
    %43 = vector.shape_cast %42 : vector<1x16x128xf32> to vector<16x128xf32>
    %44 = vector.shape_cast %41 : vector<16x128xf32> to vector<1x16x128xf32>
    tpu.vector_store %arg9[%c0_24, %c0_25, %c0_26], %44 {strides = array<i32>} : memref<1x16x128xf32, #tpu.memory_space<vmem>>, vector<1x16x128xf32>,
    return
  }
  func.func @transform_0(%arg0: i32) -> i32 {
    %c0_i32 = arith.constant 0 : i32
    %c0_i32_0 = arith.constant 0 : i32
    return %c0_i32 : i32
  }
  func.func @transform_1(%arg0: i32) -> (i32, i32, i32) {
    %c0_i32 = arith.constant 0 : i32
    %c0_i32_0 = arith.constant 0 : i32
    %c0_i32_1 = arith.constant 0 : i32
    return %arg0, %c0_i32, %c0_i32_0 : i32, i32, i32
  }
  func.func @transform_2(%arg0: i32) -> (i32, i32, i32) {
    %c0_i32 = arith.constant 0 : i32
    %c0_i32_0 = arith.constant 0 : i32
    %c0_i32_1 = arith.constant 0 : i32
    return %arg0, %c0_i32, %c0_i32_0 : i32, i32, i32
  }
  func.func @transform_3(%arg0: i32) -> (i32, i32) {
    %c0_i32 = arith.constant 0 : i32
    %c0_i32_0 = arith.constant 0 : i32
    %c0_i32_1 = arith.constant 0 : i32
    return %c0_i32, %c0_i32_0 : i32, i32
  }
  func.func @transform_4(%arg0: i32) -> (i32, i32) {
    %c0_i32 = arith.constant 0 : i32
    %c0_i32_0 = arith.constant 0 : i32
    %c0_i32_1 = arith.constant 0 : i32
    return %c0_i32, %c0_i32_0 : i32, i32
  }
  func.func @transform_5(%arg0: i32) -> (i32, i32) {
    %c0_i32 = arith.constant 0 : i32
    %c0_i32_0 = arith.constant 0 : i32
    %c0_i32_1 = arith.constant 0 : i32
    return %c0_i32, %c0_i32_0 : i32, i32
  }
  func.func @transform_6(%arg0: i32) -> (i32, i32) {
    %c0_i32 = arith.constant 0 : i32
    %c0_i32_0 = arith.constant 0 : i32
    %c0_i32_1 = arith.constant 0 : i32
    return %c0_i32, %c0_i32_0 : i32, i32
  }
  func.func @transform_7(%arg0: i32) -> (i32, i32, i32) {
    %c0_i32 = arith.constant 0 : i32
    %c0_i32_0 = arith.constant 0 : i32
    %c0_i32_1 = arith.constant 0 : i32
    return %arg0, %c0_i32, %c0_i32_0 : i32, i32, i32
  }
  func.func @transform_8(%arg0: i32) -> (i32, i32, i32) {
    %c0_i32 = arith.constant 0 : i32
    %c0_i32_0 = arith.constant 0 : i32
    %c0_i32_1 = arith.constant 0 : i32
    return %arg0, %c0_i32, %c0_i32_0 : i32, i32, i32
  }
}

module attributes {stable_mosaic.version = 11 : i64} {
  func.func @_bottleneck_kernel(%arg0: i32, %arg1: memref<4xf32, #tpu.memory_space<smem>>, %arg2: memref<1x8x128xf32, #tpu.memory_space<vmem>>, %arg3: memref<2x16x8xf32, #tpu.memory_space<vmem>>, %arg4: memref<2x16x1xf32, #tpu.memory_space<vmem>>, %arg5: memref<2x3x16x1xf32, #tpu.memory_space<vmem>>, %arg6: memref<2x16x1xf32, #tpu.memory_space<vmem>>, %arg7: memref<2x16x16xf32, #tpu.memory_space<vmem>>, %arg8: memref<2x16x1xf32, #tpu.memory_space<vmem>>, %arg9: memref<1x8x128xf32, #tpu.memory_space<vmem>>, %arg10: memref<1x8x128xf32, #tpu.memory_space<vmem>>) attributes {dimension_semantics = [#tpu.dimension_semantics<parallel>], iteration_bounds = array<i64: 2>, scalar_prefetch = 0 : i64, scratch_operands = 0 : i64, tpu.core_type = #tpu.core_type<tc>, window_params = [{transform_indices = @transform_0, window_bounds = array<i64: 4>}, {transform_indices = @transform_1, window_bounds = array<i64: 1, 8, 128>}, {pipeline_mode = #tpu.pipeline_mode<synchronous>, transform_indices = @transform_2, window_bounds = array<i64: 2, 16, 8>}, {pipeline_mode = #tpu.pipeline_mode<synchronous>, transform_indices = @transform_3, window_bounds = array<i64: 2, 16, 1>}, {pipeline_mode = #tpu.pipeline_mode<synchronous>, transform_indices = @transform_4, window_bounds = array<i64: 2, 3, 16, 1>}, {pipeline_mode = #tpu.pipeline_mode<synchronous>, transform_indices = @transform_5, window_bounds = array<i64: 2, 16, 1>}, {pipeline_mode = #tpu.pipeline_mode<synchronous>, transform_indices = @transform_6, window_bounds = array<i64: 2, 16, 16>}, {pipeline_mode = #tpu.pipeline_mode<synchronous>, transform_indices = @transform_7, window_bounds = array<i64: 2, 16, 1>}, {transform_indices = @transform_8, window_bounds = array<i64: 1, 8, 128>}, {transform_indices = @transform_9, window_bounds = array<i64: 1, 8, 128>}]} {
    %c0 = arith.constant 0 : index
    %c0_0 = arith.constant 0 : index
    %c0_1 = arith.constant 0 : index
    %0 = vector.load %arg2[%c0, %c0_0, %c0_1] : memref<1x8x128xf32, #tpu.memory_space<vmem>>, vector<1x8x128xf32>
    %1 = vector.shape_cast %0 : vector<1x8x128xf32> to vector<8x128xf32>
    %cst = arith.constant 0.000000e+00 : f32
    %2 = vector.broadcast %cst : f32 to vector<8x128xf32>
    %3 = tpu.iota {dimensions = array<i32: 1>} : vector<16x128xi32>
    %c0_2 = arith.constant 0 : index
    %4 = memref.load %arg1[%c0_2] : memref<4xf32, #tpu.memory_space<smem>>
    %c1 = arith.constant 1 : index
    %5 = memref.load %arg1[%c1] : memref<4xf32, #tpu.memory_space<smem>>
    %c0_3 = arith.constant 0 : index
    %c0_4 = arith.constant 0 : index
    %c0_5 = arith.constant 0 : index
    %6 = vector.load %arg3[%c0_3, %c0_4, %c0_5] : memref<2x16x8xf32, #tpu.memory_space<vmem>>, vector<1x16x8xf32>
    %7 = vector.shape_cast %6 : vector<1x16x8xf32> to vector<16x8xf32>
    %cst_6 = arith.constant dense<0.000000e+00> : vector<16x128xf32>
    %8 = tpu.matmul %7, %1, %cst_6 {dimension_numbers = #tpu.dot_dimension_numbers<[1], [0], [0], [1], [0, 0, 1, 1], [], []>} : vector<16x8xf32>, vector<8x128xf32>, vector<16x128xf32> -> vector<16x128xf32>
    %c0_7 = arith.constant 0 : index
    %c0_8 = arith.constant 0 : index
    %c0_9 = arith.constant 0 : index
    %9 = vector.load %arg4[%c0_7, %c0_8, %c0_9] : memref<2x16x1xf32, #tpu.memory_space<vmem>>, vector<1x16x1xf32>
    %10 = vector.shape_cast %9 : vector<1x16x1xf32> to vector<16x1xf32>
    %11 = vector.broadcast %10 : vector<16x1xf32> to vector<16x128xf32>
    %12 = arith.addf %8, %11 : vector<16x128xf32>
    %cst_10 = arith.constant 0.000000e+00 : f32
    %13 = vector.broadcast %cst_10 : f32 to vector<16x128xf32>
    %14 = arith.cmpf oge, %12, %13 : vector<16x128xf32>
    %15 = vector.broadcast %4 : f32 to vector<16x128xf32>
    %16 = arith.mulf %15, %12 : vector<16x128xf32>
    %17 = arith.select %14, %12, %16 : vector<16x128xi1>, vector<16x128xf32>
    %c0_11 = arith.constant 0 : index
    %c0_12 = arith.constant 0 : index
    %c0_13 = arith.constant 0 : index
    %c0_14 = arith.constant 0 : index
    %18 = vector.load %arg5[%c0_11, %c0_12, %c0_13, %c0_14] : memref<2x3x16x1xf32, #tpu.memory_space<vmem>>, vector<1x1x16x1xf32>
    %19 = vector.shape_cast %18 : vector<1x1x16x1xf32> to vector<16x1xf32>
    %c1_i32 = arith.constant 1 : i32
    %20 = tpu.dynamic_rotate %17 by %c1_i32 dim 1 : vector<16x128xf32>, i32 -> vector<16x128xf32>
    %c1_i32_15 = arith.constant 1 : i32
    %21 = vector.broadcast %c1_i32_15 : i32 to vector<16x128xi32>
    %22 = arith.cmpi sge, %3, %21 : vector<16x128xi32>
    %cst_16 = arith.constant 0.000000e+00 : f32
    %23 = vector.broadcast %cst_16 : f32 to vector<16x128xf32>
    %24 = arith.select %22, %20, %23 : vector<16x128xi1>, vector<16x128xf32>
    %25 = vector.broadcast %19 : vector<16x1xf32> to vector<16x128xf32>
    %26 = arith.mulf %25, %24 : vector<16x128xf32>
    %c0_17 = arith.constant 0 : index
    %c1_18 = arith.constant 1 : index
    %c0_19 = arith.constant 0 : index
    %c0_20 = arith.constant 0 : index
    %27 = vector.load %arg5[%c0_17, %c1_18, %c0_19, %c0_20] : memref<2x3x16x1xf32, #tpu.memory_space<vmem>>, vector<1x1x16x1xf32>
    %28 = vector.shape_cast %27 : vector<1x1x16x1xf32> to vector<16x1xf32>
    %29 = vector.broadcast %28 : vector<16x1xf32> to vector<16x128xf32>
    %30 = arith.mulf %29, %17 : vector<16x128xf32>
    %31 = arith.addf %26, %30 : vector<16x128xf32>
    %c0_21 = arith.constant 0 : index
    %c2 = arith.constant 2 : index
    %c0_22 = arith.constant 0 : index
    %c0_23 = arith.constant 0 : index
    %32 = vector.load %arg5[%c0_21, %c2, %c0_22, %c0_23] : memref<2x3x16x1xf32, #tpu.memory_space<vmem>>, vector<1x1x16x1xf32>
    %33 = vector.shape_cast %32 : vector<1x1x16x1xf32> to vector<16x1xf32>
    %c127_i32 = arith.constant 127 : i32
    %34 = tpu.dynamic_rotate %17 by %c127_i32 dim 1 : vector<16x128xf32>, i32 -> vector<16x128xf32>
    %c127_i32_24 = arith.constant 127 : i32
    %35 = vector.broadcast %c127_i32_24 : i32 to vector<16x128xi32>
    %36 = arith.cmpi slt, %3, %35 : vector<16x128xi32>
    %cst_25 = arith.constant 0.000000e+00 : f32
    %37 = vector.broadcast %cst_25 : f32 to vector<16x128xf32>
    %38 = arith.select %36, %34, %37 : vector<16x128xi1>, vector<16x128xf32>
    %39 = vector.broadcast %33 : vector<16x1xf32> to vector<16x128xf32>
    %40 = arith.mulf %39, %38 : vector<16x128xf32>
    %41 = arith.addf %31, %40 : vector<16x128xf32>
    %c0_26 = arith.constant 0 : index
    %c0_27 = arith.constant 0 : index
    %c0_28 = arith.constant 0 : index
    %42 = vector.load %arg6[%c0_26, %c0_27, %c0_28] : memref<2x16x1xf32, #tpu.memory_space<vmem>>, vector<1x16x1xf32>
    %43 = vector.shape_cast %42 : vector<1x16x1xf32> to vector<16x1xf32>
    %44 = vector.broadcast %43 : vector<16x1xf32> to vector<16x128xf32>
    %45 = arith.addf %41, %44 : vector<16x128xf32>
    %cst_29 = arith.constant 0.000000e+00 : f32
    %46 = vector.broadcast %cst_29 : f32 to vector<16x128xf32>
    %47 = arith.cmpf oge, %45, %46 : vector<16x128xf32>
    %48 = vector.broadcast %5 : f32 to vector<16x128xf32>
    %49 = arith.mulf %48, %45 : vector<16x128xf32>
    %50 = arith.select %47, %45, %49 : vector<16x128xi1>, vector<16x128xf32>
    %c0_30 = arith.constant 0 : index
    %c0_31 = arith.constant 0 : index
    %c0_32 = arith.constant 0 : index
    %51 = vector.load %arg7[%c0_30, %c0_31, %c0_32] : memref<2x16x16xf32, #tpu.memory_space<vmem>>, vector<1x16x16xf32>
    %52 = vector.shape_cast %51 : vector<1x16x16xf32> to vector<16x16xf32>
    %cst_33 = arith.constant dense<0.000000e+00> : vector<16x128xf32>
    %53 = tpu.matmul %52, %50, %cst_33 {dimension_numbers = #tpu.dot_dimension_numbers<[1], [0], [0], [1], [0, 0, 1, 1], [], []>} : vector<16x16xf32>, vector<16x128xf32>, vector<16x128xf32> -> vector<16x128xf32>
    %c0_34 = arith.constant 0 : index
    %c0_35 = arith.constant 0 : index
    %c0_36 = arith.constant 0 : index
    %54 = vector.load %arg8[%c0_34, %c0_35, %c0_36] : memref<2x16x1xf32, #tpu.memory_space<vmem>>, vector<1x16x1xf32>
    %55 = vector.shape_cast %54 : vector<1x16x1xf32> to vector<16x1xf32>
    %56 = vector.broadcast %55 : vector<16x1xf32> to vector<16x128xf32>
    %57 = arith.addf %53, %56 : vector<16x128xf32>
    %58 = vector.extract_strided_slice %57 {offsets = [0, 0], sizes = [8, 128], strides = [1, 1]} : vector<16x128xf32> to vector<8x128xf32>
    %59 = arith.addf %1, %58 : vector<8x128xf32>
    %60 = vector.extract_strided_slice %57 {offsets = [8, 0], sizes = [8, 128], strides = [1, 1]} : vector<16x128xf32> to vector<8x128xf32>
    %61 = arith.addf %2, %60 : vector<8x128xf32>
    %c2_37 = arith.constant 2 : index
    %62 = memref.load %arg1[%c2_37] : memref<4xf32, #tpu.memory_space<smem>>
    %c3 = arith.constant 3 : index
    %63 = memref.load %arg1[%c3] : memref<4xf32, #tpu.memory_space<smem>>
    %c1_38 = arith.constant 1 : index
    %c0_39 = arith.constant 0 : index
    %c0_40 = arith.constant 0 : index
    %64 = vector.load %arg3[%c1_38, %c0_39, %c0_40] : memref<2x16x8xf32, #tpu.memory_space<vmem>>, vector<1x16x8xf32>
    %65 = vector.shape_cast %64 : vector<1x16x8xf32> to vector<16x8xf32>
    %cst_41 = arith.constant dense<0.000000e+00> : vector<16x128xf32>
    %66 = tpu.matmul %65, %59, %cst_41 {dimension_numbers = #tpu.dot_dimension_numbers<[1], [0], [0], [1], [0, 0, 1, 1], [], []>} : vector<16x8xf32>, vector<8x128xf32>, vector<16x128xf32> -> vector<16x128xf32>
    %c1_42 = arith.constant 1 : index
    %c0_43 = arith.constant 0 : index
    %c0_44 = arith.constant 0 : index
    %67 = vector.load %arg4[%c1_42, %c0_43, %c0_44] : memref<2x16x1xf32, #tpu.memory_space<vmem>>, vector<1x16x1xf32>
    %68 = vector.shape_cast %67 : vector<1x16x1xf32> to vector<16x1xf32>
    %69 = vector.broadcast %68 : vector<16x1xf32> to vector<16x128xf32>
    %70 = arith.addf %66, %69 : vector<16x128xf32>
    %cst_45 = arith.constant 0.000000e+00 : f32
    %71 = vector.broadcast %cst_45 : f32 to vector<16x128xf32>
    %72 = arith.cmpf oge, %70, %71 : vector<16x128xf32>
    %73 = vector.broadcast %62 : f32 to vector<16x128xf32>
    %74 = arith.mulf %73, %70 : vector<16x128xf32>
    %75 = arith.select %72, %70, %74 : vector<16x128xi1>, vector<16x128xf32>
    %c1_46 = arith.constant 1 : index
    %c0_47 = arith.constant 0 : index
    %c0_48 = arith.constant 0 : index
    %c0_49 = arith.constant 0 : index
    %76 = vector.load %arg5[%c1_46, %c0_47, %c0_48, %c0_49] : memref<2x3x16x1xf32, #tpu.memory_space<vmem>>, vector<1x1x16x1xf32>
    %77 = vector.shape_cast %76 : vector<1x1x16x1xf32> to vector<16x1xf32>
    %c2_i32 = arith.constant 2 : i32
    %78 = tpu.dynamic_rotate %75 by %c2_i32 dim 1 : vector<16x128xf32>, i32 -> vector<16x128xf32>
    %c2_i32_50 = arith.constant 2 : i32
    %79 = vector.broadcast %c2_i32_50 : i32 to vector<16x128xi32>
    %80 = arith.cmpi sge, %3, %79 : vector<16x128xi32>
    %cst_51 = arith.constant 0.000000e+00 : f32
    %81 = vector.broadcast %cst_51 : f32 to vector<16x128xf32>
    %82 = arith.select %80, %78, %81 : vector<16x128xi1>, vector<16x128xf32>
    %83 = vector.broadcast %77 : vector<16x1xf32> to vector<16x128xf32>
    %84 = arith.mulf %83, %82 : vector<16x128xf32>
    %c1_52 = arith.constant 1 : index
    %c1_53 = arith.constant 1 : index
    %c0_54 = arith.constant 0 : index
    %c0_55 = arith.constant 0 : index
    %85 = vector.load %arg5[%c1_52, %c1_53, %c0_54, %c0_55] : memref<2x3x16x1xf32, #tpu.memory_space<vmem>>, vector<1x1x16x1xf32>
    %86 = vector.shape_cast %85 : vector<1x1x16x1xf32> to vector<16x1xf32>
    %87 = vector.broadcast %86 : vector<16x1xf32> to vector<16x128xf32>
    %88 = arith.mulf %87, %75 : vector<16x128xf32>
    %89 = arith.addf %84, %88 : vector<16x128xf32>
    %c1_56 = arith.constant 1 : index
    %c2_57 = arith.constant 2 : index
    %c0_58 = arith.constant 0 : index
    %c0_59 = arith.constant 0 : index
    %90 = vector.load %arg5[%c1_56, %c2_57, %c0_58, %c0_59] : memref<2x3x16x1xf32, #tpu.memory_space<vmem>>, vector<1x1x16x1xf32>
    %91 = vector.shape_cast %90 : vector<1x1x16x1xf32> to vector<16x1xf32>
    %c126_i32 = arith.constant 126 : i32
    %92 = tpu.dynamic_rotate %75 by %c126_i32 dim 1 : vector<16x128xf32>, i32 -> vector<16x128xf32>
    %c126_i32_60 = arith.constant 126 : i32
    %93 = vector.broadcast %c126_i32_60 : i32 to vector<16x128xi32>
    %94 = arith.cmpi slt, %3, %93 : vector<16x128xi32>
    %cst_61 = arith.constant 0.000000e+00 : f32
    %95 = vector.broadcast %cst_61 : f32 to vector<16x128xf32>
    %96 = arith.select %94, %92, %95 : vector<16x128xi1>, vector<16x128xf32>
    %97 = vector.broadcast %91 : vector<16x1xf32> to vector<16x128xf32>
    %98 = arith.mulf %97, %96 : vector<16x128xf32>
    %99 = arith.addf %89, %98 : vector<16x128xf32>
    %c1_62 = arith.constant 1 : index
    %c0_63 = arith.constant 0 : index
    %c0_64 = arith.constant 0 : index
    %100 = vector.load %arg6[%c1_62, %c0_63, %c0_64] : memref<2x16x1xf32, #tpu.memory_space<vmem>>, vector<1x16x1xf32>
    %101 = vector.shape_cast %100 : vector<1x16x1xf32> to vector<16x1xf32>
    %102 = vector.broadcast %101 : vector<16x1xf32> to vector<16x128xf32>
    %103 = arith.addf %99, %102 : vector<16x128xf32>
    %cst_65 = arith.constant 0.000000e+00 : f32
    %104 = vector.broadcast %cst_65 : f32 to vector<16x128xf32>
    %105 = arith.cmpf oge, %103, %104 : vector<16x128xf32>
    %106 = vector.broadcast %63 : f32 to vector<16x128xf32>
    %107 = arith.mulf %106, %103 : vector<16x128xf32>
    %108 = arith.select %105, %103, %107 : vector<16x128xi1>, vector<16x128xf32>
    %c1_66 = arith.constant 1 : index
    %c0_67 = arith.constant 0 : index
    %c0_68 = arith.constant 0 : index
    %109 = vector.load %arg7[%c1_66, %c0_67, %c0_68] : memref<2x16x16xf32, #tpu.memory_space<vmem>>, vector<1x16x16xf32>
    %110 = vector.shape_cast %109 : vector<1x16x16xf32> to vector<16x16xf32>
    %cst_69 = arith.constant dense<0.000000e+00> : vector<16x128xf32>
    %111 = tpu.matmul %110, %108, %cst_69 {dimension_numbers = #tpu.dot_dimension_numbers<[1], [0], [0], [1], [0, 0, 1, 1], [], []>} : vector<16x16xf32>, vector<16x128xf32>, vector<16x128xf32> -> vector<16x128xf32>
    %c1_70 = arith.constant 1 : index
    %c0_71 = arith.constant 0 : index
    %c0_72 = arith.constant 0 : index
    %112 = vector.load %arg8[%c1_70, %c0_71, %c0_72] : memref<2x16x1xf32, #tpu.memory_space<vmem>>, vector<1x16x1xf32>
    %113 = vector.shape_cast %112 : vector<1x16x1xf32> to vector<16x1xf32>
    %114 = vector.broadcast %113 : vector<16x1xf32> to vector<16x128xf32>
    %115 = arith.addf %111, %114 : vector<16x128xf32>
    %116 = vector.extract_strided_slice %115 {offsets = [0, 0], sizes = [8, 128], strides = [1, 1]} : vector<16x128xf32> to vector<8x128xf32>
    %117 = arith.addf %59, %116 : vector<8x128xf32>
    %118 = vector.extract_strided_slice %115 {offsets = [8, 0], sizes = [8, 128], strides = [1, 1]} : vector<16x128xf32> to vector<8x128xf32>
    %119 = arith.addf %61, %118 : vector<8x128xf32>
    %c0_73 = arith.constant 0 : index
    %c0_74 = arith.constant 0 : index
    %c0_75 = arith.constant 0 : index
    %120 = vector.load %arg9[%c0_73, %c0_74, %c0_75] : memref<1x8x128xf32, #tpu.memory_space<vmem>>, vector<1x8x128xf32>
    %121 = vector.shape_cast %120 : vector<1x8x128xf32> to vector<8x128xf32>
    %122 = vector.shape_cast %117 : vector<8x128xf32> to vector<1x8x128xf32>
    tpu.vector_store %arg9[%c0_73, %c0_74, %c0_75], %122 {strides = array<i32>} : memref<1x8x128xf32, #tpu.memory_space<vmem>>, vector<1x8x128xf32>,
    %c0_76 = arith.constant 0 : index
    %c0_77 = arith.constant 0 : index
    %c0_78 = arith.constant 0 : index
    %123 = vector.load %arg10[%c0_76, %c0_77, %c0_78] : memref<1x8x128xf32, #tpu.memory_space<vmem>>, vector<1x8x128xf32>
    %124 = vector.shape_cast %123 : vector<1x8x128xf32> to vector<8x128xf32>
    %125 = vector.shape_cast %119 : vector<8x128xf32> to vector<1x8x128xf32>
    tpu.vector_store %arg10[%c0_76, %c0_77, %c0_78], %125 {strides = array<i32>} : memref<1x8x128xf32, #tpu.memory_space<vmem>>, vector<1x8x128xf32>,
    return
  }
  func.func @transform_0(%arg0: i32) -> i32 {
    %c0_i32 = arith.constant 0 : i32
    %c0_i32_0 = arith.constant 0 : i32
    return %c0_i32 : i32
  }
  func.func @transform_1(%arg0: i32) -> (i32, i32, i32) {
    %c0_i32 = arith.constant 0 : i32
    %c0_i32_0 = arith.constant 0 : i32
    %c0_i32_1 = arith.constant 0 : i32
    return %arg0, %c0_i32, %c0_i32_0 : i32, i32, i32
  }
  func.func @transform_2(%arg0: i32) -> (i32, i32, i32) {
    %c0_i32 = arith.constant 0 : i32
    %c0_i32_0 = arith.constant 0 : i32
    %c0_i32_1 = arith.constant 0 : i32
    %c0_i32_2 = arith.constant 0 : i32
    return %c0_i32, %c0_i32_0, %c0_i32_1 : i32, i32, i32
  }
  func.func @transform_3(%arg0: i32) -> (i32, i32, i32) {
    %c0_i32 = arith.constant 0 : i32
    %c0_i32_0 = arith.constant 0 : i32
    %c0_i32_1 = arith.constant 0 : i32
    %c0_i32_2 = arith.constant 0 : i32
    return %c0_i32, %c0_i32_0, %c0_i32_1 : i32, i32, i32
  }
  func.func @transform_4(%arg0: i32) -> (i32, i32, i32, i32) {
    %c0_i32 = arith.constant 0 : i32
    %c0_i32_0 = arith.constant 0 : i32
    %c0_i32_1 = arith.constant 0 : i32
    %c0_i32_2 = arith.constant 0 : i32
    %c0_i32_3 = arith.constant 0 : i32
    return %c0_i32, %c0_i32_0, %c0_i32_1, %c0_i32_2 : i32, i32, i32, i32
  }
  func.func @transform_5(%arg0: i32) -> (i32, i32, i32) {
    %c0_i32 = arith.constant 0 : i32
    %c0_i32_0 = arith.constant 0 : i32
    %c0_i32_1 = arith.constant 0 : i32
    %c0_i32_2 = arith.constant 0 : i32
    return %c0_i32, %c0_i32_0, %c0_i32_1 : i32, i32, i32
  }
  func.func @transform_6(%arg0: i32) -> (i32, i32, i32) {
    %c0_i32 = arith.constant 0 : i32
    %c0_i32_0 = arith.constant 0 : i32
    %c0_i32_1 = arith.constant 0 : i32
    %c0_i32_2 = arith.constant 0 : i32
    return %c0_i32, %c0_i32_0, %c0_i32_1 : i32, i32, i32
  }
  func.func @transform_7(%arg0: i32) -> (i32, i32, i32) {
    %c0_i32 = arith.constant 0 : i32
    %c0_i32_0 = arith.constant 0 : i32
    %c0_i32_1 = arith.constant 0 : i32
    %c0_i32_2 = arith.constant 0 : i32
    return %c0_i32, %c0_i32_0, %c0_i32_1 : i32, i32, i32
  }
  func.func @transform_8(%arg0: i32) -> (i32, i32, i32) {
    %c0_i32 = arith.constant 0 : i32
    %c0_i32_0 = arith.constant 0 : i32
    %c0_i32_1 = arith.constant 0 : i32
    return %arg0, %c0_i32, %c0_i32_0 : i32, i32, i32
  }
  func.func @transform_9(%arg0: i32) -> (i32, i32, i32) {
    %c0_i32 = arith.constant 0 : i32
    %c0_i32_0 = arith.constant 0 : i32
    %c0_i32_1 = arith.constant 0 : i32
    return %arg0, %c0_i32, %c0_i32_0 : i32, i32, i32
  }
}

module attributes {stable_mosaic.version = 11 : i64} {
  func.func @_bottleneck_kernel(%arg0: i32, %arg1: memref<4xf32, #tpu.memory_space<smem>>, %arg2: memref<1x16x128xf32, #tpu.memory_space<vmem>>, %arg3: memref<2x16x16xf32, #tpu.memory_space<vmem>>, %arg4: memref<2x16x1xf32, #tpu.memory_space<vmem>>, %arg5: memref<2x3x16x1xf32, #tpu.memory_space<vmem>>, %arg6: memref<2x16x1xf32, #tpu.memory_space<vmem>>, %arg7: memref<2x32x16xf32, #tpu.memory_space<vmem>>, %arg8: memref<2x32x1xf32, #tpu.memory_space<vmem>>, %arg9: memref<1x16x128xf32, #tpu.memory_space<vmem>>, %arg10: memref<1x16x128xf32, #tpu.memory_space<vmem>>) attributes {dimension_semantics = [#tpu.dimension_semantics<parallel>], iteration_bounds = array<i64: 2>, scalar_prefetch = 0 : i64, scratch_operands = 0 : i64, tpu.core_type = #tpu.core_type<tc>, window_params = [{transform_indices = @transform_0, window_bounds = array<i64: 4>}, {transform_indices = @transform_1, window_bounds = array<i64: 1, 16, 128>}, {pipeline_mode = #tpu.pipeline_mode<synchronous>, transform_indices = @transform_2, window_bounds = array<i64: 2, 16, 16>}, {pipeline_mode = #tpu.pipeline_mode<synchronous>, transform_indices = @transform_3, window_bounds = array<i64: 2, 16, 1>}, {pipeline_mode = #tpu.pipeline_mode<synchronous>, transform_indices = @transform_4, window_bounds = array<i64: 2, 3, 16, 1>}, {pipeline_mode = #tpu.pipeline_mode<synchronous>, transform_indices = @transform_5, window_bounds = array<i64: 2, 16, 1>}, {pipeline_mode = #tpu.pipeline_mode<synchronous>, transform_indices = @transform_6, window_bounds = array<i64: 2, 32, 16>}, {pipeline_mode = #tpu.pipeline_mode<synchronous>, transform_indices = @transform_7, window_bounds = array<i64: 2, 32, 1>}, {transform_indices = @transform_8, window_bounds = array<i64: 1, 16, 128>}, {transform_indices = @transform_9, window_bounds = array<i64: 1, 16, 128>}]} {
    %c0 = arith.constant 0 : index
    %c0_0 = arith.constant 0 : index
    %c0_1 = arith.constant 0 : index
    %0 = vector.load %arg2[%c0, %c0_0, %c0_1] : memref<1x16x128xf32, #tpu.memory_space<vmem>>, vector<1x16x128xf32>
    %1 = vector.shape_cast %0 : vector<1x16x128xf32> to vector<16x128xf32>
    %cst = arith.constant 0.000000e+00 : f32
    %2 = vector.broadcast %cst : f32 to vector<16x128xf32>
    %3 = tpu.iota {dimensions = array<i32: 1>} : vector<16x128xi32>
    %c0_2 = arith.constant 0 : index
    %4 = memref.load %arg1[%c0_2] : memref<4xf32, #tpu.memory_space<smem>>
    %c1 = arith.constant 1 : index
    %5 = memref.load %arg1[%c1] : memref<4xf32, #tpu.memory_space<smem>>
    %c0_3 = arith.constant 0 : index
    %c0_4 = arith.constant 0 : index
    %c0_5 = arith.constant 0 : index
    %6 = vector.load %arg3[%c0_3, %c0_4, %c0_5] : memref<2x16x16xf32, #tpu.memory_space<vmem>>, vector<1x16x16xf32>
    %7 = vector.shape_cast %6 : vector<1x16x16xf32> to vector<16x16xf32>
    %cst_6 = arith.constant dense<0.000000e+00> : vector<16x128xf32>
    %8 = tpu.matmul %7, %1, %cst_6 {dimension_numbers = #tpu.dot_dimension_numbers<[1], [0], [0], [1], [0, 0, 1, 1], [], []>} : vector<16x16xf32>, vector<16x128xf32>, vector<16x128xf32> -> vector<16x128xf32>
    %c0_7 = arith.constant 0 : index
    %c0_8 = arith.constant 0 : index
    %c0_9 = arith.constant 0 : index
    %9 = vector.load %arg4[%c0_7, %c0_8, %c0_9] : memref<2x16x1xf32, #tpu.memory_space<vmem>>, vector<1x16x1xf32>
    %10 = vector.shape_cast %9 : vector<1x16x1xf32> to vector<16x1xf32>
    %11 = vector.broadcast %10 : vector<16x1xf32> to vector<16x128xf32>
    %12 = arith.addf %8, %11 : vector<16x128xf32>
    %cst_10 = arith.constant 0.000000e+00 : f32
    %13 = vector.broadcast %cst_10 : f32 to vector<16x128xf32>
    %14 = arith.cmpf oge, %12, %13 : vector<16x128xf32>
    %15 = vector.broadcast %4 : f32 to vector<16x128xf32>
    %16 = arith.mulf %15, %12 : vector<16x128xf32>
    %17 = arith.select %14, %12, %16 : vector<16x128xi1>, vector<16x128xf32>
    %c0_11 = arith.constant 0 : index
    %c0_12 = arith.constant 0 : index
    %c0_13 = arith.constant 0 : index
    %c0_14 = arith.constant 0 : index
    %18 = vector.load %arg5[%c0_11, %c0_12, %c0_13, %c0_14] : memref<2x3x16x1xf32, #tpu.memory_space<vmem>>, vector<1x1x16x1xf32>
    %19 = vector.shape_cast %18 : vector<1x1x16x1xf32> to vector<16x1xf32>
    %c1_i32 = arith.constant 1 : i32
    %20 = tpu.dynamic_rotate %17 by %c1_i32 dim 1 : vector<16x128xf32>, i32 -> vector<16x128xf32>
    %c1_i32_15 = arith.constant 1 : i32
    %21 = vector.broadcast %c1_i32_15 : i32 to vector<16x128xi32>
    %22 = arith.cmpi sge, %3, %21 : vector<16x128xi32>
    %cst_16 = arith.constant 0.000000e+00 : f32
    %23 = vector.broadcast %cst_16 : f32 to vector<16x128xf32>
    %24 = arith.select %22, %20, %23 : vector<16x128xi1>, vector<16x128xf32>
    %25 = vector.broadcast %19 : vector<16x1xf32> to vector<16x128xf32>
    %26 = arith.mulf %25, %24 : vector<16x128xf32>
    %c0_17 = arith.constant 0 : index
    %c1_18 = arith.constant 1 : index
    %c0_19 = arith.constant 0 : index
    %c0_20 = arith.constant 0 : index
    %27 = vector.load %arg5[%c0_17, %c1_18, %c0_19, %c0_20] : memref<2x3x16x1xf32, #tpu.memory_space<vmem>>, vector<1x1x16x1xf32>
    %28 = vector.shape_cast %27 : vector<1x1x16x1xf32> to vector<16x1xf32>
    %29 = vector.broadcast %28 : vector<16x1xf32> to vector<16x128xf32>
    %30 = arith.mulf %29, %17 : vector<16x128xf32>
    %31 = arith.addf %26, %30 : vector<16x128xf32>
    %c0_21 = arith.constant 0 : index
    %c2 = arith.constant 2 : index
    %c0_22 = arith.constant 0 : index
    %c0_23 = arith.constant 0 : index
    %32 = vector.load %arg5[%c0_21, %c2, %c0_22, %c0_23] : memref<2x3x16x1xf32, #tpu.memory_space<vmem>>, vector<1x1x16x1xf32>
    %33 = vector.shape_cast %32 : vector<1x1x16x1xf32> to vector<16x1xf32>
    %c127_i32 = arith.constant 127 : i32
    %34 = tpu.dynamic_rotate %17 by %c127_i32 dim 1 : vector<16x128xf32>, i32 -> vector<16x128xf32>
    %c127_i32_24 = arith.constant 127 : i32
    %35 = vector.broadcast %c127_i32_24 : i32 to vector<16x128xi32>
    %36 = arith.cmpi slt, %3, %35 : vector<16x128xi32>
    %cst_25 = arith.constant 0.000000e+00 : f32
    %37 = vector.broadcast %cst_25 : f32 to vector<16x128xf32>
    %38 = arith.select %36, %34, %37 : vector<16x128xi1>, vector<16x128xf32>
    %39 = vector.broadcast %33 : vector<16x1xf32> to vector<16x128xf32>
    %40 = arith.mulf %39, %38 : vector<16x128xf32>
    %41 = arith.addf %31, %40 : vector<16x128xf32>
    %c0_26 = arith.constant 0 : index
    %c0_27 = arith.constant 0 : index
    %c0_28 = arith.constant 0 : index
    %42 = vector.load %arg6[%c0_26, %c0_27, %c0_28] : memref<2x16x1xf32, #tpu.memory_space<vmem>>, vector<1x16x1xf32>
    %43 = vector.shape_cast %42 : vector<1x16x1xf32> to vector<16x1xf32>
    %44 = vector.broadcast %43 : vector<16x1xf32> to vector<16x128xf32>
    %45 = arith.addf %41, %44 : vector<16x128xf32>
    %cst_29 = arith.constant 0.000000e+00 : f32
    %46 = vector.broadcast %cst_29 : f32 to vector<16x128xf32>
    %47 = arith.cmpf oge, %45, %46 : vector<16x128xf32>
    %48 = vector.broadcast %5 : f32 to vector<16x128xf32>
    %49 = arith.mulf %48, %45 : vector<16x128xf32>
    %50 = arith.select %47, %45, %49 : vector<16x128xi1>, vector<16x128xf32>
    %c0_30 = arith.constant 0 : index
    %c0_31 = arith.constant 0 : index
    %c0_32 = arith.constant 0 : index
    %51 = vector.load %arg7[%c0_30, %c0_31, %c0_32] : memref<2x32x16xf32, #tpu.memory_space<vmem>>, vector<1x32x16xf32>
    %52 = vector.shape_cast %51 : vector<1x32x16xf32> to vector<32x16xf32>
    %cst_33 = arith.constant dense<0.000000e+00> : vector<32x128xf32>
    %53 = tpu.matmul %52, %50, %cst_33 {dimension_numbers = #tpu.dot_dimension_numbers<[1], [0], [0], [1], [0, 0, 1, 1], [], []>} : vector<32x16xf32>, vector<16x128xf32>, vector<32x128xf32> -> vector<32x128xf32>
    %c0_34 = arith.constant 0 : index
    %c0_35 = arith.constant 0 : index
    %c0_36 = arith.constant 0 : index
    %54 = vector.load %arg8[%c0_34, %c0_35, %c0_36] : memref<2x32x1xf32, #tpu.memory_space<vmem>>, vector<1x32x1xf32>
    %55 = vector.shape_cast %54 : vector<1x32x1xf32> to vector<32x1xf32>
    %56 = vector.broadcast %55 : vector<32x1xf32> to vector<32x128xf32>
    %57 = arith.addf %53, %56 : vector<32x128xf32>
    %58 = vector.extract_strided_slice %57 {offsets = [0, 0], sizes = [16, 128], strides = [1, 1]} : vector<32x128xf32> to vector<16x128xf32>
    %59 = arith.addf %1, %58 : vector<16x128xf32>
    %60 = vector.extract_strided_slice %57 {offsets = [16, 0], sizes = [16, 128], strides = [1, 1]} : vector<32x128xf32> to vector<16x128xf32>
    %61 = arith.addf %2, %60 : vector<16x128xf32>
    %c2_37 = arith.constant 2 : index
    %62 = memref.load %arg1[%c2_37] : memref<4xf32, #tpu.memory_space<smem>>
    %c3 = arith.constant 3 : index
    %63 = memref.load %arg1[%c3] : memref<4xf32, #tpu.memory_space<smem>>
    %c1_38 = arith.constant 1 : index
    %c0_39 = arith.constant 0 : index
    %c0_40 = arith.constant 0 : index
    %64 = vector.load %arg3[%c1_38, %c0_39, %c0_40] : memref<2x16x16xf32, #tpu.memory_space<vmem>>, vector<1x16x16xf32>
    %65 = vector.shape_cast %64 : vector<1x16x16xf32> to vector<16x16xf32>
    %cst_41 = arith.constant dense<0.000000e+00> : vector<16x128xf32>
    %66 = tpu.matmul %65, %59, %cst_41 {dimension_numbers = #tpu.dot_dimension_numbers<[1], [0], [0], [1], [0, 0, 1, 1], [], []>} : vector<16x16xf32>, vector<16x128xf32>, vector<16x128xf32> -> vector<16x128xf32>
    %c1_42 = arith.constant 1 : index
    %c0_43 = arith.constant 0 : index
    %c0_44 = arith.constant 0 : index
    %67 = vector.load %arg4[%c1_42, %c0_43, %c0_44] : memref<2x16x1xf32, #tpu.memory_space<vmem>>, vector<1x16x1xf32>
    %68 = vector.shape_cast %67 : vector<1x16x1xf32> to vector<16x1xf32>
    %69 = vector.broadcast %68 : vector<16x1xf32> to vector<16x128xf32>
    %70 = arith.addf %66, %69 : vector<16x128xf32>
    %cst_45 = arith.constant 0.000000e+00 : f32
    %71 = vector.broadcast %cst_45 : f32 to vector<16x128xf32>
    %72 = arith.cmpf oge, %70, %71 : vector<16x128xf32>
    %73 = vector.broadcast %62 : f32 to vector<16x128xf32>
    %74 = arith.mulf %73, %70 : vector<16x128xf32>
    %75 = arith.select %72, %70, %74 : vector<16x128xi1>, vector<16x128xf32>
    %c1_46 = arith.constant 1 : index
    %c0_47 = arith.constant 0 : index
    %c0_48 = arith.constant 0 : index
    %c0_49 = arith.constant 0 : index
    %76 = vector.load %arg5[%c1_46, %c0_47, %c0_48, %c0_49] : memref<2x3x16x1xf32, #tpu.memory_space<vmem>>, vector<1x1x16x1xf32>
    %77 = vector.shape_cast %76 : vector<1x1x16x1xf32> to vector<16x1xf32>
    %c2_i32 = arith.constant 2 : i32
    %78 = tpu.dynamic_rotate %75 by %c2_i32 dim 1 : vector<16x128xf32>, i32 -> vector<16x128xf32>
    %c2_i32_50 = arith.constant 2 : i32
    %79 = vector.broadcast %c2_i32_50 : i32 to vector<16x128xi32>
    %80 = arith.cmpi sge, %3, %79 : vector<16x128xi32>
    %cst_51 = arith.constant 0.000000e+00 : f32
    %81 = vector.broadcast %cst_51 : f32 to vector<16x128xf32>
    %82 = arith.select %80, %78, %81 : vector<16x128xi1>, vector<16x128xf32>
    %83 = vector.broadcast %77 : vector<16x1xf32> to vector<16x128xf32>
    %84 = arith.mulf %83, %82 : vector<16x128xf32>
    %c1_52 = arith.constant 1 : index
    %c1_53 = arith.constant 1 : index
    %c0_54 = arith.constant 0 : index
    %c0_55 = arith.constant 0 : index
    %85 = vector.load %arg5[%c1_52, %c1_53, %c0_54, %c0_55] : memref<2x3x16x1xf32, #tpu.memory_space<vmem>>, vector<1x1x16x1xf32>
    %86 = vector.shape_cast %85 : vector<1x1x16x1xf32> to vector<16x1xf32>
    %87 = vector.broadcast %86 : vector<16x1xf32> to vector<16x128xf32>
    %88 = arith.mulf %87, %75 : vector<16x128xf32>
    %89 = arith.addf %84, %88 : vector<16x128xf32>
    %c1_56 = arith.constant 1 : index
    %c2_57 = arith.constant 2 : index
    %c0_58 = arith.constant 0 : index
    %c0_59 = arith.constant 0 : index
    %90 = vector.load %arg5[%c1_56, %c2_57, %c0_58, %c0_59] : memref<2x3x16x1xf32, #tpu.memory_space<vmem>>, vector<1x1x16x1xf32>
    %91 = vector.shape_cast %90 : vector<1x1x16x1xf32> to vector<16x1xf32>
    %c126_i32 = arith.constant 126 : i32
    %92 = tpu.dynamic_rotate %75 by %c126_i32 dim 1 : vector<16x128xf32>, i32 -> vector<16x128xf32>
    %c126_i32_60 = arith.constant 126 : i32
    %93 = vector.broadcast %c126_i32_60 : i32 to vector<16x128xi32>
    %94 = arith.cmpi slt, %3, %93 : vector<16x128xi32>
    %cst_61 = arith.constant 0.000000e+00 : f32
    %95 = vector.broadcast %cst_61 : f32 to vector<16x128xf32>
    %96 = arith.select %94, %92, %95 : vector<16x128xi1>, vector<16x128xf32>
    %97 = vector.broadcast %91 : vector<16x1xf32> to vector<16x128xf32>
    %98 = arith.mulf %97, %96 : vector<16x128xf32>
    %99 = arith.addf %89, %98 : vector<16x128xf32>
    %c1_62 = arith.constant 1 : index
    %c0_63 = arith.constant 0 : index
    %c0_64 = arith.constant 0 : index
    %100 = vector.load %arg6[%c1_62, %c0_63, %c0_64] : memref<2x16x1xf32, #tpu.memory_space<vmem>>, vector<1x16x1xf32>
    %101 = vector.shape_cast %100 : vector<1x16x1xf32> to vector<16x1xf32>
    %102 = vector.broadcast %101 : vector<16x1xf32> to vector<16x128xf32>
    %103 = arith.addf %99, %102 : vector<16x128xf32>
    %cst_65 = arith.constant 0.000000e+00 : f32
    %104 = vector.broadcast %cst_65 : f32 to vector<16x128xf32>
    %105 = arith.cmpf oge, %103, %104 : vector<16x128xf32>
    %106 = vector.broadcast %63 : f32 to vector<16x128xf32>
    %107 = arith.mulf %106, %103 : vector<16x128xf32>
    %108 = arith.select %105, %103, %107 : vector<16x128xi1>, vector<16x128xf32>
    %c1_66 = arith.constant 1 : index
    %c0_67 = arith.constant 0 : index
    %c0_68 = arith.constant 0 : index
    %109 = vector.load %arg7[%c1_66, %c0_67, %c0_68] : memref<2x32x16xf32, #tpu.memory_space<vmem>>, vector<1x32x16xf32>
    %110 = vector.shape_cast %109 : vector<1x32x16xf32> to vector<32x16xf32>
    %cst_69 = arith.constant dense<0.000000e+00> : vector<32x128xf32>
    %111 = tpu.matmul %110, %108, %cst_69 {dimension_numbers = #tpu.dot_dimension_numbers<[1], [0], [0], [1], [0, 0, 1, 1], [], []>} : vector<32x16xf32>, vector<16x128xf32>, vector<32x128xf32> -> vector<32x128xf32>
    %c1_70 = arith.constant 1 : index
    %c0_71 = arith.constant 0 : index
    %c0_72 = arith.constant 0 : index
    %112 = vector.load %arg8[%c1_70, %c0_71, %c0_72] : memref<2x32x1xf32, #tpu.memory_space<vmem>>, vector<1x32x1xf32>
    %113 = vector.shape_cast %112 : vector<1x32x1xf32> to vector<32x1xf32>
    %114 = vector.broadcast %113 : vector<32x1xf32> to vector<32x128xf32>
    %115 = arith.addf %111, %114 : vector<32x128xf32>
    %116 = vector.extract_strided_slice %115 {offsets = [0, 0], sizes = [16, 128], strides = [1, 1]} : vector<32x128xf32> to vector<16x128xf32>
    %117 = arith.addf %59, %116 : vector<16x128xf32>
    %118 = vector.extract_strided_slice %115 {offsets = [16, 0], sizes = [16, 128], strides = [1, 1]} : vector<32x128xf32> to vector<16x128xf32>
    %119 = arith.addf %61, %118 : vector<16x128xf32>
    %c0_73 = arith.constant 0 : index
    %c0_74 = arith.constant 0 : index
    %c0_75 = arith.constant 0 : index
    %120 = vector.load %arg9[%c0_73, %c0_74, %c0_75] : memref<1x16x128xf32, #tpu.memory_space<vmem>>, vector<1x16x128xf32>
    %121 = vector.shape_cast %120 : vector<1x16x128xf32> to vector<16x128xf32>
    %122 = vector.shape_cast %117 : vector<16x128xf32> to vector<1x16x128xf32>
    tpu.vector_store %arg9[%c0_73, %c0_74, %c0_75], %122 {strides = array<i32>} : memref<1x16x128xf32, #tpu.memory_space<vmem>>, vector<1x16x128xf32>,
    %c0_76 = arith.constant 0 : index
    %c0_77 = arith.constant 0 : index
    %c0_78 = arith.constant 0 : index
    %123 = vector.load %arg10[%c0_76, %c0_77, %c0_78] : memref<1x16x128xf32, #tpu.memory_space<vmem>>, vector<1x16x128xf32>
    %124 = vector.shape_cast %123 : vector<1x16x128xf32> to vector<16x128xf32>
    %125 = vector.shape_cast %119 : vector<16x128xf32> to vector<1x16x128xf32>
    tpu.vector_store %arg10[%c0_76, %c0_77, %c0_78], %125 {strides = array<i32>} : memref<1x16x128xf32, #tpu.memory_space<vmem>>, vector<1x16x128xf32>,
    return
  }
  func.func @transform_0(%arg0: i32) -> i32 {
    %c0_i32 = arith.constant 0 : i32
    %c0_i32_0 = arith.constant 0 : i32
    return %c0_i32 : i32
  }
  func.func @transform_1(%arg0: i32) -> (i32, i32, i32) {
    %c0_i32 = arith.constant 0 : i32
    %c0_i32_0 = arith.constant 0 : i32
    %c0_i32_1 = arith.constant 0 : i32
    return %arg0, %c0_i32, %c0_i32_0 : i32, i32, i32
  }
  func.func @transform_2(%arg0: i32) -> (i32, i32, i32) {
    %c0_i32 = arith.constant 0 : i32
    %c0_i32_0 = arith.constant 0 : i32
    %c0_i32_1 = arith.constant 0 : i32
    %c0_i32_2 = arith.constant 0 : i32
    return %c0_i32, %c0_i32_0, %c0_i32_1 : i32, i32, i32
  }
  func.func @transform_3(%arg0: i32) -> (i32, i32, i32) {
    %c0_i32 = arith.constant 0 : i32
    %c0_i32_0 = arith.constant 0 : i32
    %c0_i32_1 = arith.constant 0 : i32
    %c0_i32_2 = arith.constant 0 : i32
    return %c0_i32, %c0_i32_0, %c0_i32_1 : i32, i32, i32
  }
  func.func @transform_4(%arg0: i32) -> (i32, i32, i32, i32) {
    %c0_i32 = arith.constant 0 : i32
    %c0_i32_0 = arith.constant 0 : i32
    %c0_i32_1 = arith.constant 0 : i32
    %c0_i32_2 = arith.constant 0 : i32
    %c0_i32_3 = arith.constant 0 : i32
    return %c0_i32, %c0_i32_0, %c0_i32_1, %c0_i32_2 : i32, i32, i32, i32
  }
  func.func @transform_5(%arg0: i32) -> (i32, i32, i32) {
    %c0_i32 = arith.constant 0 : i32
    %c0_i32_0 = arith.constant 0 : i32
    %c0_i32_1 = arith.constant 0 : i32
    %c0_i32_2 = arith.constant 0 : i32
    return %c0_i32, %c0_i32_0, %c0_i32_1 : i32, i32, i32
  }
  func.func @transform_6(%arg0: i32) -> (i32, i32, i32) {
    %c0_i32 = arith.constant 0 : i32
    %c0_i32_0 = arith.constant 0 : i32
    %c0_i32_1 = arith.constant 0 : i32
    %c0_i32_2 = arith.constant 0 : i32
    return %c0_i32, %c0_i32_0, %c0_i32_1 : i32, i32, i32
  }
  func.func @transform_7(%arg0: i32) -> (i32, i32, i32) {
    %c0_i32 = arith.constant 0 : i32
    %c0_i32_0 = arith.constant 0 : i32
    %c0_i32_1 = arith.constant 0 : i32
    %c0_i32_2 = arith.constant 0 : i32
    return %c0_i32, %c0_i32_0, %c0_i32_1 : i32, i32, i32
  }
  func.func @transform_8(%arg0: i32) -> (i32, i32, i32) {
    %c0_i32 = arith.constant 0 : i32
    %c0_i32_0 = arith.constant 0 : i32
    %c0_i32_1 = arith.constant 0 : i32
    return %arg0, %c0_i32, %c0_i32_0 : i32, i32, i32
  }
  func.func @transform_9(%arg0: i32) -> (i32, i32, i32) {
    %c0_i32 = arith.constant 0 : i32
    %c0_i32_0 = arith.constant 0 : i32
    %c0_i32_1 = arith.constant 0 : i32
    return %arg0, %c0_i32, %c0_i32_0 : i32, i32, i32
  }
}

</mosaic_0001>

<bundles_post_ra>
// kernel: tcn_separation_part.7
= control target key start
LH: loop header
LB: loop body
LE: loop exit
PB: predicated region body
PF: predicated region fallthrough
CT: control target
= control target key end

     0   :  { %14 = vsyncpa [#allocation3], 0  ;;  %s926_s27 = smov 0   ;;  %s1001_s0 = inlined_call_operand.vmem [shape: f32[2], index: 0, kind: input, shape index: {}]   ;;  %s1002_s1 = inlined_call_operand.vmem [shape: f32[2,8,128], index: 1, kind: input, shape index: {}]   ;;  %s1003_s2 = inlined_call_operand.vmem [shape: f32[2,16,128], index: 2, kind: input, shape index: {}]   ;;  %s1004_s3 = inlined_call_operand.vmem [shape: f32[8,72], index: 3, kind: input, shape index: {}]   ;;  %s1005_s4 = inlined_call_operand.vmem [shape: f32[8,1], index: 4, kind: input, shape index: {}]   ;;  %s1006_s5 = inlined_call_operand.vmem [shape: f32[16,72], index: 5, kind: input, shape index: {}]   ;;  %s1007_s6 = inlined_call_operand.vmem [shape: f32[16,1], index: 6, kind: input, shape index: {}]   ;;  %s1008_s7 = inlined_call_operand.vmem [shape: f32[2,8,128], index: 7, kind: output, shape index: {0}]   ;;  %s1009_s8 = inlined_call_operand.vmem [shape: f32[2,16,128], index: 8, kind: output, shape index: {1}]  }
   0x1 LB: > { %s675_s28 = sadd.s32 4294967295, %s871_s27   ;;  %p677_p0 = scmp.ge.s32.totalorder %s871_s27, 1  ;;  %s871_s27 = sphi %s926_s27, %s20_s27  }
   0x2   : > { %p234_p1 = scmp.lt.s32.totalorder %s871_s27, 3  ;;  %s247_s9 = sshll.u32 %s1001_s0, 4  ;;  %s248_s9 = int_to_ptr.vmem [resolvable:$true] %s247_s9 }
   0x3   : > { %p816_p3 = scmp.eq.s32.totalorder %s675_s28, 0  ;;  %s846_s11 = scalar_lea.vmem %s248_s9, 16 }
   0x4   : > { %p937_p2 = pnand %p677_p0, %p234_p1  ;;  %p847_p6 = scmp.ne.s32.totalorder %s248_s9, %s846_s11 }
   0x5   : > { %p854_p10 = scmp.lt.s32.totalorder %s248_s9, %s248_s9  ;;  %p855_p11 = scmp.lt.s32.totalorder %s846_s11, %s846_s11 }
   0x6   : > { %p812_p4 = pneg %p937_p2 }
   0x7   : > { %p856_p12 = por %p855_p11, %p854_p10 }
   0x8   : > { %p813_p5 = pnand %p816_p3, %p812_p4 }
   0xa   : > { %p848_p7 = pneg %p813_p5 }
   0xc   : > { %p849_p8 = pnand %p848_p7, %p847_p6 }
   0xe   : > { %p850_p9 = pneg %p849_p8 }
  0x10   : > { %p857_p13 = pnand %p856_p12, %p850_p9 }
  0x12   : > { %860 = shalt.err (!%p857_p13)
}
  0x13   : > { %s873_s12 = smov [#allocation2]   ;;  %287 = sbr.rel (%p937_p2) target bundleno = 394 (0x18a), region = 48 }
  0x14   : > { %815 = dma.vmem_to_smem (!%p813_p5), %s248_s9, 16, %s873_s12, [#allocation3]  }
  0x1a   : > { %866 = dma.done.wait (%p816_p3), [#allocation3], 16  }
  0x1b   : > { %868 = vsyncadd (%p816_p3), [#allocation3], 4294967280 }
  0x1c   : > { %293 = sfence }
  0x1d   : > { %p330_p0 = scmp.lt.s32.totalorder %s675_s28, 1  ;;  %v874_v0 = vmov 0.0|0.0   ;;  %s875_s21 = smov 1   ;;  %vm877_vm0 = vmmov 0   ;;  %v878_v6 = vmov 0.0   ;;  %vm380_vm1 = vcmask 588800  }
  0x1e   : > { %771 = vmatprep.subr.bf16.mxu0 %v874_v0  ;;  %s876_s22 = smov 127   ;;  %747 = vmatprep.mubr.msk.f32.mxu0 %vm877_vm0, %v878_v6  ;;  %v460_v7 = vld [vmem:[%s1006_s5] sm:$0xff]  ;;  %v879_v10 = vmov 0   ;;  %v463_v11 = vld [vmem:[%s1007_s6 + $0x8] sm:$0xff]  ;;  %v351_v12 = vlaneseq  ;;  %vm880_vm4 = vmmov 1   ;;  %s703_s18 = sld [smem:[#allocation2 + $0x1]] }
  0x1f   : > { %s1012_s28 = smov (!%p330_p0, %s675_s28), 1  ;;  %768 = vmatprep.mubr.msk.f32.mxu1 %vm380_vm1, %v460_v7  ;;  %v462_v8 = vld [vmem:[%s1007_s6] sm:$0xff]  ;;  %845 = vset.pattern.permute.xlu1 %v879_v10  ;;  %v461_v26 = vld [vmem:[%s1006_s5 + $0x8] sm:$0xff] }
  0x20   : > { %s682_s13 = sshll.u32 %s1012_s28, 3  ;;  %s706_s14 = sshll.u32 %s1012_s28, 4  ;;  %v374_v9 = vld [vmem:[%s1005_s4] sm:$0xff]  ;;  %844 = vset.pattern.permute.xlu0 %v879_v10  ;;  %v352_v13 = vand.u32 127, %v351_v12 }
  0x21   : > { %s333_s17 = scalar_lea.vmem %s1002_s1, %s682_s13  ;;  %s338_s20 = scalar_lea.vmem %s1003_s2, %s706_s14  ;;  %v373_v25 = vld [vmem:[%s1004_s3] sm:$0xff] }
  0x22   : > { %v348_v1 = vld [vmem:[%s333_s17] sm:$0xff]  ;;  %v350_v3 = vld [vmem:[%s338_s20 + $0x8] sm:$0xff]  ;;  %vm359_vm2 = vcmp.ge.s32.totalorder %v352_v13, 1  ;;  %vm369_vm6 = vcmp.lt.s32.totalorder %v352_v13, 127  ;;  %s455_s17 = sld [smem:[#allocation2]]  ;;  %s347_s24 = scalar_lea.vmem %s1009_s8, %s706_s14 }
  0x23   : > { %v349_v2 = vld [vmem:[%s338_s20] sm:$0xff]  ;;  %vm773_vm3 = vmpackc.low %vm359_vm2, %vm359_vm2 }
  0x24   : > { %v834_v4 = vpack.i.bf16 %v349_v2, %v348_v1  ;;  %v780_v5 = vpack.c.bf16 %v350_v3, %v349_v2  ;;  %vm777_vm5 = vmpackc.low %vm880_vm4, %vm359_vm2  ;;  %v558_v34 = vstv %s703_s18 }
  0x25   : > { %vm784_vm7 = vmpackc.low %vm369_vm6, %vm369_vm6 }
  0x26   : > { %835 = vrot.lane.b32.xlu0 %v834_v4, %s875_s21  ;;  %840 = vrot.lane.b32.xlu1 %v834_v4, %s876_s22 }
  0x28   : > { %v456_v31 = vstv %s455_s17 }
  0x2a   : > { %357 = vrot.lane.b32.xlu0 %v350_v3, %s875_s21  ;;  %367 = vrot.lane.b32.xlu1 %v350_v3, %s876_s22  ;;  %s342_s21 = scalar_lea.vmem %s1008_s7, %s682_s13 }
  0x2e   : > { %466 = vperm.xlu1 %845, %v462_v8   ;;  %377 = vperm.xlu0 %844, %v374_v9  }
  0x32   : > { %471 = vperm.xlu1 %845, %v463_v11  }
  0x98   : > { %v836_v14 = vpop.permute.xlu0 %835  ;;  %v841_v19 = vpop.permute.xlu1 %840 }
  0x99   : > { %v838_v15 = vunpack.i.h.bf16 %v836_v14  ;;  %v837_v16 = vunpack.i.l.bf16 %v836_v14  ;;  %v843_v21 = vunpack.i.h.bf16 %v841_v19  ;;  %v842_v22 = vunpack.i.l.bf16 %v841_v19 }
  0x9b   : > { %v772_v17 = vpack.c.bf16 %v838_v15, %v837_v16  ;;  %v783_v23 = vpack.c.bf16 %v843_v21, %v842_v22 }
  0x9c   : > { %v358_v18 = vpop.permute.xlu0 %357  ;;  %v368_v24 = vpop.permute.xlu1 %367 }
  0x9d   : > { %774 = vmatpush3.bf16.msk.msra.mxu0 %vm773_vm3, %v772_v17  ;;  %788 = vmatprep.subr.msk.bf16.mxu1 %vm773_vm3, %v772_v17  ;;  %v776_v20 = vpack.c.bf16 %v348_v1, %v358_v18 }
  0x9e   : > { %791 = vmatpush3.bf16.msk.msra.mxu1 %vm773_vm3, %v772_v17  ;;  %775 = vmatprep.subr.bf16.mxu0 %v874_v0 }
  0x9f   : > { %794 = vmatprep.subr.msk.bf16.mxu1 %vm777_vm5, %v776_v20 }
  0xa1   : > { %778 = vmatpush3.bf16.msk.msra.mxu0 %vm777_vm5, %v776_v20 }
  0xa2   : > { %797 = vmatpush3.bf16.msk.msra.mxu1 %vm777_vm5, %v776_v20  ;;  %779 = vmatprep.subr.bf16.mxu0 %v874_v0 }
  0xa3   : > { %799 = vmatprep.subr.bf16.mxu1 %v780_v5 }
  0xa5   : > { %781 = vmatpush3.bf16.msra.mxu0 %v780_v5 }
  0xa6   : > { %801 = vmatpush3.bf16.msra.mxu1 %v780_v5  ;;  %782 = vmatprep.subr.bf16.mxu0 %v874_v0 }
  0xa7   : > { %804 = vmatprep.subr.msk.bf16.mxu1 %vm784_vm7, %v783_v23 }
  0xa9   : > { %785 = vmatpush3.bf16.msk.msra.mxu0 %vm784_vm7, %v783_v23 }
  0xaa   : > { %807 = vmatpush3.bf16.msk.msra.mxu1 %vm784_vm7, %v783_v23  ;;  %745 = vmatprep.subr.mxu0 %v878_v6 }
  0xab   : > { %766 = vmatprep.subr.msk.mxu1 %vm369_vm6, %v368_v24 }
  0xad   : > { %746 = vmatpush3.msk.msra.mxu0 %vm369_vm6, %v368_v24  ;;  %v467_v27 = vpop.permute.xlu1 %466  ;;  %v378_v28 = vpop.permute.xlu0 %377 }
  0xae   : > { %748 = vmatmul.mubr.msk.f32.vlgmr.msra.gmra.mrb[0].mxu0 %vm380_vm1, %v373_v25  ;;  %767 = vmatpush3.msk.msra.mxu1 %vm369_vm6, %v368_v24 }
  0xaf   : > { %769 = vmatmul.mubr.msk.f32.vlgmr.msra.gmra.mrb[0].mxu1 %vm380_vm1, %v461_v26 }
  0xb1   : > { %v472_v29 = vpop.permute.xlu1 %471 }
 0x181   : > { %v450_v30 = vpop.f32.mrb[0].mxu0 }
 0x182   : > { %v451_v32 = vadd.f32 %v450_v30, %v378_v28  ;;  %v770_v33 = vpop.f32.mrb[0].mxu1  ;;  %v749_v35 = vpop.f32.mrb[1].mxu0 }
 0x183   : > { %v552_v36 = vadd.f32 %v770_v33, %v472_v29  ;;  %v546_v37 = vpop.f32.mrb[1].mxu1 }
 0x184   : > { %vm454_vm8 = vcmp.ge.f32.partialorder %v451_v32, 0.0  ;;  %v457_v38 = vmul.f32 %v456_v31, %v451_v32  ;;  %v547_v39 = vadd.f32 %v546_v37, %v467_v27 }
 0x185   : > { %vm556_vm9 = vcmp.ge.f32.partialorder %v552_v36, 0.0  ;;  %v560_v40 = vmul.f32 %v558_v34, %v552_v36 }
 0x186   : > { %v458_v41 = vsel %vm454_vm8, %v451_v32, %v457_v38  ;;  %vm555_vm10 = vcmp.ge.f32.partialorder %v547_v39, 0.0  ;;  %v559_v42 = vmul.f32 %v558_v34, %v547_v39 }
 0x187   : > { %459 = vst [vmem:[%s342_s21] sm:$0xff] %v458_v41  ;;  %v562_v43 = vsel %vm556_vm9, %v552_v36, %v560_v40 }
 0x188   : > { %564 = vst [vmem:[%s347_s24 + $0x8] sm:$0xff] %v562_v43  ;;  %v561_v44 = vsel %vm555_vm10, %v547_v39, %v559_v42 }
 0x189   : > { %563 = vst [vmem:[%s347_s24] sm:$0xff] %v561_v44 }
 0x18a PF: > { %s20_s27 = sadd.s32 1, %s871_s27  }
 0x18b   : > { %p17_p1 = scmp.ge.s32.totalorder %s20_s27, 4  }
 0x18d   :  { %19 = sbr.rel (!%p17_p1) target bundleno = 1 (0x1), region = 98 }
 0x194   :  { %600 = vsyncpa [#allocation3], 1 }
 0x195   :  { %602 = vsyncpa [#allocation3 + $0x1], 1 }

// kernel: tcn_separation_part.5
= control target key start
LH: loop header
LB: loop body
LE: loop exit
PB: predicated region body
PF: predicated region fallthrough
CT: control target
= control target key end

     0   :  { %15 = vsyncpa [#allocation3], 0  ;;  %s1228_s30 = smov 0   ;;  %s1398_s0 = inlined_call_operand.vmem [shape: f32[4], index: 0, kind: input, shape index: {}]   ;;  %s1399_s1 = inlined_call_operand.vmem [shape: f32[2,8,128], index: 1, kind: input, shape index: {}]   ;;  %s1400_s2 = inlined_call_operand.vmem [shape: f32[2,16,8], index: 2, kind: input, shape index: {}]   ;;  %s1401_s3 = inlined_call_operand.vmem [shape: f32[2,16,1], index: 3, kind: input, shape index: {}]   ;;  %s1402_s4 = inlined_call_operand.vmem [shape: f32[2,3,16,1], index: 4, kind: input, shape index: {}]   ;;  %s1403_s5 = inlined_call_operand.vmem [shape: f32[2,16,1], index: 5, kind: input, shape index: {}]   ;;  %s1404_s6 = inlined_call_operand.vmem [shape: f32[2,16,16], index: 6, kind: input, shape index: {}]   ;;  %s1405_s7 = inlined_call_operand.vmem [shape: f32[2,16,1], index: 7, kind: input, shape index: {}]   ;;  %s1406_s8 = inlined_call_operand.vmem [shape: f32[2,8,128], index: 8, kind: output, shape index: {0}]   ;;  %s1407_s9 = inlined_call_operand.vmem [shape: f32[2,8,128], index: 9, kind: output, shape index: {1}]  }
   0x1 LB: > { %s1234_s10 = sadd.s32 4294967295, %s1170_s30   ;;  %p1032_p0 = scmp.ge.s32.totalorder %s1170_s30, 1  ;;  %s1170_s30 = sphi %s1228_s30, %s21_s30  }
   0x2   : > { %p251_p1 = scmp.lt.s32.totalorder %s1170_s30, 3  ;;  %s264_s13 = sshll.u32 %s1398_s0, 4  ;;  %s265_s13 = int_to_ptr.vmem [resolvable:$true] %s264_s13 }
   0x3   : > { %p1127_p3 = scmp.eq.s32.totalorder %s1234_s10, 0  ;;  %s1145_s15 = scalar_lea.vmem %s265_s13, 16 }
   0x4   : > { %p1241_p2 = pnand %p1032_p0, %p251_p1  ;;  %p1146_p6 = scmp.ne.s32.totalorder %s265_s13, %s1145_s15 }
   0x5   : > { %p1153_p10 = scmp.lt.s32.totalorder %s265_s13, %s265_s13  ;;  %p1154_p11 = scmp.lt.s32.totalorder %s1145_s15, %s1145_s15 }
   0x6   : > { %p1123_p4 = pneg %p1241_p2 }
   0x7   : > { %p1155_p12 = por %p1154_p11, %p1153_p10 }
   0x8   : > { %p1124_p5 = pnand %p1127_p3, %p1123_p4 }
   0xa   : > { %p1147_p7 = pneg %p1124_p5 }
   0xc   : > { %p1148_p8 = pnand %p1147_p7, %p1146_p6 }
   0xe   : > { %p1149_p9 = pneg %p1148_p8 }
  0x10   : > { %p1156_p13 = pnand %p1155_p12, %p1149_p9 }
  0x12   : > { %1159 = shalt.err (!%p1156_p13)
}
  0x13   : > { %s1172_s16 = smov [#allocation2]   ;;  %302 = sbr.rel (%p1241_p2) target bundleno = 1180 (0x49c), region = 52 }
  0x14   : > { %1126 = dma.vmem_to_smem (!%p1124_p5), %s265_s13, 16, %s1172_s16, [#allocation3]  }
  0x1a   : > { %1165 = dma.done.wait (%p1127_p3), [#allocation3], 16  }
  0x1b   : > { %1167 = vsyncadd (%p1127_p3), [#allocation3], 4294967280 }
  0x1c   : > { %308 = sfence }
  0x1d   : > { %p341_p0 = scmp.lt.s32.totalorder %s1234_s10, 1  ;;  %v358_v0 = vld [vmem:[%s1400_s2] sm:$0xff]  ;;  %vm372_vm0 = vcmask 64512   ;;  %v1173_v2 = vmov 0   ;;  %v361_v4 = vld [vmem:[%s1401_s3 + $0x8] sm:$0xff]  ;;  %v1043_v8 = vld [vmem:[%s1402_s4 + $0x10] sm:$0xff]  ;;  %v354_v42 = vlaneseq }
  0x1e   : > { %v360_v1 = vld [vmem:[%s1401_s3] sm:$0xff]  ;;  %1089 = vmatprep.mubr.msk.f32.mxu0 %vm372_vm0, %v358_v0  ;;  %1143 = vset.pattern.permute.xlu0 %v1173_v2  ;;  %v462_v5 = vld [vmem:[%s1402_s4 + $0x8] sm:$0xff]  ;;  %v1044_v9 = vld [vmem:[%s1402_s4 + $0x18] sm:$0xff]  ;;  %s356_s26 = sld [smem:[#allocation2]]  ;;  %s1174_s27 = smov 1   ;;  %vm558_vm3 = vcmask 130048  }
  0x1f   : > { %s1410_s10 = smov (!%p341_p0, %s1234_s10), 1  ;;  %364 = vperm.xlu0 %1143, %v360_v1   ;;  %1144 = vset.pattern.permute.xlu1 %v1173_v2  ;;  %v461_v3 = vld [vmem:[%s1402_s4] sm:$0xff]  ;;  %v359_v7 = vld [vmem:[%s1400_s2 + $0x8] sm:$0xff]  ;;  %s1175_s28 = smov 127   ;;  %v1053_v25 = vld [vmem:[%s1401_s3 + $0x10] sm:$0xff]  ;;  %v1343_v44 = vand.u32 127, %v354_v42 }
  0x20   : > { %472 = vperm.xlu1 %1144, %v461_v3   ;;  %s1271_s25 = sshll.u32 %s1410_s10, 3  ;;  %v1045_v10 = vld [vmem:[%s1402_s4 + $0x20] sm:$0xff]  ;;  %v1046_v11 = vld [vmem:[%s1402_s4 + $0x28] sm:$0xff]  ;;  %v1057_v28 = vld [vmem:[%s1402_s4 + $0x30] sm:$0xff]  ;;  %s1040_s14 = sld [smem:[#allocation2 + $0x1]] }
  0x21   : > { %s344_s11 = scalar_lea.vmem %s1399_s1, %s1271_s25  ;;  %v523_v12 = vld [vmem:[%s1403_s5] sm:$0xff]  ;;  %v524_v13 = vld [vmem:[%s1403_s5 + $0x8] sm:$0xff]  ;;  %v1054_v29 = vld [vmem:[%s1401_s3 + $0x18] sm:$0xff]  ;;  %vm467_vm4 = vcmp.ge.s32.totalorder %v1343_v44, 1  ;;  %vm506_vm5 = vcmp.lt.s32.totalorder %v1343_v44, 127  ;;  %s1049_s21 = sld [smem:[#allocation2 + $0x2]] }
  0x22   : > { %v1280_v6 = vld [vmem:[%s344_s11] sm:$0xff]  ;;  %v1058_v31 = vld [vmem:[%s1402_s4 + $0x38] sm:$0xff]  ;;  %v1061_v32 = vld [vmem:[%s1402_s4 + $0x50] sm:$0xff]  ;;  %s1176_s22 = smov 2   ;;  %s1177_s23 = smov 126   ;;  %vm755_vm10 = vcmp.ge.s32.totalorder %v1343_v44, 2 }
  0x23   : > { %369 = vperm.xlu0 %1143, %v361_v4   ;;  %1087 = vmatprep.subr.mxu0 %v1280_v6  ;;  %v544_v26 = vld [vmem:[%s1404_s6] sm:$0xff]  ;;  %v1060_v33 = vld [vmem:[%s1402_s4 + $0x48] sm:$0xff]  ;;  %v1063_v34 = vld [vmem:[%s1403_s5 + $0x10] sm:$0xff]  ;;  %s1050_s10 = sld [smem:[#allocation2 + $0x3]]  ;;  %vm794_vm11 = vcmp.lt.s32.totalorder %v1343_v44, 126  ;;  %s352_s18 = scalar_lea.vmem %s1407_s9, %s1271_s25 }
  0x24   : > { %477 = vperm.xlu1 %1144, %v462_v5   ;;  %1088 = vmatpush3.msra.mxu0 %v1280_v6  ;;  %v456_v17 = vstv %s356_s26  ;;  %v546_v27 = vld [vmem:[%s1405_s7] sm:$0xff]  ;;  %v1062_v35 = vld [vmem:[%s1402_s4 + $0x58] sm:$0xff] }
  0x25   : > { %1090 = vmatmul.mubr.msk.f32.vlgmr.msra.gmra.mrb[0].mxu0 %vm372_vm0, %v359_v7  ;;  %1096 = vmatprep.mubr.msk.f32.mxu1 %vm558_vm3, %v544_v26  ;;  %v1059_v30 = vld [vmem:[%s1402_s4 + $0x40] sm:$0xff]  ;;  %v1064_v36 = vld [vmem:[%s1403_s5 + $0x18] sm:$0xff] }
  0x26   : > { %v539_v1 = vstv %s1040_s14 }
  0x27   : > { %487 = vperm.xlu0 %1143, %v1043_v8  }
  0x28   : > { %492 = vperm.xlu1 %1144, %v1044_v9  }
  0x2b   : > { %511 = vperm.xlu0 %1143, %v1045_v10   ;;  %v545_v10 = vld [vmem:[%s1404_s6 + $0x8] sm:$0xff] }
  0x2c   : > { %516 = vperm.xlu1 %1144, %v1046_v11   ;;  %v1051_v11 = vld [vmem:[%s1400_s2 + $0x10] sm:$0xff] }
  0x2d   : > { %1101 = vmatprep.mubr.msk.f32.mxu0 %vm372_vm0, %v1051_v11 }
  0x2f   : > { %527 = vperm.xlu0 %1143, %v523_v12  }
  0x30   : > { %532 = vperm.xlu1 %1144, %v524_v13  }
  0x9e   : > { %v365_v14 = vpop.permute.xlu0 %364 }
  0x9f   : > { %v473_v37 = vpop.permute.xlu1 %472 }
  0xa2   : > { %v370_v15 = vpop.permute.xlu0 %369 }
  0xa3   : > { %v478_v38 = vpop.permute.xlu1 %477 }
  0xa6   : > { %v488_v39 = vpop.permute.xlu0 %487 }
  0xa7   : > { %v493_v40 = vpop.permute.xlu1 %492 }
  0xaa   : > { %v512_v43 = vpop.permute.xlu0 %511 }
  0xab   : > { %v517_v41 = vpop.permute.xlu1 %516 }
  0xae   : > { %v528_v46 = vpop.permute.xlu0 %527 }
  0xaf   : > { %v533_v45 = vpop.permute.xlu1 %532 }
  0xf8   : > { %v1091_v16 = vpop.f32.mrb[0].mxu0 }
  0xf9   : > { %v451_v18 = vadd.f32 %v1091_v16, %v370_v15  ;;  %v445_v19 = vpop.f32.mrb[1].mxu0 }
  0xfa   : > { %v446_v20 = vadd.f32 %v445_v19, %v365_v14 }
  0xfb   : > { %v458_v21 = vmul.f32 %v456_v17, %v451_v18  ;;  %vm455_vm1 = vcmp.ge.f32.partialorder %v451_v18, 0.0 }
  0xfc   : > { %v457_v22 = vmul.f32 %v456_v17, %v446_v20  ;;  %vm454_vm2 = vcmp.ge.f32.partialorder %v446_v20, 0.0  ;;  %v1052_v17 = vld [vmem:[%s1400_s2 + $0x18] sm:$0xff] }
  0xfd   : > { %v460_v23 = vsel %vm455_vm1, %v451_v18, %v458_v21 }
  0xfe   : > { %465 = vrot.lane.b32.xlu1 %v460_v23, %s1174_s27  ;;  %v459_v24 = vsel %vm454_vm2, %v446_v20, %v457_v22  ;;  %v496_v53 = vmul.f32 %v493_v40, %v460_v23  ;;  %v743_v20 = vstv %s1049_s21  ;;  %s348_s21 = scalar_lea.vmem %s1406_s8, %s1271_s25 }
  0xff   : > { %463 = vrot.lane.b32.xlu0 %v459_v24, %s1174_s27  ;;  %v495_v55 = vmul.f32 %v488_v39, %v459_v24 }
 0x102   : > { %504 = vrot.lane.b32.xlu1 %v460_v23, %s1175_s28 }
 0x103   : > { %502 = vrot.lane.b32.xlu0 %v459_v24, %s1175_s28 }
 0x106   : > { %652 = vperm.xlu1 %1144, %v1053_v25  }
 0x107   : > { %550 = vperm.xlu0 %1143, %v546_v27  }
 0x10a   : > { %760 = vperm.xlu1 %1144, %v1057_v28   ;;  %v1067_v28 = vld [vmem:[%s1405_s7 + $0x10] sm:$0xff] }
 0x10b   : > { %657 = vperm.xlu0 %1143, %v1054_v29   ;;  %v1065_v29 = vld [vmem:[%s1404_s6 + $0x10] sm:$0xff] }
 0x10e   : > { %775 = vperm.xlu1 %1144, %v1059_v30   ;;  %v547_v30 = vld [vmem:[%s1405_s7 + $0x8] sm:$0xff] }
 0x10f   : > { %765 = vperm.xlu0 %1143, %v1058_v31   ;;  %v1068_v31 = vld [vmem:[%s1405_s7 + $0x18] sm:$0xff] }
 0x112   : > { %799 = vperm.xlu1 %1144, %v1061_v32  }
 0x113   : > { %780 = vperm.xlu0 %1143, %v1060_v33  }
 0x116   : > { %816 = vperm.xlu1 %1144, %v1063_v34  }
 0x117   : > { %804 = vperm.xlu0 %1143, %v1062_v35  }
 0x11b   : > { %821 = vperm.xlu0 %1143, %v1064_v36  }
 0x170   : > { %v466_v47 = vpop.permute.xlu1 %465 }
 0x171   : > { %v469_v48 = vsel %vm467_vm4, %v466_v47, 0.0  ;;  %v464_v49 = vpop.permute.xlu0 %463 }
 0x172   : > { %v481_v50 = vmul.f32 %v478_v38, %v469_v48  ;;  %v468_v51 = vsel %vm467_vm4, %v464_v49, 0.0 }
 0x173   : > { %v480_v52 = vmul.f32 %v473_v37, %v468_v51 }
 0x174   : > { %v505_v54 = vpop.permute.xlu1 %504  ;;  %v498_v58 = vadd.f32 %v496_v53, %v481_v50 }
 0x175   : > { %v508_v56 = vsel %vm506_vm5, %v505_v54, 0.0  ;;  %v503_v57 = vpop.permute.xlu0 %502  ;;  %v497_v61 = vadd.f32 %v495_v55, %v480_v52 }
 0x176   : > { %v520_v59 = vmul.f32 %v517_v41, %v508_v56  ;;  %v507_v60 = vsel %vm506_vm5, %v503_v57, 0.0 }
 0x177   : > { %v519_v62 = vmul.f32 %v512_v43, %v507_v60 }
 0x178   : > { %v522_v63 = vadd.f32 %v520_v59, %v498_v58  ;;  %v828_v59 = vstv %s1050_s10 }
 0x179   : > { %v521_v0 = vadd.f32 %v519_v62, %v497_v61 }
 0x17a   : > { %v536_v2 = vadd.f32 %v533_v45, %v522_v63 }
 0x17b   : > { %v535_v3 = vadd.f32 %v528_v46, %v521_v0 }
 0x17c   : > { %vm538_vm6 = vcmp.ge.f32.partialorder %v536_v2, 0.0  ;;  %v541_v4 = vmul.f32 %v539_v1, %v536_v2 }
 0x17d   : > { %vm537_vm7 = vcmp.ge.f32.partialorder %v535_v3, 0.0  ;;  %v540_v5 = vmul.f32 %v539_v1, %v535_v3 }
 0x17e   : > { %v543_v7 = vsel %vm538_vm6, %v536_v2, %v541_v4  ;;  %v1066_v2 = vld [vmem:[%s1404_s6 + $0x18] sm:$0xff] }
 0x17f   : > { %v542_v8 = vsel %vm537_vm7, %v535_v3, %v540_v5 }
 0x180   : > { %v1111_v9 = vpack.c.bf16 %v543_v7, %v542_v8 }
 0x182   : > { %1112 = vmatprep.subr.bf16.mxu1 %v1111_v9 }
 0x183   : > { %1114 = vmatpush3.bf16.msra.mxu1 %v1111_v9 }
 0x185   : > { %v653_v21 = vpop.permute.xlu1 %652 }
 0x186   : > { %1097 = vmatmul.mubr.msk.f32.vlgmr.msra.gmra.mrb[0].mxu1 %vm558_vm3, %v545_v10  ;;  %v551_v13 = vpop.permute.xlu0 %550 }
 0x187   : > { %1108 = vmatprep.mubr.msk.f32.mxu1 %vm558_vm3, %v1065_v29 }
 0x189   : > { %v761_v33 = vpop.permute.xlu1 %760 }
 0x18a   : > { %v658_v18 = vpop.permute.xlu0 %657 }
 0x18d   : > { %v776_v35 = vpop.permute.xlu1 %775 }
 0x18e   : > { %v766_v32 = vpop.permute.xlu0 %765 }
 0x191   : > { %v800_v37 = vpop.permute.xlu1 %799 }
 0x192   : > { %v781_v34 = vpop.permute.xlu0 %780 }
 0x195   : > { %v817_v39 = vpop.permute.xlu1 %816 }
 0x196   : > { %v805_v36 = vpop.permute.xlu0 %804 }
 0x19a   : > { %v822_v38 = vpop.permute.xlu0 %821 }
 0x259   : > { %v1355_v12 = vpop.f32.mrb[0].mxu1 }
 0x25a   : > { %v631_v14 = vpop.f32.mrb[1].mxu1 }
 0x25b   : > { %v632_v15 = vadd.f32 %v631_v14, %v551_v13 }
 0x25d   : > { %v1358_v16 = vadd.f32 %v632_v15, %v1280_v6 }
 0x25f   : > { %1099 = vmatprep.subr.mxu0 %v1358_v16 }
 0x260   : > { %1100 = vmatpush3.msra.mxu0 %v1358_v16 }
 0x261   : > { %1102 = vmatmul.mubr.msk.f32.vlgmr.msra.gmra.mrb[2].mxu0 %vm372_vm0, %v1052_v17 }
 0x334   : > { %v1103_v19 = vpop.f32.mrb[2].mxu0 }
 0x335   : > { %v738_v22 = vadd.f32 %v1103_v19, %v658_v18  ;;  %v732_v23 = vpop.f32.mrb[3].mxu0 }
 0x336   : > { %v733_v24 = vadd.f32 %v732_v23, %v653_v21 }
 0x337   : > { %v745_v6 = vmul.f32 %v743_v20, %v738_v22  ;;  %vm742_vm8 = vcmp.ge.f32.partialorder %v738_v22, 0.0 }
 0x338   : > { %v744_v25 = vmul.f32 %v743_v20, %v733_v24  ;;  %vm741_vm9 = vcmp.ge.f32.partialorder %v733_v24, 0.0 }
 0x339   : > { %v747_v26 = vsel %vm742_vm8, %v738_v22, %v745_v6 }
 0x33a   : > { %753 = vrot.lane.b32.xlu0 %v747_v26, %s1176_s22  ;;  %v746_v27 = vsel %vm741_vm9, %v733_v24, %v744_v25  ;;  %v784_v47 = vmul.f32 %v781_v34, %v747_v26 }
 0x33b   : > { %751 = vrot.lane.b32.xlu1 %v746_v27, %s1176_s22  ;;  %v783_v49 = vmul.f32 %v776_v35, %v746_v27 }
 0x33e   : > { %792 = vrot.lane.b32.xlu0 %v747_v26, %s1177_s23 }
 0x33f   : > { %790 = vrot.lane.b32.xlu1 %v746_v27, %s1177_s23 }
 0x342   : > { %841 = vperm.xlu0 %1143, %v1067_v28  }
 0x343   : > { %555 = vperm.xlu1 %1144, %v547_v30  }
 0x347   : > { %846 = vperm.xlu1 %1144, %v1068_v31  }
 0x3ac   : > { %v754_v40 = vpop.permute.xlu0 %753 }
 0x3ad   : > { %v757_v41 = vsel %vm755_vm10, %v754_v40, 0.0  ;;  %v752_v42 = vpop.permute.xlu1 %751 }
 0x3ae   : > { %v769_v43 = vmul.f32 %v766_v32, %v757_v41  ;;  %v756_v45 = vsel %vm755_vm10, %v752_v42, 0.0 }
 0x3af   : > { %v768_v46 = vmul.f32 %v761_v33, %v756_v45 }
 0x3b0   : > { %v793_v48 = vpop.permute.xlu0 %792  ;;  %v786_v52 = vadd.f32 %v784_v47, %v769_v43 }
 0x3b1   : > { %v796_v50 = vsel %vm794_vm11, %v793_v48, 0.0  ;;  %v791_v51 = vpop.permute.xlu1 %790  ;;  %v785_v55 = vadd.f32 %v783_v49, %v768_v46 }
 0x3b2   : > { %v808_v53 = vmul.f32 %v805_v36, %v796_v50  ;;  %v795_v54 = vsel %vm794_vm11, %v791_v51, 0.0 }
 0x3b3   : > { %v807_v56 = vmul.f32 %v800_v37, %v795_v54 }
 0x3b4   : > { %v810_v57 = vadd.f32 %v808_v53, %v786_v52 }
 0x3b5   : > { %v809_v58 = vadd.f32 %v807_v56, %v785_v55 }
 0x3b6   : > { %v825_v60 = vadd.f32 %v822_v38, %v810_v57 }
 0x3b7   : > { %v824_v61 = vadd.f32 %v817_v39, %v809_v58 }
 0x3b8   : > { %vm827_vm12 = vcmp.ge.f32.partialorder %v825_v60, 0.0  ;;  %v830_v62 = vmul.f32 %v828_v59, %v825_v60 }
 0x3b9   : > { %vm826_vm13 = vcmp.ge.f32.partialorder %v824_v61, 0.0  ;;  %v829_v44 = vmul.f32 %v828_v59, %v824_v61 }
 0x3ba   : > { %v832_v63 = vsel %vm827_vm12, %v825_v60, %v830_v62 }
 0x3bb   : > { %v831_v0 = vsel %vm826_vm13, %v824_v61, %v829_v44 }
 0x3bc   : > { %v1115_v1 = vpack.c.bf16 %v832_v63, %v831_v0 }
 0x3be   : > { %1116 = vmatprep.subr.bf16.mxu1 %v1115_v1 }
 0x3bf   : > { %1118 = vmatpush3.bf16.msra.mxu1 %v1115_v1 }
 0x3c1   : > { %v842_v7 = vpop.permute.xlu0 %841 }
 0x3c2   : > { %1109 = vmatmul.mubr.msk.f32.vlgmr.msra.gmra.mrb[2].mxu1 %vm558_vm3, %v1066_v2  ;;  %v556_v3 = vpop.permute.xlu1 %555 }
 0x3c3   : > { %v637_v8 = vadd.f32 %v1355_v12, %v556_v3 }
 0x3c6   : > { %v847_v4 = vpop.permute.xlu1 %846 }
 0x495   : > { %v1110_v5 = vpop.f32.mrb[2].mxu1 }
 0x496   : > { %v927_v9 = vadd.f32 %v1110_v5, %v847_v4  ;;  %v921_v10 = vpop.f32.mrb[3].mxu1 }
 0x497   : > { %v922_v11 = vadd.f32 %v921_v10, %v842_v7 }
 0x498   : > { %v931_v13 = vadd.f32 %v927_v9, %v637_v8 }
 0x499   : > { %v930_v14 = vadd.f32 %v922_v11, %v1358_v16 }
 0x49a   : > { %933 = vst [vmem:[%s352_s18] sm:$0xff] %v931_v13 }
 0x49b   : > { %932 = vst [vmem:[%s348_s21] sm:$0xff] %v930_v14 }
 0x49c PF: > { %s21_s30 = sadd.s32 1, %s1170_s30  }
 0x49d   : > { %p18_p1 = scmp.ge.s32.totalorder %s21_s30, 4  }
 0x49f   :  { %20 = sbr.rel (!%p18_p1) target bundleno = 1 (0x1), region = 109 }
 0x4a6   :  { %967 = vsyncpa [#allocation3], 1 }
 0x4a7   :  { %969 = vsyncpa [#allocation3 + $0x1], 1 }

// kernel: tcn_separation_part.6
= control target key start
LH: loop header
LB: loop body
LE: loop exit
PB: predicated region body
PF: predicated region fallthrough
CT: control target
= control target key end

     0   :  { %15 = vsyncpa [#allocation3], 0  ;;  %s1351_s30 = smov 0   ;;  %s1552_s0 = inlined_call_operand.vmem [shape: f32[4], index: 0, kind: input, shape index: {}]   ;;  %s1553_s1 = inlined_call_operand.vmem [shape: f32[2,16,128], index: 1, kind: input, shape index: {}]   ;;  %s1554_s2 = inlined_call_operand.vmem [shape: f32[2,16,16], index: 2, kind: input, shape index: {}]   ;;  %s1555_s3 = inlined_call_operand.vmem [shape: f32[2,16,1], index: 3, kind: input, shape index: {}]   ;;  %s1556_s4 = inlined_call_operand.vmem [shape: f32[2,3,16,1], index: 4, kind: input, shape index: {}]   ;;  %s1557_s5 = inlined_call_operand.vmem [shape: f32[2,16,1], index: 5, kind: input, shape index: {}]   ;;  %s1558_s6 = inlined_call_operand.vmem [shape: f32[2,32,16], index: 6, kind: input, shape index: {}]   ;;  %s1559_s7 = inlined_call_operand.vmem [shape: f32[2,32,1], index: 7, kind: input, shape index: {}]   ;;  %s1560_s8 = inlined_call_operand.vmem [shape: f32[2,16,128], index: 8, kind: output, shape index: {0}]   ;;  %s1561_s9 = inlined_call_operand.vmem [shape: f32[2,16,128], index: 9, kind: output, shape index: {1}]  }
   0x1 LB: > { %s1357_s10 = sadd.s32 4294967295, %s1293_s30   ;;  %p1109_p0 = scmp.ge.s32.totalorder %s1293_s30, 1  ;;  %s1293_s30 = sphi %s1351_s30, %s21_s30  }
   0x2   : > { %p251_p1 = scmp.lt.s32.totalorder %s1293_s30, 3  ;;  %s264_s13 = sshll.u32 %s1552_s0, 4  ;;  %s265_s13 = int_to_ptr.vmem [resolvable:$true] %s264_s13 }
   0x3   : > { %p1250_p3 = scmp.eq.s32.totalorder %s1357_s10, 0  ;;  %s1268_s15 = scalar_lea.vmem %s265_s13, 16 }
   0x4   : > { %p1364_p2 = pnand %p1109_p0, %p251_p1  ;;  %p1269_p6 = scmp.ne.s32.totalorder %s265_s13, %s1268_s15 }
   0x5   : > { %p1276_p10 = scmp.lt.s32.totalorder %s265_s13, %s265_s13  ;;  %p1277_p11 = scmp.lt.s32.totalorder %s1268_s15, %s1268_s15 }
   0x6   : > { %p1246_p4 = pneg %p1364_p2 }
   0x7   : > { %p1278_p12 = por %p1277_p11, %p1276_p10 }
   0x8   : > { %p1247_p5 = pnand %p1250_p3, %p1246_p4 }
   0xa   : > { %p1270_p7 = pneg %p1247_p5 }
   0xc   : > { %p1271_p8 = pnand %p1270_p7, %p1269_p6 }
   0xe   : > { %p1272_p9 = pneg %p1271_p8 }
  0x10   : > { %p1279_p13 = pnand %p1278_p12, %p1272_p9 }
  0x12   : > { %1282 = shalt.err (!%p1279_p13)
}
  0x13   : > { %s1295_s16 = smov [#allocation2]   ;;  %303 = sbr.rel (%p1364_p2) target bundleno = 1190 (0x4a6), region = 52 }
  0x14   : > { %1249 = dma.vmem_to_smem (!%p1247_p5), %s265_s13, 16, %s1295_s16, [#allocation3]  }
  0x1a   : > { %1288 = dma.done.wait (%p1250_p3), [#allocation3], 16  }
  0x1b   : > { %1290 = vsyncadd (%p1250_p3), [#allocation3], 4294967280 }
  0x1c   : > { %309 = sfence }
  0x1d   : > { %p345_p0 = scmp.lt.s32.totalorder %s1357_s10, 1  ;;  %v366_v0 = vld [vmem:[%s1554_s2] sm:$0xff]  ;;  %vm380_vm0 = vcmask 130048   ;;  %v1296_v2 = vmov 0   ;;  %v369_v4 = vld [vmem:[%s1555_s3 + $0x8] sm:$0xff]  ;;  %v1123_v9 = vld [vmem:[%s1556_s4 + $0x10] sm:$0xff]  ;;  %v362_v45 = vlaneseq }
  0x1e   : > { %v368_v1 = vld [vmem:[%s1555_s3] sm:$0xff]  ;;  %1188 = vmatprep.mubr.msk.f32.mxu0 %vm380_vm0, %v366_v0  ;;  %1266 = vset.pattern.permute.xlu0 %v1296_v2  ;;  %v470_v5 = vld [vmem:[%s1556_s4 + $0x8] sm:$0xff]  ;;  %v1124_v10 = vld [vmem:[%s1556_s4 + $0x18] sm:$0xff]  ;;  %s364_s26 = sld [smem:[#allocation2]]  ;;  %s1297_s27 = smov 1  }
  0x1f   : > { %s1564_s10 = smov (!%p345_p0, %s1357_s10), 1  ;;  %372 = vperm.xlu0 %1266, %v368_v1   ;;  %1267 = vset.pattern.permute.xlu1 %v1296_v2  ;;  %v469_v3 = vld [vmem:[%s1556_s4] sm:$0xff]  ;;  %v367_v11 = vld [vmem:[%s1554_s2 + $0x8] sm:$0xff]  ;;  %s1298_s28 = smov 127   ;;  %v1136_v30 = vld [vmem:[%s1555_s3 + $0x18] sm:$0xff]  ;;  %v1471_v47 = vand.u32 127, %v362_v45 }
  0x20   : > { %480 = vperm.xlu1 %1267, %v469_v3   ;;  %s1394_s25 = sshll.u32 %s1564_s10, 4  ;;  %v1125_v12 = vld [vmem:[%s1556_s4 + $0x20] sm:$0xff]  ;;  %v1126_v13 = vld [vmem:[%s1556_s4 + $0x28] sm:$0xff]  ;;  %v1135_v31 = vld [vmem:[%s1555_s3 + $0x10] sm:$0xff]  ;;  %s1120_s16 = sld [smem:[#allocation2 + $0x1]] }
  0x21   : > { %s349_s11 = scalar_lea.vmem %s1553_s1, %s1394_s25  ;;  %v531_v14 = vld [vmem:[%s1557_s5] sm:$0xff]  ;;  %v532_v15 = vld [vmem:[%s1557_s5 + $0x8] sm:$0xff]  ;;  %v1140_v32 = vld [vmem:[%s1556_s4 + $0x38] sm:$0xff]  ;;  %vm475_vm3 = vcmp.ge.s32.totalorder %v1471_v47, 1  ;;  %vm514_vm4 = vcmp.lt.s32.totalorder %v1471_v47, 127  ;;  %s1131_s23 = sld [smem:[#allocation2 + $0x2]] }
  0x22   : > { %v1403_v6 = vld [vmem:[%s349_s11] sm:$0xff]  ;;  %v1405_v7 = vld [vmem:[%s349_s11 + $0x8] sm:$0xff]  ;;  %v1139_v33 = vld [vmem:[%s1556_s4 + $0x30] sm:$0xff]  ;;  %s1299_s29 = smov 2   ;;  %s1300_s11 = smov 126   ;;  %vm794_vm9 = vcmp.ge.s32.totalorder %v1471_v47, 2 }
  0x23   : > { %377 = vperm.xlu0 %1266, %v369_v4   ;;  %v1218_v8 = vpack.c.bf16 %v1405_v7, %v1403_v6  ;;  %v557_v27 = vld [vmem:[%s1559_s7 + $0x8] sm:$0xff]  ;;  %v552_v28 = vld [vmem:[%s1558_s6] sm:$0xff]  ;;  %v1144_v36 = vld [vmem:[%s1556_s4 + $0x58] sm:$0xff]  ;;  %vm833_vm10 = vcmp.lt.s32.totalorder %v1471_v47, 126  ;;  %s354_s15 = scalar_lea.vmem %s1560_s8, %s1394_s25  ;;  %s359_s18 = scalar_lea.vmem %s1561_s9, %s1394_s25 }
  0x24   : > { %485 = vperm.xlu1 %1267, %v470_v5   ;;  %v464_v19 = vstv %s364_s26  ;;  %v556_v29 = vld [vmem:[%s1559_s7] sm:$0xff]  ;;  %v1142_v34 = vld [vmem:[%s1556_s4 + $0x48] sm:$0xff]  ;;  %v1143_v37 = vld [vmem:[%s1556_s4 + $0x50] sm:$0xff]  ;;  %s1132_s26 = sld [smem:[#allocation2 + $0x3]] }
  0x25   : > { %1219 = vmatprep.subr.bf16.mxu0 %v1218_v8  ;;  %v1141_v35 = vld [vmem:[%s1556_s4 + $0x40] sm:$0xff]  ;;  %v1146_v38 = vld [vmem:[%s1557_s5 + $0x18] sm:$0xff]  ;;  %v1145_v39 = vld [vmem:[%s1557_s5 + $0x10] sm:$0xff] }
  0x26   : > { %1221 = vmatpush3.bf16.msra.mxu0 %v1218_v8  ;;  %v547_v3 = vstv %s1120_s16 }
  0x27   : > { %495 = vperm.xlu0 %1266, %v1123_v9  }
  0x28   : > { %500 = vperm.xlu1 %1267, %v1124_v10  }
  0x29   : > { %1189 = vmatmul.mubr.msk.f32.vlgmr.msra.gmra.mrb[0].mxu0 %vm380_vm0, %v367_v11 }
  0x2a   : > { %1195 = vmatprep.mubr.msk.f32.mxu0 %vm380_vm0, %v552_v28  ;;  %v782_v28 = vstv %s1131_s23 }
  0x2b   : > { %519 = vperm.xlu0 %1266, %v1125_v12  }
  0x2c   : > { %524 = vperm.xlu1 %1267, %v1126_v13  }
  0x2f   : > { %535 = vperm.xlu0 %1266, %v531_v14   ;;  %v553_v14 = vld [vmem:[%s1558_s6 + $0x8] sm:$0xff] }
  0x30   : > { %540 = vperm.xlu1 %1267, %v532_v15   ;;  %v1133_v15 = vld [vmem:[%s1554_s2 + $0x10] sm:$0xff] }
  0x9e   : > { %v373_v16 = vpop.permute.xlu0 %372 }
  0x9f   : > { %v481_v40 = vpop.permute.xlu1 %480 }
  0xa2   : > { %v378_v17 = vpop.permute.xlu0 %377 }
  0xa3   : > { %v486_v41 = vpop.permute.xlu1 %485 }
  0xa6   : > { %v496_v42 = vpop.permute.xlu0 %495 }
  0xa7   : > { %v501_v43 = vpop.permute.xlu1 %500 }
  0xaa   : > { %v520_v46 = vpop.permute.xlu0 %519 }
  0xab   : > { %v525_v44 = vpop.permute.xlu1 %524 }
  0xae   : > { %v536_v49 = vpop.permute.xlu0 %535 }
  0xaf   : > { %v541_v48 = vpop.permute.xlu1 %540 }
  0xfc   : > { %v1190_v18 = vpop.f32.mrb[0].mxu0 }
  0xfd   : > { %v459_v20 = vadd.f32 %v1190_v18, %v378_v17  ;;  %v453_v21 = vpop.f32.mrb[1].mxu0 }
  0xfe   : > { %v454_v22 = vadd.f32 %v453_v21, %v373_v16 }
  0xff   : > { %v466_v23 = vmul.f32 %v464_v19, %v459_v20  ;;  %vm463_vm1 = vcmp.ge.f32.partialorder %v459_v20, 0.0 }
 0x100   : > { %v465_v24 = vmul.f32 %v464_v19, %v454_v22  ;;  %vm462_vm2 = vcmp.ge.f32.partialorder %v454_v22, 0.0 }
 0x101   : > { %v468_v25 = vsel %vm463_vm1, %v459_v20, %v466_v23 }
 0x102   : > { %473 = vrot.lane.b32.xlu1 %v468_v25, %s1297_s27  ;;  %v467_v26 = vsel %vm462_vm2, %v454_v22, %v465_v24  ;;  %v504_v56 = vmul.f32 %v501_v43, %v468_v25  ;;  %v1153_v43 = vld [vmem:[%s1559_s7 + $0x30] sm:$0xff] }
 0x103   : > { %471 = vrot.lane.b32.xlu0 %v467_v26, %s1297_s27  ;;  %v503_v58 = vmul.f32 %v496_v42, %v467_v26  ;;  %v1154_v42 = vld [vmem:[%s1559_s7 + $0x38] sm:$0xff] }
 0x106   : > { %512 = vrot.lane.b32.xlu1 %v468_v25, %s1298_s28  ;;  %v1134_v25 = vld [vmem:[%s1554_s2 + $0x18] sm:$0xff] }
 0x107   : > { %510 = vrot.lane.b32.xlu0 %v467_v26, %s1298_s28 }
 0x10a   : > { %567 = vperm.xlu1 %1267, %v557_v27  }
 0x10b   : > { %562 = vperm.xlu0 %1266, %v556_v29  }
 0x10e   : > { %696 = vperm.xlu1 %1267, %v1136_v30  }
 0x10f   : > { %691 = vperm.xlu0 %1266, %v1135_v31  }
 0x112   : > { %804 = vperm.xlu1 %1267, %v1140_v32   ;;  %v554_v32 = vld [vmem:[%s1558_s6 + $0x10] sm:$0xff] }
 0x113   : > { %799 = vperm.xlu0 %1266, %v1139_v33   ;;  %v555_v33 = vld [vmem:[%s1558_s6 + $0x18] sm:$0xff]  ;;  %1198 = vmatprep.mubr.msk.f32.mxu1 %vm380_vm0, %v554_v32 }
 0x116   : > { %819 = vperm.xlu1 %1267, %v1142_v34  }
 0x117   : > { %814 = vperm.xlu0 %1266, %v1141_v35  }
 0x11a   : > { %843 = vperm.xlu1 %1267, %v1144_v36  }
 0x11b   : > { %838 = vperm.xlu0 %1266, %v1143_v37   ;;  %v559_v37 = vld [vmem:[%s1559_s7 + $0x18] sm:$0xff] }
 0x11e   : > { %860 = vperm.xlu1 %1267, %v1146_v38   ;;  %v1147_v38 = vld [vmem:[%s1558_s6 + $0x20] sm:$0xff] }
 0x11f   : > { %855 = vperm.xlu0 %1266, %v1145_v39   ;;  %v558_v39 = vld [vmem:[%s1559_s7 + $0x10] sm:$0xff] }
 0x174   : > { %v474_v50 = vpop.permute.xlu1 %473 }
 0x175   : > { %v477_v51 = vsel %vm475_vm3, %v474_v50, 0.0  ;;  %v472_v52 = vpop.permute.xlu0 %471 }
 0x176   : > { %v489_v53 = vmul.f32 %v486_v41, %v477_v51  ;;  %v476_v54 = vsel %vm475_vm3, %v472_v52, 0.0  ;;  %v1151_v41 = vld [vmem:[%s1559_s7 + $0x20] sm:$0xff] }
 0x177   : > { %v488_v55 = vmul.f32 %v481_v40, %v476_v54  ;;  %v1152_v40 = vld [vmem:[%s1559_s7 + $0x28] sm:$0xff] }
 0x178   : > { %v513_v57 = vpop.permute.xlu1 %512  ;;  %v506_v61 = vadd.f32 %v504_v56, %v489_v53 }
 0x179   : > { %v516_v59 = vsel %vm514_vm4, %v513_v57, 0.0  ;;  %v511_v60 = vpop.permute.xlu0 %510  ;;  %v505_v0 = vadd.f32 %v503_v58, %v488_v55 }
 0x17a   : > { %v528_v62 = vmul.f32 %v525_v44, %v516_v59  ;;  %v515_v63 = vsel %vm514_vm4, %v511_v60, 0.0 }
 0x17b   : > { %v527_v1 = vmul.f32 %v520_v46, %v515_v63 }
 0x17c   : > { %v530_v2 = vadd.f32 %v528_v62, %v506_v61 }
 0x17d   : > { %v529_v4 = vadd.f32 %v527_v1, %v505_v0 }
 0x17e   : > { %v544_v5 = vadd.f32 %v541_v48, %v530_v2 }
 0x17f   : > { %v543_v8 = vadd.f32 %v536_v49, %v529_v4 }
 0x180   : > { %vm546_vm5 = vcmp.ge.f32.partialorder %v544_v5, 0.0  ;;  %v549_v9 = vmul.f32 %v547_v3, %v544_v5 }
 0x181   : > { %vm545_vm6 = vcmp.ge.f32.partialorder %v543_v8, 0.0  ;;  %v548_v10 = vmul.f32 %v547_v3, %v543_v8 }
 0x182   : > { %v551_v11 = vsel %vm546_vm5, %v544_v5, %v549_v9  ;;  %v867_v9 = vstv %s1132_s26 }
 0x183   : > { %v550_v12 = vsel %vm545_vm6, %v543_v8, %v548_v10 }
 0x184   : > { %v1222_v13 = vpack.c.bf16 %v551_v11, %v550_v12 }
 0x186   : > { %1223 = vmatprep.subr.bf16.mxu0 %v1222_v13  ;;  %1234 = vmatprep.subr.bf16.mxu1 %v1222_v13 }
 0x187   : > { %1225 = vmatpush3.bf16.msra.mxu0 %v1222_v13  ;;  %1235 = vmatpush3.bf16.msra.mxu1 %v1222_v13 }
 0x189   : > { %v568_v16 = vpop.permute.xlu1 %567 }
 0x18a   : > { %1196 = vmatmul.mubr.msk.f32.vlgmr.msra.gmra.mrb[2].mxu0 %vm380_vm0, %v553_v14  ;;  %v563_v18 = vpop.permute.xlu0 %562  ;;  %1199 = vmatmul.mubr.msk.f32.vlgmr.msra.gmra.mrb[0].mxu1 %vm380_vm0, %v555_v33 }
 0x18b   : > { %1205 = vmatprep.mubr.msk.f32.mxu0 %vm380_vm0, %v1133_v15  ;;  %1212 = vmatprep.mubr.msk.f32.mxu1 %vm380_vm0, %v1147_v38 }
 0x18d   : > { %v697_v26 = vpop.permute.xlu1 %696 }
 0x191   : > { %v805_v44 = vpop.permute.xlu1 %804 }
 0x195   : > { %v820_v46 = vpop.permute.xlu1 %819 }
 0x199   : > { %v844_v49 = vpop.permute.xlu1 %843 }
 0x19d   : > { %v861_v51 = vpop.permute.xlu1 %860 }
 0x25d   : > { %v1197_v17 = vpop.f32.mrb[2].mxu0 }
 0x25e   : > { %v664_v19 = vadd.f32 %v1197_v17, %v568_v16  ;;  %v658_v20 = vpop.f32.mrb[3].mxu0  ;;  %v1148_v16 = vld [vmem:[%s1558_s6 + $0x28] sm:$0xff]  ;;  %v1149_v17 = vld [vmem:[%s1558_s6 + $0x30] sm:$0xff] }
 0x25f   : > { %v659_v21 = vadd.f32 %v658_v20, %v563_v18  ;;  %v1150_v18 = vld [vmem:[%s1558_s6 + $0x38] sm:$0xff] }
 0x260   : > { %v1484_v22 = vadd.f32 %v664_v19, %v1405_v7  ;;  %v692_v7 = vpop.permute.xlu0 %691 }
 0x261   : > { %v1487_v23 = vadd.f32 %v659_v21, %v1403_v6 }
 0x263   : > { %v1226_v24 = vpack.c.bf16 %v1484_v22, %v1487_v23 }
 0x264   : > { %v800_v45 = vpop.permute.xlu0 %799 }
 0x265   : > { %1227 = vmatprep.subr.bf16.mxu0 %v1226_v24 }
 0x266   : > { %1229 = vmatpush3.bf16.msra.mxu0 %v1226_v24 }
 0x268   : > { %v815_v48 = vpop.permute.xlu0 %814 }
 0x269   : > { %1206 = vmatmul.mubr.msk.f32.vlgmr.msra.gmra.mrb[4].mxu0 %vm380_vm0, %v1134_v25 }
 0x26c   : > { %v839_v50 = vpop.permute.xlu0 %838 }
 0x270   : > { %v856_v52 = vpop.permute.xlu0 %855 }
 0x33c   : > { %v1207_v27 = vpop.f32.mrb[4].mxu0 }
 0x33d   : > { %v777_v29 = vadd.f32 %v1207_v27, %v697_v26  ;;  %v771_v30 = vpop.f32.mrb[5].mxu0 }
 0x33e   : > { %v772_v6 = vadd.f32 %v771_v30, %v692_v7 }
 0x33f   : > { %v784_v31 = vmul.f32 %v782_v28, %v777_v29  ;;  %vm781_vm7 = vcmp.ge.f32.partialorder %v777_v29, 0.0 }
 0x340   : > { %v783_v34 = vmul.f32 %v782_v28, %v772_v6  ;;  %vm780_vm8 = vcmp.ge.f32.partialorder %v772_v6, 0.0 }
 0x341   : > { %v786_v35 = vsel %vm781_vm7, %v777_v29, %v784_v31 }
 0x342   : > { %792 = vrot.lane.b32.xlu1 %v786_v35, %s1299_s29  ;;  %v785_v36 = vsel %vm780_vm8, %v772_v6, %v783_v34  ;;  %v823_v59 = vmul.f32 %v820_v46, %v786_v35 }
 0x343   : > { %790 = vrot.lane.b32.xlu0 %v785_v36, %s1299_s29  ;;  %v822_v61 = vmul.f32 %v815_v48, %v785_v36 }
 0x346   : > { %831 = vrot.lane.b32.xlu1 %v786_v35, %s1300_s11 }
 0x347   : > { %829 = vrot.lane.b32.xlu0 %v785_v36, %s1300_s11 }
 0x34a   : > { %577 = vperm.xlu1 %1267, %v559_v37  }
 0x34b   : > { %572 = vperm.xlu0 %1266, %v558_v39  }
 0x34e   : > { %889 = vperm.xlu1 %1267, %v1152_v40  }
 0x34f   : > { %884 = vperm.xlu0 %1266, %v1151_v41  }
 0x352   : > { %899 = vperm.xlu1 %1267, %v1154_v42  }
 0x353   : > { %894 = vperm.xlu0 %1266, %v1153_v43  }
 0x3b4   : > { %v793_v53 = vpop.permute.xlu1 %792 }
 0x3b5   : > { %v796_v54 = vsel %vm794_vm9, %v793_v53, 0.0  ;;  %v791_v55 = vpop.permute.xlu0 %790 }
 0x3b6   : > { %v808_v56 = vmul.f32 %v805_v44, %v796_v54  ;;  %v795_v57 = vsel %vm794_vm9, %v791_v55, 0.0 }
 0x3b7   : > { %v807_v58 = vmul.f32 %v800_v45, %v795_v57 }
 0x3b8   : > { %v832_v60 = vpop.permute.xlu1 %831  ;;  %v825_v0 = vadd.f32 %v823_v59, %v808_v56 }
 0x3b9   : > { %v835_v62 = vsel %vm833_vm10, %v832_v60, 0.0  ;;  %v830_v63 = vpop.permute.xlu0 %829  ;;  %v824_v3 = vadd.f32 %v822_v61, %v807_v58 }
 0x3ba   : > { %v847_v1 = vmul.f32 %v844_v49, %v835_v62  ;;  %v834_v2 = vsel %vm833_vm10, %v830_v63, 0.0 }
 0x3bb   : > { %v846_v4 = vmul.f32 %v839_v50, %v834_v2 }
 0x3bc   : > { %v849_v5 = vadd.f32 %v847_v1, %v825_v0 }
 0x3bd   : > { %v848_v8 = vadd.f32 %v846_v4, %v824_v3 }
 0x3be   : > { %v864_v10 = vadd.f32 %v861_v51, %v849_v5 }
 0x3bf   : > { %v863_v11 = vadd.f32 %v856_v52, %v848_v8 }
 0x3c0   : > { %vm866_vm11 = vcmp.ge.f32.partialorder %v864_v10, 0.0  ;;  %v869_v12 = vmul.f32 %v867_v9, %v864_v10 }
 0x3c1   : > { %vm865_vm12 = vcmp.ge.f32.partialorder %v863_v11, 0.0  ;;  %v868_v47 = vmul.f32 %v867_v9, %v863_v11 }
 0x3c2   : > { %v871_v13 = vsel %vm866_vm11, %v864_v10, %v869_v12 }
 0x3c3   : > { %v870_v14 = vsel %vm865_vm12, %v863_v11, %v868_v47 }
 0x3c4   : > { %v1230_v15 = vpack.c.bf16 %v871_v13, %v870_v14 }
 0x3c6   : > { %1231 = vmatprep.subr.bf16.mxu1 %v1230_v15 }
 0x3c7   : > { %1233 = vmatpush3.bf16.msra.mxu1 %v1230_v15 }
 0x3c9   : > { %v578_v19 = vpop.permute.xlu1 %577 }
 0x3ca   : > { %1213 = vmatmul.mubr.msk.f32.vlgmr.msra.gmra.mrb[2].mxu1 %vm380_vm0, %v1148_v16  ;;  %v573_v20 = vpop.permute.xlu0 %572 }
 0x3cb   : > { %1215 = vmatprep.mubr.msk.f32.mxu1 %vm380_vm0, %v1149_v17 }
 0x3cd   : > { %v890_v21 = vpop.permute.xlu1 %889 }
 0x3ce   : > { %1216 = vmatmul.mubr.msk.f32.gmra.mrb[0].mxu1 %vm380_vm0, %v1150_v18  ;;  %v885_v24 = vpop.permute.xlu0 %884 }
 0x3d1   : > { %v900_v25 = vpop.permute.xlu1 %899 }
 0x3d2   : > { %v895_v27 = vpop.permute.xlu0 %894  ;;  %v1236_v30 = vadd.f32 %v900_v25, %v578_v19 }
 0x3d3   : > { %v1238_v31 = vadd.f32 %v895_v27, %v573_v20 }
 0x49d   : > { %v1214_v26 = vpop.f32.mrb[2].mxu1 }
 0x49e   : > { %v986_v28 = vadd.f32 %v1214_v26, %v890_v21  ;;  %v980_v7 = vpop.f32.mrb[3].mxu1 }
 0x49f   : > { %v981_v29 = vadd.f32 %v980_v7, %v885_v24 }
 0x4a0   : > { %v1000_v6 = vadd.f32 %v986_v28, %v1484_v22 }
 0x4a1   : > { %v999_v32 = vadd.f32 %v981_v29, %v1487_v23  ;;  %v1217_v33 = vpop.f32.mrb[0].mxu1 }
 0x4a2   : > { %1004 = vst [vmem:[%s354_s15 + $0x8] sm:$0xff] %v1000_v6  ;;  %v1237_v34 = vadd.f32 %v1236_v30, %v1217_v33  ;;  %v990_v35 = vpop.f32.mrb[1].mxu1 }
 0x4a3   : > { %1003 = vst [vmem:[%s354_s15] sm:$0xff] %v999_v32  ;;  %v1239_v36 = vadd.f32 %v1238_v31, %v990_v35 }
 0x4a4   : > { %1006 = vst [vmem:[%s359_s18 + $0x8] sm:$0xff] %v1237_v34 }
 0x4a5   : > { %1005 = vst [vmem:[%s359_s18] sm:$0xff] %v1239_v36 }
 0x4a6 PF: > { %s21_s30 = sadd.s32 1, %s1293_s30  }
 0x4a7   : > { %p18_p1 = scmp.ge.s32.totalorder %s21_s30, 4  }
 0x4a9   :  { %20 = sbr.rel (!%p18_p1) target bundleno = 1 (0x1), region = 109 }
 0x4b0   :  { %1044 = vsyncpa [#allocation3], 1 }
 0x4b1   :  { %1046 = vsyncpa [#allocation3 + $0x1], 1 }

// kernel: tcn_separation_part.8
= control target key start
LH: loop header
LB: loop body
LE: loop exit
PB: predicated region body
PF: predicated region fallthrough
CT: control target
= control target key end

     0   :  { %s1588_s0 = inlined_call_operand.vmem [shape: f32[4], index: 0, kind: input, shape index: {}]   ;;  %s1589_s1 = inlined_call_operand.vmem [shape: f32[2,8,128], index: 1, kind: input, shape index: {}]   ;;  %s1590_s2 = inlined_call_operand.vmem [shape: f32[2,16,8], index: 2, kind: input, shape index: {}]   ;;  %s1591_s3 = inlined_call_operand.vmem [shape: f32[2,16,1], index: 3, kind: input, shape index: {}]   ;;  %s1592_s4 = inlined_call_operand.vmem [shape: f32[2,3,16,1], index: 4, kind: input, shape index: {}]   ;;  %s1593_s5 = inlined_call_operand.vmem [shape: f32[2,16,1], index: 5, kind: input, shape index: {}]   ;;  %s1594_s6 = inlined_call_operand.vmem [shape: f32[2,16,16], index: 6, kind: input, shape index: {}]   ;;  %s1595_s7 = inlined_call_operand.vmem [shape: f32[2,16,1], index: 7, kind: input, shape index: {}]   ;;  %s1596_s8 = inlined_call_operand.hbm [shape: f32[2,8,128], index: 8, kind: output, shape index: {0}]   ;;  %s1597_s9 = inlined_call_operand.vmem [shape: f32[2,8,128], index: 9, kind: output, shape index: {1}]  }
   0x1   :  { %1598 = sst [smem:[#allocation8_spill]] %s1588_s0 }
   0x2   :  { %15 = vsyncpa [#allocation4], 0 }
   0x3   :  { %16 = vsyncpa [#allocation3], 0 }
   0x4   :  { %18 = vsyncpa [#allocation3 + $0x1], 0  ;;  %s1337_s30 = smov 0   ;;  %s1339_s10 = smov 0  }
   0x5   :  { %s1341_s11 = smov 0   ;;  %s1343_s12 = smov 0  }
   0x6 LB: > { %s1358_s13 = sadd.s32 4294967295, %s1278_s12   ;;  %s1050_s14 = sadd.s32 4294967294, %s1278_s12   ;;  %s1278_s12 = sphi %s1343_s12, %s1606_s12   ;;  %s1274_s11 = sphi %s1341_s11, %s1605_s11   ;;  %s1270_s10 = sphi %s1339_s10, %s1604_s10   ;;  %s1266_s30 = sphi %s1337_s30, %s1603_s30  }
   0x7   : > { %s1362_s15 = sadd.s32 1, %s1278_s12   ;;  %s204_s16 = sadd.s32 1, %s1274_s11 }
   0x8   : > { %s201_s17 = ssub.s32 %s1278_s12, %s1362_s15  ;;  %p214_p0 = scmp.ne.s32.totalorder %s1274_s11, %s1270_s10 }
   0x9   : > { %p202_p1 = scmp.eq.s32.totalorder %s201_s17, 0  ;;  %p215_p2 = scmp.eq.s32.totalorder %s1358_s13, 1 }
   0xa   : > { %p220_p3 = scmp.ne.s32.totalorder %s1270_s10, %s1266_s30  ;;  %p221_p4 = scmp.eq.s32.totalorder %s1050_s14, 1 }
   0xb   : > { %s1373_s18 = scalar_select %p202_p1, %s1274_s11, %s204_s16  }
   0xc   : > { %p1375_p5 = por %p215_p2, %p214_p0  ;;  %p1379_p6 = por %p221_p4, %p220_p3 }
   0xd   : > { %p1051_p7 = scmp.ge.s32.totalorder %s1278_s12, 1  ;;  %p254_p8 = scmp.lt.s32.totalorder %s1278_s12, 3 }
   0xe   : > { %p1154_p9 = scmp.eq.s32.totalorder %s1358_s13, 0  ;;  %s1602_s0 = sld [smem:[#allocation8_spill]] }
   0xf   : > { %p1386_p10 = pnand %p1051_p7, %p254_p8 }
  0x11   : > { %p1146_p11 = pneg %p1386_p10 }
  0x13   : > { %p1147_p12 = pnand %p1154_p9, %p1146_p11 }
  0x14   : > { %s267_s24 = sshll.u32 %s1602_s0, 4  ;;  %s268_s24 = int_to_ptr.vmem [resolvable:$true] %s267_s24 }
  0x15   : > { %s1197_s25 = scalar_lea.vmem %s268_s24, 16  ;;  %p1199_p0 = pneg %p1147_p12 }
  0x16   : > { %p1198_p13 = scmp.ne.s32.totalorder %s268_s24, %s1197_s25  ;;  %p1205_p3 = scmp.lt.s32.totalorder %s268_s24, %s268_s24 }
  0x17   : > { %p1206_p4 = scmp.lt.s32.totalorder %s1197_s25, %s1197_s25 }
  0x18   : > { %p1200_p1 = pnand %p1199_p0, %p1198_p13 }
  0x19   : > { %p1207_p7 = por %p1206_p4, %p1205_p3 }
  0x1a   : > { %p1201_p2 = pneg %p1200_p1 }
  0x1c   : > { %p1208_p8 = pnand %p1207_p7, %p1201_p2 }
  0x1e   : > { %1211 = shalt.err (!%p1208_p8)
}
  0x1f   : > { %s1280_s26 = smov [#allocation2]   ;;  %305 = sbr.rel (%p1386_p10) target bundleno = 1206 (0x4b6), region = 52 }
  0x20   : > { %1149 = dma.vmem_to_smem (!%p1147_p12), %s268_s24, 16, %s1280_s26, [#allocation4]  }
  0x26   : > { %1257 = dma.done.wait (%p1154_p9), [#allocation4], 16  }
  0x27   : > { %1259 = vsyncadd (%p1154_p9), [#allocation4], 4294967280 }
  0x28   : > { %311 = sfence }
  0x29   : > { %p345_p11 = scmp.lt.s32.totalorder %s1358_s13, 1  ;;  %v358_v0 = vld [vmem:[%s1590_s2] sm:$0xff]  ;;  %vm372_vm0 = vcmask 64512   ;;  %v1281_v2 = vmov 0   ;;  %v361_v4 = vld [vmem:[%s1591_s3 + $0x8] sm:$0xff]  ;;  %v1062_v8 = vld [vmem:[%s1592_s4 + $0x10] sm:$0xff]  ;;  %v354_v42 = vlaneseq }
  0x2a   : > { %v360_v1 = vld [vmem:[%s1591_s3] sm:$0xff]  ;;  %1110 = vmatprep.mubr.msk.f32.mxu0 %vm372_vm0, %v358_v0  ;;  %1195 = vset.pattern.permute.xlu0 %v1281_v2  ;;  %v462_v5 = vld [vmem:[%s1592_s4 + $0x8] sm:$0xff]  ;;  %v1063_v9 = vld [vmem:[%s1592_s4 + $0x18] sm:$0xff]  ;;  %s356_s23 = sld [smem:[#allocation2]]  ;;  %s1282_s25 = smov 1   ;;  %vm558_vm3 = vcmask 130048  }
  0x2b   : > { %s1412_s16 = scalar_select %p345_p11, %s1358_s13, 1  ;;  %364 = vperm.xlu0 %1195, %v360_v1   ;;  %1196 = vset.pattern.permute.xlu1 %v1281_v2  ;;  %v461_v3 = vld [vmem:[%s1592_s4] sm:$0xff]  ;;  %v359_v7 = vld [vmem:[%s1590_s2 + $0x8] sm:$0xff]  ;;  %v1072_v25 = vld [vmem:[%s1591_s3 + $0x10] sm:$0xff]  ;;  %v1492_v44 = vand.u32 127, %v354_v42 }
  0x2c   : > { %472 = vperm.xlu1 %1196, %v461_v3   ;;  %v1064_v10 = vld [vmem:[%s1592_s4 + $0x20] sm:$0xff]  ;;  %v1065_v11 = vld [vmem:[%s1592_s4 + $0x28] sm:$0xff]  ;;  %s1283_s26 = smov 127   ;;  %v1076_v28 = vld [vmem:[%s1592_s4 + $0x30] sm:$0xff]  ;;  %s1059_s17 = sld [smem:[#allocation2 + $0x1]] }
  0x2d   : > { %s1057_s24 = sshll.u32 %s1412_s16, 3  ;;  %v523_v12 = vld [vmem:[%s1593_s5] sm:$0xff]  ;;  %v524_v13 = vld [vmem:[%s1593_s5 + $0x8] sm:$0xff]  ;;  %v1073_v29 = vld [vmem:[%s1591_s3 + $0x18] sm:$0xff]  ;;  %vm467_vm4 = vcmp.ge.s32.totalorder %v1492_v44, 1  ;;  %vm506_vm5 = vcmp.lt.s32.totalorder %v1492_v44, 127 }
  0x2e   : > { %s348_s29 = scalar_lea.vmem %s1589_s1, %s1057_s24  ;;  %v544_v26 = vld [vmem:[%s1594_s6] sm:$0xff]  ;;  %v1077_v31 = vld [vmem:[%s1592_s4 + $0x38] sm:$0xff]  ;;  %v1080_v32 = vld [vmem:[%s1592_s4 + $0x50] sm:$0xff]  ;;  %s1068_s28 = sld [smem:[#allocation2 + $0x2]]  ;;  %vm755_vm10 = vcmp.ge.s32.totalorder %v1492_v44, 2  ;;  %vm794_vm11 = vcmp.lt.s32.totalorder %v1492_v44, 126 }
  0x2f   : > { %v1429_v6 = vld [vmem:[%s348_s29] sm:$0xff]  ;;  %369 = vperm.xlu0 %1195, %v361_v4   ;;  %1117 = vmatprep.mubr.msk.f32.mxu1 %vm558_vm3, %v544_v26  ;;  %v1079_v33 = vld [vmem:[%s1592_s4 + $0x48] sm:$0xff]  ;;  %v1082_v34 = vld [vmem:[%s1593_s5 + $0x10] sm:$0xff]  ;;  %s1284_s29 = smov 2   ;;  %s1285_s14 = smov 126  }
  0x30   : > { %1108 = vmatprep.subr.mxu0 %v1429_v6  ;;  %477 = vperm.xlu1 %1196, %v462_v5   ;;  %v456_v17 = vstv %s356_s23  ;;  %v546_v27 = vld [vmem:[%s1595_s7] sm:$0xff]  ;;  %v1081_v35 = vld [vmem:[%s1592_s4 + $0x58] sm:$0xff]  ;;  %s336_s21 = sand.u32 1, %s1270_s10   ;;  %s1091_s23 = sshll.u32 %s1358_s13, 7 }
  0x31   : > { %1109 = vmatpush3.msra.mxu0 %v1429_v6  ;;  %v1078_v30 = vld [vmem:[%s1592_s4 + $0x40] sm:$0xff]  ;;  %v1083_v36 = vld [vmem:[%s1593_s5 + $0x18] sm:$0xff]  ;;  %s1056_s22 = sshll.u32 %s336_s21, 3  ;;  %s1546_s0 = scalar_lea.hbm %s1596_s8, %s1091_s23 }
  0x32   : > { %1111 = vmatmul.mubr.msk.f32.vlgmr.msra.gmra.mrb[0].mxu0 %vm372_vm0, %v359_v7  ;;  %v539_v1 = vstv %s1059_s17  ;;  %s935_s13 = scalar_lea.sflag [#allocation3], %s336_s21 }
  0x33   : > { %487 = vperm.xlu0 %1195, %v1062_v8  }
  0x34   : > { %492 = vperm.xlu1 %1196, %v1063_v9  }
  0x37   : > { %511 = vperm.xlu0 %1195, %v1064_v10   ;;  %v545_v10 = vld [vmem:[%s1594_s6 + $0x8] sm:$0xff] }
  0x38   : > { %516 = vperm.xlu1 %1196, %v1065_v11   ;;  %v1070_v11 = vld [vmem:[%s1590_s2 + $0x10] sm:$0xff] }
  0x39   : > { %1122 = vmatprep.mubr.msk.f32.mxu0 %vm372_vm0, %v1070_v11 }
  0x3b   : > { %527 = vperm.xlu0 %1195, %v523_v12  }
  0x3c   : > { %532 = vperm.xlu1 %1196, %v524_v13  }
  0xaa   : > { %v365_v14 = vpop.permute.xlu0 %364 }
  0xab   : > { %v473_v37 = vpop.permute.xlu1 %472 }
  0xae   : > { %v370_v15 = vpop.permute.xlu0 %369 }
  0xaf   : > { %v478_v38 = vpop.permute.xlu1 %477 }
  0xb2   : > { %v488_v39 = vpop.permute.xlu0 %487 }
  0xb3   : > { %v493_v40 = vpop.permute.xlu1 %492 }
  0xb6   : > { %v512_v43 = vpop.permute.xlu0 %511 }
  0xb7   : > { %v517_v41 = vpop.permute.xlu1 %516 }
  0xba   : > { %v528_v46 = vpop.permute.xlu0 %527 }
  0xbb   : > { %v533_v45 = vpop.permute.xlu1 %532 }
 0x105   : > { %v1112_v16 = vpop.f32.mrb[0].mxu0 }
 0x106   : > { %v451_v18 = vadd.f32 %v1112_v16, %v370_v15  ;;  %v445_v19 = vpop.f32.mrb[1].mxu0 }
 0x107   : > { %v446_v20 = vadd.f32 %v445_v19, %v365_v14 }
 0x108   : > { %v458_v21 = vmul.f32 %v456_v17, %v451_v18  ;;  %vm455_vm1 = vcmp.ge.f32.partialorder %v451_v18, 0.0 }
 0x109   : > { %v457_v22 = vmul.f32 %v456_v17, %v446_v20  ;;  %vm454_vm2 = vcmp.ge.f32.partialorder %v446_v20, 0.0  ;;  %v1071_v17 = vld [vmem:[%s1590_s2 + $0x18] sm:$0xff] }
 0x10a   : > { %v460_v23 = vsel %vm455_vm1, %v451_v18, %v458_v21 }
 0x10b   : > { %465 = vrot.lane.b32.xlu1 %v460_v23, %s1282_s25  ;;  %v459_v24 = vsel %vm454_vm2, %v446_v20, %v457_v22  ;;  %v496_v53 = vmul.f32 %v493_v40, %v460_v23  ;;  %v743_v20 = vstv %s1068_s28 }
 0x10c   : > { %463 = vrot.lane.b32.xlu0 %v459_v24, %s1282_s25  ;;  %v495_v55 = vmul.f32 %v488_v39, %v459_v24  ;;  %s338_s25 = scalar_lea.vmem [#allocation5], %s1056_s22 }
 0x10f   : > { %504 = vrot.lane.b32.xlu1 %v460_v23, %s1283_s26 }
 0x110   : > { %502 = vrot.lane.b32.xlu0 %v459_v24, %s1283_s26  ;;  %s952_s26 = sshll.u32 %s338_s25, 4  ;;  %s1548_s26 = int_to_ptr.vmem [resolvable:$true] %s952_s26 }
 0x111   : > { %s1212_s16 = scalar_lea.vmem %s1548_s26, 128 }
 0x112   : > { %p1213_p9 = scmp.ne.s32.totalorder %s1548_s26, %s1212_s16 }
 0x113   : > { %652 = vperm.xlu1 %1196, %v1072_v25  }
 0x114   : > { %550 = vperm.xlu0 %1195, %v546_v27   ;;  %p1214_p10 = pnand %p1213_p9, %p1375_p5 }
 0x116   : > { %p1215_p12 = pneg %p1214_p10 }
 0x117   : > { %760 = vperm.xlu1 %1196, %v1076_v28   ;;  %v547_v28 = vld [vmem:[%s1595_s7 + $0x8] sm:$0xff] }
 0x118   : > { %657 = vperm.xlu0 %1195, %v1073_v29   ;;  %v1084_v29 = vld [vmem:[%s1594_s6 + $0x10] sm:$0xff] }
 0x11b   : > { %775 = vperm.xlu1 %1196, %v1078_v30   ;;  %v1086_v30 = vld [vmem:[%s1595_s7 + $0x10] sm:$0xff] }
 0x11c   : > { %765 = vperm.xlu0 %1195, %v1077_v31   ;;  %v1087_v31 = vld [vmem:[%s1595_s7 + $0x18] sm:$0xff] }
 0x11f   : > { %799 = vperm.xlu1 %1196, %v1080_v32  }
 0x120   : > { %780 = vperm.xlu0 %1195, %v1079_v33  }
 0x123   : > { %816 = vperm.xlu1 %1196, %v1082_v34  }
 0x124   : > { %804 = vperm.xlu0 %1195, %v1081_v35  }
 0x128   : > { %821 = vperm.xlu0 %1195, %v1083_v36  }
 0x17d   : > { %v466_v47 = vpop.permute.xlu1 %465 }
 0x17e   : > { %v469_v48 = vsel %vm467_vm4, %v466_v47, 0.0  ;;  %v464_v49 = vpop.permute.xlu0 %463 }
 0x17f   : > { %v481_v50 = vmul.f32 %v478_v38, %v469_v48  ;;  %v468_v51 = vsel %vm467_vm4, %v464_v49, 0.0 }
 0x180   : > { %v480_v52 = vmul.f32 %v473_v37, %v468_v51 }
 0x181   : > { %v505_v54 = vpop.permute.xlu1 %504  ;;  %v498_v58 = vadd.f32 %v496_v53, %v481_v50 }
 0x182   : > { %v508_v56 = vsel %vm506_vm5, %v505_v54, 0.0  ;;  %v503_v57 = vpop.permute.xlu0 %502  ;;  %v497_v61 = vadd.f32 %v495_v55, %v480_v52 }
 0x183   : > { %v520_v59 = vmul.f32 %v517_v41, %v508_v56  ;;  %v507_v60 = vsel %vm506_vm5, %v503_v57, 0.0 }
 0x184   : > { %v519_v62 = vmul.f32 %v512_v43, %v507_v60 }
 0x185   : > { %v522_v63 = vadd.f32 %v520_v59, %v498_v58 }
 0x186   : > { %v521_v0 = vadd.f32 %v519_v62, %v497_v61 }
 0x187   : > { %v536_v2 = vadd.f32 %v533_v45, %v522_v63 }
 0x188   : > { %v535_v3 = vadd.f32 %v528_v46, %v521_v0 }
 0x189   : > { %vm538_vm6 = vcmp.ge.f32.partialorder %v536_v2, 0.0  ;;  %v541_v4 = vmul.f32 %v539_v1, %v536_v2 }
 0x18a   : > { %vm537_vm7 = vcmp.ge.f32.partialorder %v535_v3, 0.0  ;;  %v540_v5 = vmul.f32 %v539_v1, %v535_v3 }
 0x18b   : > { %v543_v7 = vsel %vm538_vm6, %v536_v2, %v541_v4  ;;  %v1085_v2 = vld [vmem:[%s1594_s6 + $0x18] sm:$0xff] }
 0x18c   : > { %v542_v8 = vsel %vm537_vm7, %v535_v3, %v540_v5 }
 0x18d   : > { %v1132_v9 = vpack.c.bf16 %v543_v7, %v542_v8 }
 0x18f   : > { %1133 = vmatprep.subr.bf16.mxu1 %v1132_v9 }
 0x190   : > { %1135 = vmatpush3.bf16.msra.mxu1 %v1132_v9 }
 0x192   : > { %v653_v21 = vpop.permute.xlu1 %652 }
 0x193   : > { %1118 = vmatmul.mubr.msk.f32.vlgmr.msra.gmra.mrb[0].mxu1 %vm558_vm3, %v545_v10  ;;  %v551_v13 = vpop.permute.xlu0 %550 }
 0x194   : > { %1129 = vmatprep.mubr.msk.f32.mxu1 %vm558_vm3, %v1084_v29 }
 0x196   : > { %v761_v33 = vpop.permute.xlu1 %760 }
 0x197   : > { %v658_v18 = vpop.permute.xlu0 %657 }
 0x19a   : > { %v776_v35 = vpop.permute.xlu1 %775 }
 0x19b   : > { %v766_v32 = vpop.permute.xlu0 %765 }
 0x19e   : > { %v800_v37 = vpop.permute.xlu1 %799 }
 0x19f   : > { %v781_v34 = vpop.permute.xlu0 %780 }
 0x1a2   : > { %v817_v39 = vpop.permute.xlu1 %816 }
 0x1a3   : > { %v805_v36 = vpop.permute.xlu0 %804 }
 0x1a7   : > { %v822_v38 = vpop.permute.xlu0 %821 }
 0x266   : > { %v1504_v12 = vpop.f32.mrb[0].mxu1 }
 0x267   : > { %v631_v14 = vpop.f32.mrb[1].mxu1 }
 0x268   : > { %v632_v15 = vadd.f32 %v631_v14, %v551_v13 }
 0x26a   : > { %v1507_v16 = vadd.f32 %v632_v15, %v1429_v6 }
 0x26c   : > { %1120 = vmatprep.subr.mxu0 %v1507_v16 }
 0x26d   : > { %1121 = vmatpush3.msra.mxu0 %v1507_v16 }
 0x26e   : > { %1123 = vmatmul.mubr.msk.f32.vlgmr.msra.gmra.mrb[2].mxu0 %vm372_vm0, %v1071_v17 }
 0x341   : > { %v1124_v19 = vpop.f32.mrb[2].mxu0 }
 0x342   : > { %v738_v22 = vadd.f32 %v1124_v19, %v658_v18  ;;  %v732_v23 = vpop.f32.mrb[3].mxu0 }
 0x343   : > { %v733_v24 = vadd.f32 %v732_v23, %v653_v21 }
 0x344   : > { %v745_v6 = vmul.f32 %v743_v20, %v738_v22  ;;  %vm742_vm8 = vcmp.ge.f32.partialorder %v738_v22, 0.0 }
 0x345   : > { %v744_v25 = vmul.f32 %v743_v20, %v733_v24  ;;  %vm741_vm9 = vcmp.ge.f32.partialorder %v733_v24, 0.0 }
 0x346   : > { %v747_v26 = vsel %vm742_vm8, %v738_v22, %v745_v6 }
 0x347   : > { %753 = vrot.lane.b32.xlu0 %v747_v26, %s1284_s29  ;;  %v746_v27 = vsel %vm741_vm9, %v733_v24, %v744_v25  ;;  %v784_v47 = vmul.f32 %v781_v34, %v747_v26 }
 0x348   : > { %751 = vrot.lane.b32.xlu1 %v746_v27, %s1284_s29  ;;  %s1069_s29 = sld [smem:[#allocation2 + $0x3]]  ;;  %v783_v49 = vmul.f32 %v776_v35, %v746_v27 }
 0x34b   : > { %792 = vrot.lane.b32.xlu0 %v747_v26, %s1285_s14 }
 0x34c   : > { %790 = vrot.lane.b32.xlu1 %v746_v27, %s1285_s14 }
 0x34e   : > { %v828_v59 = vstv %s1069_s29  ;;  %s352_s29 = scalar_lea.vmem %s1597_s9, %s1057_s24  ;;  %s1286_s24 = smov [#allocation5]  }
 0x34f   : > { %555 = vperm.xlu0 %1195, %v547_v28   ;;  %s1216_s22 = sshll.u32 %s1286_s24, 4  ;;  %s1217_s22 = int_to_ptr.vmem [resolvable:$false] %s1216_s22 }
 0x350   : > { %841 = vperm.xlu1 %1196, %v1086_v30   ;;  %s1218_s27 = scalar_lea.vmem %s1217_s22, 256  ;;  %p1219_p13 = scmp.lt.s32.totalorder %s1548_s26, %s1217_s22 }
 0x351   : > { %p1220_p0 = scmp.lt.s32.totalorder %s1218_s27, %s1212_s16 }
 0x353   : > { %p1221_p1 = por %p1220_p0, %p1219_p13 }
 0x354   : > { %846 = vperm.xlu1 %1196, %v1087_v31  }
 0x355   : > { %p1222_p2 = pnand %p1221_p1, %p1215_p12 }
 0x3b9   : > { %v754_v40 = vpop.permute.xlu0 %753 }
 0x3ba   : > { %v757_v41 = vsel %vm755_vm10, %v754_v40, 0.0  ;;  %v752_v42 = vpop.permute.xlu1 %751 }
 0x3bb   : > { %v769_v43 = vmul.f32 %v766_v32, %v757_v41  ;;  %v756_v45 = vsel %vm755_vm10, %v752_v42, 0.0 }
 0x3bc   : > { %v768_v46 = vmul.f32 %v761_v33, %v756_v45 }
 0x3bd   : > { %v793_v48 = vpop.permute.xlu0 %792  ;;  %v786_v52 = vadd.f32 %v784_v47, %v769_v43 }
 0x3be   : > { %v796_v50 = vsel %vm794_vm11, %v793_v48, 0.0  ;;  %v791_v51 = vpop.permute.xlu1 %790  ;;  %v785_v55 = vadd.f32 %v783_v49, %v768_v46 }
 0x3bf   : > { %v808_v53 = vmul.f32 %v805_v36, %v796_v50  ;;  %v795_v54 = vsel %vm794_vm11, %v791_v51, 0.0 }
 0x3c0   : > { %v807_v56 = vmul.f32 %v800_v37, %v795_v54 }
 0x3c1   : > { %v810_v57 = vadd.f32 %v808_v53, %v786_v52 }
 0x3c2   : > { %v809_v58 = vadd.f32 %v807_v56, %v785_v55 }
 0x3c3   : > { %v825_v60 = vadd.f32 %v822_v38, %v810_v57 }
 0x3c4   : > { %v824_v61 = vadd.f32 %v817_v39, %v809_v58 }
 0x3c5   : > { %vm827_vm12 = vcmp.ge.f32.partialorder %v825_v60, 0.0  ;;  %v830_v62 = vmul.f32 %v828_v59, %v825_v60 }
 0x3c6   : > { %vm826_vm13 = vcmp.ge.f32.partialorder %v824_v61, 0.0  ;;  %v829_v44 = vmul.f32 %v828_v59, %v824_v61 }
 0x3c7   : > { %v832_v63 = vsel %vm827_vm12, %v825_v60, %v830_v62 }
 0x3c8   : > { %v831_v0 = vsel %vm826_vm13, %v824_v61, %v829_v44 }
 0x3c9   : > { %v1136_v1 = vpack.c.bf16 %v832_v63, %v831_v0 }
 0x3cb   : > { %1137 = vmatprep.subr.bf16.mxu1 %v1136_v1 }
 0x3cc   : > { %1139 = vmatpush3.bf16.msra.mxu1 %v1136_v1 }
 0x3ce   : > { %v556_v4 = vpop.permute.xlu0 %555 }
 0x3cf   : > { %1130 = vmatmul.mubr.msk.f32.vlgmr.msra.gmra.mrb[2].mxu1 %vm558_vm3, %v1085_v2  ;;  %v842_v3 = vpop.permute.xlu1 %841  ;;  %v637_v8 = vadd.f32 %v1504_v12, %v556_v4 }
 0x3d3   : > { %v847_v5 = vpop.permute.xlu1 %846 }
 0x4a2   : > { %v1131_v7 = vpop.f32.mrb[2].mxu1 }
 0x4a3   : > { %v927_v9 = vadd.f32 %v1131_v7, %v847_v5  ;;  %v921_v10 = vpop.f32.mrb[3].mxu1 }
 0x4a4   : > { %v922_v11 = vadd.f32 %v921_v10, %v842_v3 }
 0x4a5   : > { %v931_v13 = vadd.f32 %v927_v9, %v637_v8 }
 0x4a6   : > { %v930_v14 = vadd.f32 %v922_v11, %v1507_v16 }
 0x4a7   : > { %933 = vst [vmem:[%s352_s29] sm:$0xff] %v931_v13 }
 0x4a8   : > { %932 = vst [vmem:[%s338_s25] sm:$0xff] %v930_v14 }
 0x4a9   : > { %1225 = shalt.err (!%p1222_p2)
}
 0x4aa   : > { %s1226_s21 = scalar_lea.hbm %s1546_s0, 128  ;;  %s1230_s28 = scalar_lea.hbm %s1596_s8, 256 }
 0x4ab   : > { %p1227_p3 = scmp.ne.s32.totalorder %s1546_s0, %s1226_s21  ;;  %p1231_p8 = scmp.lt.u32.totalorder %s1546_s0, %s1596_s8 }
 0x4ac   : > { %p1232_p11 = scmp.lt.u32.totalorder %s1230_s28, %s1226_s21  ;;  %p1234_p10 = scmp.lt.u32.totalorder %s1226_s21, %s1546_s0 }
 0x4ad   : > { %p1228_p4 = pnand %p1227_p3, %p1375_p5 }
 0x4ae   : > { %p1233_p9 = por %p1232_p11, %p1231_p8 }
 0x4af   : > { %p1229_p7 = pneg %p1228_p4 }
 0x4b0   : > { %p1235_p12 = por %p1234_p10, %p1233_p9 }
 0x4b2   : > { %p1236_p13 = pnand %p1235_p12, %p1229_p7 }
 0x4b4   : > { %1239 = shalt.err (!%p1236_p13)
}
 0x4b5   : > { %1144 = dma.vmem_to_hbm [thread:$0]  (%p1375_p5), %s1548_s26, 128, %s1546_s0, %s935_s13  }
 0x4b6 PF: > { %p1156_p0 = scmp.ge.s32.totalorder %s1278_s12, 2  ;;  %s967_s17 = sand.u32 1, %s1266_s30  }
 0x4b7   : > { %s968_s16 = scalar_lea.sflag [#allocation3], %s967_s17 }
 0x4b8   : > { %p1151_p1 = pnand %p1156_p0, %p1379_p6 }
 0x4ba   : > { %1261 = dma.done.wait (!%p1151_p1), %s968_s16, 128  }
 0x4bb   : > { %1263 = vsyncadd (!%p1151_p1), %s968_s16, 4294967168  ;;  %p21_p2 = scmp.ge.s32.totalorder %s1362_s15, 4   ;;  %s1603_s30 = smov %s1270_s10 }
 0x4bc   : > { %s1604_s10 = smov %s1274_s11  ;;  %s1605_s11 = smov %s1373_s18 }
 0x4bd   : > { %s1606_s12 = smov %s1362_s15  ;;  %23 = sbr.rel (!%p21_p2) target bundleno = 6 (0x6), region = 114 }
 0x4c4   :  { %980 = vsyncpa [#allocation3], 1 }
 0x4c5   :  { %982 = vsyncpa [#allocation3 + $0x1], 1 }
 0x4c6   :  { %983 = vsyncpa [#allocation4], 1 }
 0x4c7   :  { %985 = vsyncpa [#allocation4 + $0x1], 1 }

// kernel: tcn_separation_part.9
= control target key start
LH: loop header
LB: loop body
LE: loop exit
PB: predicated region body
PF: predicated region fallthrough
CT: control target
= control target key end

     0   :  { %15 = vsyncpa [#allocation4], 0  ;;  %s1752_s0 = inlined_call_operand.vmem [shape: f32[4], index: 0, kind: input, shape index: {}]   ;;  %s1753_s1 = inlined_call_operand.vmem [shape: f32[2,16,128], index: 1, kind: input, shape index: {}]   ;;  %s1754_s2 = inlined_call_operand.vmem [shape: f32[2,16,16], index: 2, kind: input, shape index: {}]   ;;  %s1755_s3 = inlined_call_operand.vmem [shape: f32[2,16,1], index: 3, kind: input, shape index: {}]   ;;  %s1756_s4 = inlined_call_operand.vmem [shape: f32[2,3,16,1], index: 4, kind: input, shape index: {}]   ;;  %s1757_s5 = inlined_call_operand.vmem [shape: f32[2,16,1], index: 5, kind: input, shape index: {}]   ;;  %s1758_s6 = inlined_call_operand.vmem [shape: f32[2,32,16], index: 6, kind: input, shape index: {}]   ;;  %s1759_s7 = inlined_call_operand.vmem [shape: f32[2,32,1], index: 7, kind: input, shape index: {}]   ;;  %s1760_s8 = inlined_call_operand.hbm [shape: f32[2,16,128], index: 8, kind: output, shape index: {0}]   ;;  %s1761_s9 = inlined_call_operand.vmem [shape: f32[2,16,128], index: 9, kind: output, shape index: {1}]  }
   0x1   :  { %16 = vsyncpa [#allocation3], 0 }
   0x2   :  { %18 = vsyncpa [#allocation3 + $0x1], 0  ;;  %s1463_s30 = smov 0   ;;  %s1465_s10 = smov 0  }
   0x3   :  { %s1467_s11 = smov 0   ;;  %s1469_s12 = smov 0  }
   0x4 LB: > { %s1484_s13 = sadd.s32 4294967295, %s1402_s12   ;;  %s1126_s14 = sadd.s32 4294967294, %s1402_s12   ;;  %s1402_s12 = sphi %s1469_s12, %s1768_s12   ;;  %s1398_s11 = sphi %s1467_s11, %s1767_s11   ;;  %s1394_s10 = sphi %s1465_s10, %s1766_s10   ;;  %s1390_s30 = sphi %s1463_s30, %s1765_s30  }
   0x5   : > { %s1488_s15 = sadd.s32 1, %s1402_s12   ;;  %s204_s16 = sadd.s32 1, %s1398_s11 }
   0x6   : > { %s201_s17 = ssub.s32 %s1402_s12, %s1488_s15  ;;  %p214_p0 = scmp.ne.s32.totalorder %s1398_s11, %s1394_s10 }
   0x7   : > { %p202_p1 = scmp.eq.s32.totalorder %s201_s17, 0  ;;  %p215_p2 = scmp.eq.s32.totalorder %s1484_s13, 1 }
   0x8   : > { %p220_p3 = scmp.ne.s32.totalorder %s1394_s10, %s1390_s30  ;;  %p221_p4 = scmp.eq.s32.totalorder %s1126_s14, 1 }
   0x9   : > { %s1499_s18 = scalar_select %p202_p1, %s1398_s11, %s204_s16  }
   0xa   : > { %p1501_p5 = por %p215_p2, %p214_p0  ;;  %p1505_p6 = por %p221_p4, %p220_p3 }
   0xb   : > { %p1127_p7 = scmp.ge.s32.totalorder %s1402_s12, 1  ;;  %p254_p8 = scmp.lt.s32.totalorder %s1402_s12, 3 }
   0xc   : > { %p1276_p9 = scmp.eq.s32.totalorder %s1484_s13, 0  ;;  %s267_s24 = sshll.u32 %s1752_s0, 4  ;;  %s268_s24 = int_to_ptr.vmem [resolvable:$true] %s267_s24 }
   0xd   : > { %p1512_p10 = pnand %p1127_p7, %p254_p8  ;;  %s1321_s25 = scalar_lea.vmem %s268_s24, 16 }
   0xe   : > { %p1322_p13 = scmp.ne.s32.totalorder %s268_s24, %s1321_s25  ;;  %p1329_p3 = scmp.lt.s32.totalorder %s268_s24, %s268_s24 }
   0xf   : > { %p1268_p11 = pneg %p1512_p10  ;;  %p1330_p4 = scmp.lt.s32.totalorder %s1321_s25, %s1321_s25 }
  0x11   : > { %p1269_p12 = pnand %p1276_p9, %p1268_p11  ;;  %p1331_p7 = por %p1330_p4, %p1329_p3 }
  0x13   : > { %p1323_p0 = pneg %p1269_p12 }
  0x15   : > { %p1324_p1 = pnand %p1323_p0, %p1322_p13 }
  0x17   : > { %p1325_p2 = pneg %p1324_p1 }
  0x19   : > { %p1332_p8 = pnand %p1331_p7, %p1325_p2 }
  0x1b   : > { %1335 = shalt.err (!%p1332_p8)
}
  0x1c   : > { %s1404_s26 = smov [#allocation2]   ;;  %306 = sbr.rel (%p1512_p10) target bundleno = 1213 (0x4bd), region = 52 }
  0x1d   : > { %1271 = dma.vmem_to_smem (!%p1269_p12), %s268_s24, 16, %s1404_s26, [#allocation4]  }
  0x23   : > { %1381 = dma.done.wait (%p1276_p9), [#allocation4], 16  }
  0x24   : > { %1383 = vsyncadd (%p1276_p9), [#allocation4], 4294967280 }
  0x25   : > { %312 = sfence }
  0x26   : > { %p348_p11 = scmp.lt.s32.totalorder %s1484_s13, 1  ;;  %v364_v0 = vld [vmem:[%s1754_s2] sm:$0xff]  ;;  %vm378_vm0 = vcmask 130048   ;;  %v1405_v2 = vmov 0   ;;  %v367_v4 = vld [vmem:[%s1755_s3 + $0x8] sm:$0xff]  ;;  %v1140_v9 = vld [vmem:[%s1756_s4 + $0x10] sm:$0xff]  ;;  %v360_v45 = vlaneseq }
  0x27   : > { %v366_v1 = vld [vmem:[%s1755_s3] sm:$0xff]  ;;  %1208 = vmatprep.mubr.msk.f32.mxu0 %vm378_vm0, %v364_v0  ;;  %1319 = vset.pattern.permute.xlu0 %v1405_v2  ;;  %v468_v5 = vld [vmem:[%s1756_s4 + $0x8] sm:$0xff]  ;;  %v1141_v10 = vld [vmem:[%s1756_s4 + $0x18] sm:$0xff]  ;;  %s362_s23 = sld [smem:[#allocation2]]  ;;  %s1406_s25 = smov 1  }
  0x28   : > { %s1538_s16 = scalar_select %p348_p11, %s1484_s13, 1  ;;  %370 = vperm.xlu0 %1319, %v366_v1   ;;  %1320 = vset.pattern.permute.xlu1 %v1405_v2  ;;  %v467_v3 = vld [vmem:[%s1756_s4] sm:$0xff]  ;;  %v365_v11 = vld [vmem:[%s1754_s2 + $0x8] sm:$0xff]  ;;  %v1153_v30 = vld [vmem:[%s1755_s3 + $0x18] sm:$0xff]  ;;  %v1623_v47 = vand.u32 127, %v360_v45 }
  0x29   : > { %478 = vperm.xlu1 %1320, %v467_v3   ;;  %v1142_v12 = vld [vmem:[%s1756_s4 + $0x20] sm:$0xff]  ;;  %v1143_v13 = vld [vmem:[%s1756_s4 + $0x28] sm:$0xff]  ;;  %s1407_s26 = smov 127   ;;  %v1152_v31 = vld [vmem:[%s1755_s3 + $0x10] sm:$0xff]  ;;  %s1137_s22 = sld [smem:[#allocation2 + $0x1]] }
  0x2a   : > { %s1181_s24 = sshll.u32 %s1538_s16, 4  ;;  %v529_v14 = vld [vmem:[%s1757_s5] sm:$0xff]  ;;  %v530_v15 = vld [vmem:[%s1757_s5 + $0x8] sm:$0xff]  ;;  %v1157_v32 = vld [vmem:[%s1756_s4 + $0x38] sm:$0xff]  ;;  %vm473_vm3 = vcmp.ge.s32.totalorder %v1623_v47, 1  ;;  %vm512_vm4 = vcmp.lt.s32.totalorder %v1623_v47, 127 }
  0x2b   : > { %s352_s29 = scalar_lea.vmem %s1753_s1, %s1181_s24  ;;  %v555_v27 = vld [vmem:[%s1759_s7 + $0x8] sm:$0xff]  ;;  %v550_v28 = vld [vmem:[%s1758_s6] sm:$0xff]  ;;  %v1156_v33 = vld [vmem:[%s1756_s4 + $0x30] sm:$0xff]  ;;  %s1148_s14 = sld [smem:[#allocation2 + $0x2]]  ;;  %vm792_vm9 = vcmp.ge.s32.totalorder %v1623_v47, 2  ;;  %vm831_vm10 = vcmp.lt.s32.totalorder %v1623_v47, 126 }
  0x2c   : > { %v1555_v6 = vld [vmem:[%s352_s29] sm:$0xff]  ;;  %v1557_v7 = vld [vmem:[%s352_s29 + $0x8] sm:$0xff]  ;;  %375 = vperm.xlu0 %1319, %v367_v4   ;;  %v1161_v36 = vld [vmem:[%s1756_s4 + $0x58] sm:$0xff]  ;;  %s1149_s17 = sld [smem:[#allocation2 + $0x3]]  ;;  %s338_s28 = sand.u32 1, %s1394_s10  }
  0x2d   : > { %v1238_v8 = vpack.c.bf16 %v1557_v7, %v1555_v6  ;;  %483 = vperm.xlu1 %1320, %v468_v5   ;;  %v462_v19 = vstv %s362_s23  ;;  %v554_v29 = vld [vmem:[%s1759_s7] sm:$0xff]  ;;  %v1159_v34 = vld [vmem:[%s1756_s4 + $0x48] sm:$0xff]  ;;  %v1160_v37 = vld [vmem:[%s1756_s4 + $0x50] sm:$0xff]  ;;  %s1132_s29 = sshll.u32 %s338_s28, 4  ;;  %s1183_s21 = sshll.u32 %s1484_s13, 8 }
  0x2e   : > { %v1158_v35 = vld [vmem:[%s1756_s4 + $0x40] sm:$0xff]  ;;  %v1163_v38 = vld [vmem:[%s1757_s5 + $0x18] sm:$0xff]  ;;  %v1162_v39 = vld [vmem:[%s1757_s5 + $0x10] sm:$0xff]  ;;  %s1707_s27 = scalar_lea.hbm %s1760_s8, %s1183_s21  ;;  %s1710_s16 = scalar_lea.sflag [#allocation3], %s338_s28 }
  0x2f   : > { %1239 = vmatprep.subr.bf16.mxu0 %v1238_v8  ;;  %v545_v3 = vstv %s1137_s22 }
  0x30   : > { %1241 = vmatpush3.bf16.msra.mxu0 %v1238_v8  ;;  %493 = vperm.xlu0 %1319, %v1140_v9  }
  0x31   : > { %498 = vperm.xlu1 %1320, %v1141_v10  }
  0x33   : > { %1209 = vmatmul.mubr.msk.f32.vlgmr.msra.gmra.mrb[0].mxu0 %vm378_vm0, %v365_v11 }
  0x34   : > { %517 = vperm.xlu0 %1319, %v1142_v12   ;;  %1215 = vmatprep.mubr.msk.f32.mxu0 %vm378_vm0, %v550_v28  ;;  %v780_v28 = vstv %s1148_s14  ;;  %s340_s14 = scalar_lea.vmem [#allocation5], %s1132_s29  ;;  %s1410_s29 = smov [#allocation5]  }
  0x35   : > { %522 = vperm.xlu1 %1320, %v1143_v13   ;;  %s1340_s22 = sshll.u32 %s1410_s29, 4  ;;  %s1341_s22 = int_to_ptr.vmem [resolvable:$false] %s1340_s22 }
  0x36   : > { %s1342_s23 = scalar_lea.vmem %s1341_s22, 512 }
  0x38   : > { %533 = vperm.xlu0 %1319, %v529_v14   ;;  %v551_v14 = vld [vmem:[%s1758_s6 + $0x8] sm:$0xff] }
  0x39   : > { %538 = vperm.xlu1 %1320, %v530_v15   ;;  %v1150_v15 = vld [vmem:[%s1754_s2 + $0x10] sm:$0xff] }
  0xa7   : > { %v371_v16 = vpop.permute.xlu0 %370 }
  0xa8   : > { %v479_v40 = vpop.permute.xlu1 %478 }
  0xab   : > { %v376_v17 = vpop.permute.xlu0 %375 }
  0xac   : > { %v484_v41 = vpop.permute.xlu1 %483 }
  0xaf   : > { %v494_v42 = vpop.permute.xlu0 %493 }
  0xb0   : > { %v499_v43 = vpop.permute.xlu1 %498 }
  0xb3   : > { %v518_v46 = vpop.permute.xlu0 %517 }
  0xb4   : > { %v523_v44 = vpop.permute.xlu1 %522 }
  0xb7   : > { %v534_v49 = vpop.permute.xlu0 %533 }
  0xb8   : > { %v539_v48 = vpop.permute.xlu1 %538 }
 0x106   : > { %v1210_v18 = vpop.f32.mrb[0].mxu0 }
 0x107   : > { %v457_v20 = vadd.f32 %v1210_v18, %v376_v17  ;;  %v451_v21 = vpop.f32.mrb[1].mxu0 }
 0x108   : > { %v452_v22 = vadd.f32 %v451_v21, %v371_v16 }
 0x109   : > { %v464_v23 = vmul.f32 %v462_v19, %v457_v20  ;;  %vm461_vm1 = vcmp.ge.f32.partialorder %v457_v20, 0.0 }
 0x10a   : > { %v463_v24 = vmul.f32 %v462_v19, %v452_v22  ;;  %vm460_vm2 = vcmp.ge.f32.partialorder %v452_v22, 0.0 }
 0x10b   : > { %v466_v25 = vsel %vm461_vm1, %v457_v20, %v464_v23 }
 0x10c   : > { %471 = vrot.lane.b32.xlu1 %v466_v25, %s1406_s25  ;;  %v465_v26 = vsel %vm460_vm2, %v452_v22, %v463_v24  ;;  %v502_v56 = vmul.f32 %v499_v43, %v466_v25  ;;  %v1170_v43 = vld [vmem:[%s1759_s7 + $0x30] sm:$0xff] }
 0x10d   : > { %469 = vrot.lane.b32.xlu0 %v465_v26, %s1406_s25  ;;  %v501_v58 = vmul.f32 %v494_v42, %v465_v26  ;;  %s1408_s25 = smov 2   ;;  %v1171_v42 = vld [vmem:[%s1759_s7 + $0x38] sm:$0xff] }
 0x110   : > { %510 = vrot.lane.b32.xlu1 %v466_v25, %s1407_s26  ;;  %v1151_v25 = vld [vmem:[%s1754_s2 + $0x18] sm:$0xff] }
 0x111   : > { %508 = vrot.lane.b32.xlu0 %v465_v26, %s1407_s26  ;;  %s1409_s26 = smov 126  }
 0x114   : > { %565 = vperm.xlu1 %1320, %v555_v27  }
 0x115   : > { %560 = vperm.xlu0 %1319, %v554_v29  }
 0x118   : > { %694 = vperm.xlu1 %1320, %v1153_v30  }
 0x119   : > { %689 = vperm.xlu0 %1319, %v1152_v31  }
 0x11c   : > { %802 = vperm.xlu1 %1320, %v1157_v32   ;;  %v552_v32 = vld [vmem:[%s1758_s6 + $0x10] sm:$0xff] }
 0x11d   : > { %797 = vperm.xlu0 %1319, %v1156_v33   ;;  %v553_v33 = vld [vmem:[%s1758_s6 + $0x18] sm:$0xff]  ;;  %1218 = vmatprep.mubr.msk.f32.mxu1 %vm378_vm0, %v552_v32 }
 0x120   : > { %817 = vperm.xlu1 %1320, %v1159_v34  }
 0x121   : > { %812 = vperm.xlu0 %1319, %v1158_v35  }
 0x124   : > { %841 = vperm.xlu1 %1320, %v1161_v36  }
 0x125   : > { %836 = vperm.xlu0 %1319, %v1160_v37   ;;  %v1169_v37 = vld [vmem:[%s1759_s7 + $0x28] sm:$0xff] }
 0x128   : > { %858 = vperm.xlu1 %1320, %v1163_v38   ;;  %v1164_v38 = vld [vmem:[%s1758_s6 + $0x20] sm:$0xff] }
 0x129   : > { %853 = vperm.xlu0 %1319, %v1162_v39   ;;  %v1168_v39 = vld [vmem:[%s1759_s7 + $0x20] sm:$0xff] }
 0x17e   : > { %v472_v50 = vpop.permute.xlu1 %471 }
 0x17f   : > { %v475_v51 = vsel %vm473_vm3, %v472_v50, 0.0  ;;  %v470_v52 = vpop.permute.xlu0 %469 }
 0x180   : > { %v487_v53 = vmul.f32 %v484_v41, %v475_v51  ;;  %v474_v54 = vsel %vm473_vm3, %v470_v52, 0.0  ;;  %v556_v41 = vld [vmem:[%s1759_s7 + $0x10] sm:$0xff] }
 0x181   : > { %v486_v55 = vmul.f32 %v479_v40, %v474_v54  ;;  %v557_v40 = vld [vmem:[%s1759_s7 + $0x18] sm:$0xff] }
 0x182   : > { %v511_v57 = vpop.permute.xlu1 %510  ;;  %v504_v61 = vadd.f32 %v502_v56, %v487_v53 }
 0x183   : > { %v514_v59 = vsel %vm512_vm4, %v511_v57, 0.0  ;;  %v509_v60 = vpop.permute.xlu0 %508  ;;  %v503_v0 = vadd.f32 %v501_v58, %v486_v55 }
 0x184   : > { %v526_v62 = vmul.f32 %v523_v44, %v514_v59  ;;  %v513_v63 = vsel %vm512_vm4, %v509_v60, 0.0 }
 0x185   : > { %v525_v1 = vmul.f32 %v518_v46, %v513_v63 }
 0x186   : > { %v528_v2 = vadd.f32 %v526_v62, %v504_v61 }
 0x187   : > { %v527_v4 = vadd.f32 %v525_v1, %v503_v0 }
 0x188   : > { %v542_v5 = vadd.f32 %v539_v48, %v528_v2 }
 0x189   : > { %v541_v8 = vadd.f32 %v534_v49, %v527_v4 }
 0x18a   : > { %vm544_vm5 = vcmp.ge.f32.partialorder %v542_v5, 0.0  ;;  %v547_v9 = vmul.f32 %v545_v3, %v542_v5 }
 0x18b   : > { %vm543_vm6 = vcmp.ge.f32.partialorder %v541_v8, 0.0  ;;  %v546_v10 = vmul.f32 %v545_v3, %v541_v8 }
 0x18c   : > { %v549_v11 = vsel %vm544_vm5, %v542_v5, %v547_v9  ;;  %v865_v9 = vstv %s1149_s17  ;;  %s1024_s17 = sshll.u32 %s340_s14, 4  ;;  %s1693_s17 = int_to_ptr.vmem [resolvable:$true] %s1024_s17 }
 0x18d   : > { %v548_v12 = vsel %vm543_vm6, %v541_v8, %v546_v10  ;;  %p1343_p13 = scmp.lt.s32.totalorder %s1693_s17, %s1341_s22 }
 0x18e   : > { %v1242_v13 = vpack.c.bf16 %v549_v11, %v548_v12 }
 0x190   : > { %1243 = vmatprep.subr.bf16.mxu0 %v1242_v13  ;;  %1254 = vmatprep.subr.bf16.mxu1 %v1242_v13 }
 0x191   : > { %1245 = vmatpush3.bf16.msra.mxu0 %v1242_v13  ;;  %1255 = vmatpush3.bf16.msra.mxu1 %v1242_v13 }
 0x193   : > { %v566_v16 = vpop.permute.xlu1 %565 }
 0x194   : > { %1216 = vmatmul.mubr.msk.f32.vlgmr.msra.gmra.mrb[2].mxu0 %vm378_vm0, %v551_v14  ;;  %v561_v18 = vpop.permute.xlu0 %560  ;;  %1219 = vmatmul.mubr.msk.f32.vlgmr.msra.gmra.mrb[0].mxu1 %vm378_vm0, %v553_v33 }
 0x195   : > { %1225 = vmatprep.mubr.msk.f32.mxu0 %vm378_vm0, %v1150_v15  ;;  %1232 = vmatprep.mubr.msk.f32.mxu1 %vm378_vm0, %v1164_v38 }
 0x197   : > { %v695_v26 = vpop.permute.xlu1 %694 }
 0x19b   : > { %v803_v44 = vpop.permute.xlu1 %802 }
 0x19f   : > { %v818_v46 = vpop.permute.xlu1 %817 }
 0x1a3   : > { %v842_v49 = vpop.permute.xlu1 %841 }
 0x1a7   : > { %v859_v51 = vpop.permute.xlu1 %858 }
 0x267   : > { %v1217_v17 = vpop.f32.mrb[2].mxu0 }
 0x268   : > { %v662_v19 = vadd.f32 %v1217_v17, %v566_v16  ;;  %v656_v20 = vpop.f32.mrb[3].mxu0  ;;  %v1165_v16 = vld [vmem:[%s1758_s6 + $0x28] sm:$0xff]  ;;  %v1166_v17 = vld [vmem:[%s1758_s6 + $0x30] sm:$0xff] }
 0x269   : > { %v657_v21 = vadd.f32 %v656_v20, %v561_v18  ;;  %v1167_v18 = vld [vmem:[%s1758_s6 + $0x38] sm:$0xff] }
 0x26a   : > { %v1636_v22 = vadd.f32 %v662_v19, %v1557_v7  ;;  %v690_v7 = vpop.permute.xlu0 %689 }
 0x26b   : > { %v1639_v23 = vadd.f32 %v657_v21, %v1555_v6 }
 0x26d   : > { %v1246_v24 = vpack.c.bf16 %v1636_v22, %v1639_v23 }
 0x26e   : > { %v798_v45 = vpop.permute.xlu0 %797 }
 0x26f   : > { %1247 = vmatprep.subr.bf16.mxu0 %v1246_v24 }
 0x270   : > { %1249 = vmatpush3.bf16.msra.mxu0 %v1246_v24 }
 0x272   : > { %v813_v48 = vpop.permute.xlu0 %812 }
 0x273   : > { %1226 = vmatmul.mubr.msk.f32.vlgmr.msra.gmra.mrb[4].mxu0 %vm378_vm0, %v1151_v25 }
 0x276   : > { %v837_v50 = vpop.permute.xlu0 %836 }
 0x27a   : > { %v854_v52 = vpop.permute.xlu0 %853 }
 0x346   : > { %v1227_v27 = vpop.f32.mrb[4].mxu0 }
 0x347   : > { %v775_v29 = vadd.f32 %v1227_v27, %v695_v26  ;;  %v769_v30 = vpop.f32.mrb[5].mxu0 }
 0x348   : > { %v770_v6 = vadd.f32 %v769_v30, %v690_v7 }
 0x349   : > { %v782_v31 = vmul.f32 %v780_v28, %v775_v29  ;;  %vm779_vm7 = vcmp.ge.f32.partialorder %v775_v29, 0.0 }
 0x34a   : > { %v781_v34 = vmul.f32 %v780_v28, %v770_v6  ;;  %vm778_vm8 = vcmp.ge.f32.partialorder %v770_v6, 0.0 }
 0x34b   : > { %v784_v35 = vsel %vm779_vm7, %v775_v29, %v782_v31 }
 0x34c   : > { %790 = vrot.lane.b32.xlu1 %v784_v35, %s1408_s25  ;;  %v783_v36 = vsel %vm778_vm8, %v770_v6, %v781_v34  ;;  %v821_v59 = vmul.f32 %v818_v46, %v784_v35 }
 0x34d   : > { %788 = vrot.lane.b32.xlu0 %v783_v36, %s1408_s25  ;;  %v820_v61 = vmul.f32 %v813_v48, %v783_v36  ;;  %s1701_s25 = scalar_lea.vmem %s1761_s9, %s1181_s24  ;;  %s1336_s24 = scalar_lea.vmem %s1693_s17, 256 }
 0x34e   : > { %p1337_p9 = scmp.ne.s32.totalorder %s1693_s17, %s1336_s24  ;;  %p1344_p0 = scmp.lt.s32.totalorder %s1342_s23, %s1336_s24 }
 0x350   : > { %829 = vrot.lane.b32.xlu1 %v784_v35, %s1409_s26  ;;  %p1338_p10 = pnand %p1337_p9, %p1501_p5  ;;  %p1345_p1 = por %p1344_p0, %p1343_p13 }
 0x351   : > { %827 = vrot.lane.b32.xlu0 %v783_v36, %s1409_s26 }
 0x352   : > { %p1339_p12 = pneg %p1338_p10 }
 0x354   : > { %887 = vperm.xlu1 %1320, %v1169_v37   ;;  %p1346_p2 = pnand %p1345_p1, %p1339_p12 }
 0x355   : > { %882 = vperm.xlu0 %1319, %v1168_v39  }
 0x358   : > { %575 = vperm.xlu1 %1320, %v557_v40  }
 0x359   : > { %570 = vperm.xlu0 %1319, %v556_v41  }
 0x35c   : > { %897 = vperm.xlu1 %1320, %v1171_v42  }
 0x35d   : > { %892 = vperm.xlu0 %1319, %v1170_v43  }
 0x3be   : > { %v791_v53 = vpop.permute.xlu1 %790 }
 0x3bf   : > { %v794_v54 = vsel %vm792_vm9, %v791_v53, 0.0  ;;  %v789_v55 = vpop.permute.xlu0 %788 }
 0x3c0   : > { %v806_v56 = vmul.f32 %v803_v44, %v794_v54  ;;  %v793_v57 = vsel %vm792_vm9, %v789_v55, 0.0 }
 0x3c1   : > { %v805_v58 = vmul.f32 %v798_v45, %v793_v57 }
 0x3c2   : > { %v830_v60 = vpop.permute.xlu1 %829  ;;  %v823_v0 = vadd.f32 %v821_v59, %v806_v56 }
 0x3c3   : > { %v833_v62 = vsel %vm831_vm10, %v830_v60, 0.0  ;;  %v828_v63 = vpop.permute.xlu0 %827  ;;  %v822_v3 = vadd.f32 %v820_v61, %v805_v58 }
 0x3c4   : > { %v845_v1 = vmul.f32 %v842_v49, %v833_v62  ;;  %v832_v2 = vsel %vm831_vm10, %v828_v63, 0.0 }
 0x3c5   : > { %v844_v4 = vmul.f32 %v837_v50, %v832_v2 }
 0x3c6   : > { %v847_v5 = vadd.f32 %v845_v1, %v823_v0 }
 0x3c7   : > { %v846_v8 = vadd.f32 %v844_v4, %v822_v3 }
 0x3c8   : > { %v862_v10 = vadd.f32 %v859_v51, %v847_v5 }
 0x3c9   : > { %v861_v11 = vadd.f32 %v854_v52, %v846_v8 }
 0x3ca   : > { %vm864_vm11 = vcmp.ge.f32.partialorder %v862_v10, 0.0  ;;  %v867_v12 = vmul.f32 %v865_v9, %v862_v10 }
 0x3cb   : > { %vm863_vm12 = vcmp.ge.f32.partialorder %v861_v11, 0.0  ;;  %v866_v47 = vmul.f32 %v865_v9, %v861_v11 }
 0x3cc   : > { %v869_v13 = vsel %vm864_vm11, %v862_v10, %v867_v12 }
 0x3cd   : > { %v868_v14 = vsel %vm863_vm12, %v861_v11, %v866_v47 }
 0x3ce   : > { %v1250_v15 = vpack.c.bf16 %v869_v13, %v868_v14 }
 0x3d0   : > { %1251 = vmatprep.subr.bf16.mxu1 %v1250_v15 }
 0x3d1   : > { %1253 = vmatpush3.bf16.msra.mxu1 %v1250_v15 }
 0x3d3   : > { %v888_v19 = vpop.permute.xlu1 %887 }
 0x3d4   : > { %1233 = vmatmul.mubr.msk.f32.vlgmr.msra.gmra.mrb[2].mxu1 %vm378_vm0, %v1165_v16  ;;  %v883_v20 = vpop.permute.xlu0 %882 }
 0x3d5   : > { %1235 = vmatprep.mubr.msk.f32.mxu1 %vm378_vm0, %v1166_v17 }
 0x3d7   : > { %v576_v21 = vpop.permute.xlu1 %575 }
 0x3d8   : > { %1236 = vmatmul.mubr.msk.f32.gmra.mrb[0].mxu1 %vm378_vm0, %v1167_v18  ;;  %v571_v24 = vpop.permute.xlu0 %570 }
 0x3db   : > { %v898_v25 = vpop.permute.xlu1 %897 }
 0x3dc   : > { %v893_v27 = vpop.permute.xlu0 %892  ;;  %v1256_v30 = vadd.f32 %v898_v25, %v576_v21 }
 0x3dd   : > { %v1258_v31 = vadd.f32 %v893_v27, %v571_v24 }
 0x4a7   : > { %v1234_v26 = vpop.f32.mrb[2].mxu1 }
 0x4a8   : > { %v984_v28 = vadd.f32 %v1234_v26, %v888_v19  ;;  %v978_v7 = vpop.f32.mrb[3].mxu1 }
 0x4a9   : > { %v979_v29 = vadd.f32 %v978_v7, %v883_v20 }
 0x4aa   : > { %v998_v6 = vadd.f32 %v984_v28, %v1636_v22 }
 0x4ab   : > { %v997_v32 = vadd.f32 %v979_v29, %v1639_v23  ;;  %v1237_v33 = vpop.f32.mrb[0].mxu1 }
 0x4ac   : > { %1002 = vst [vmem:[%s340_s14 + $0x8] sm:$0xff] %v998_v6  ;;  %v1257_v34 = vadd.f32 %v1256_v30, %v1237_v33  ;;  %v988_v22 = vpop.f32.mrb[1].mxu1 }
 0x4ad   : > { %1001 = vst [vmem:[%s340_s14] sm:$0xff] %v997_v32  ;;  %v1259_v35 = vadd.f32 %v1258_v31, %v988_v22 }
 0x4ae   : > { %1004 = vst [vmem:[%s1701_s25 + $0x8] sm:$0xff] %v1257_v34 }
 0x4af   : > { %1349 = shalt.err (!%p1346_p2)
}
 0x4b0   : > { %s1350_s28 = scalar_lea.hbm %s1707_s27, 256  ;;  %s1354_s13 = scalar_lea.hbm %s1760_s8, 512 }
 0x4b1   : > { %p1351_p3 = scmp.ne.s32.totalorder %s1707_s27, %s1350_s28  ;;  %p1355_p8 = scmp.lt.u32.totalorder %s1707_s27, %s1760_s8 }
 0x4b2   : > { %p1356_p11 = scmp.lt.u32.totalorder %s1354_s13, %s1350_s28  ;;  %p1358_p10 = scmp.lt.u32.totalorder %s1350_s28, %s1707_s27 }
 0x4b3   : > { %p1352_p4 = pnand %p1351_p3, %p1501_p5 }
 0x4b4   : > { %p1357_p9 = por %p1356_p11, %p1355_p8 }
 0x4b5   : > { %p1353_p7 = pneg %p1352_p4 }
 0x4b6   : > { %p1359_p12 = por %p1358_p10, %p1357_p9 }
 0x4b8   : > { %p1360_p13 = pnand %p1359_p12, %p1353_p7 }
 0x4ba   : > { %1363 = shalt.err (!%p1360_p13)
}
 0x4bb   : > { %s1411_s24 = smov 128   ;;  %s1412_s22 = smov 8   ;;  %1003 = vst [vmem:[%s1701_s25] sm:$0xff] %v1259_v35 }
 0x4bc   : > { %1266 = dma.vmem_to_hbm [thread:$0]  (%p1501_p5), %s1693_s17, 256, %s1707_s27, %s1710_s16, %s1411_s24, %s1411_s24, %s1412_s22  }
 0x4bd PF: > { %p1278_p0 = scmp.ge.s32.totalorder %s1402_s12, 2  ;;  %s1042_s23 = sand.u32 1, %s1390_s30  }
 0x4be   : > { %s1043_s28 = scalar_lea.sflag [#allocation3], %s1042_s23 }
 0x4bf   : > { %p1273_p1 = pnand %p1278_p0, %p1505_p6 }
 0x4c1   : > { %1385 = dma.done.wait (!%p1273_p1), %s1043_s28, 256  }
 0x4c2   : > { %1387 = vsyncadd (!%p1273_p1), %s1043_s28, 4294967040  ;;  %p21_p2 = scmp.ge.s32.totalorder %s1488_s15, 4   ;;  %s1765_s30 = smov %s1394_s10 }
 0x4c3   : > { %s1766_s10 = smov %s1398_s11  ;;  %s1767_s11 = smov %s1499_s18 }
 0x4c4   : > { %s1768_s12 = smov %s1488_s15  ;;  %23 = sbr.rel (!%p21_p2) target bundleno = 4 (0x4), region = 114 }
 0x4cb   :  { %1056 = vsyncpa [#allocation3], 1 }
 0x4cc   :  { %1058 = vsyncpa [#allocation3 + $0x1], 1 }
 0x4cd   :  { %1059 = vsyncpa [#allocation4], 1 }
 0x4ce   :  { %1061 = vsyncpa [#allocation4 + $0x1], 1 }

</bundles_post_ra>
